<compile_context>
chip_gen: v6e
topology: v6e:2x2x1
jax: 0.10.0
libtpu: 0.0.40
codegen_flags: <defaults>
</compile_context>

<pallas_src>
import jax
import jax.numpy as jnp
from jax.experimental import pallas as pl
from jax.experimental.pallas import tpu as pltpu


# ----------------------------------------------------------------------------
# Helpers / planning
# ----------------------------------------------------------------------------
def _round_up(a, b):
    return (a + b - 1) // b * b


def _divisors_desc(n):
    return [d for d in range(n, 0, -1) if n % d == 0]


def _vmem_budget_bytes():
    """Generation-aware VMEM limit (v5e/v6e: 128 MiB physical, v7x: 64 MiB)."""
    cap = None
    try:
        info = pltpu.get_tpu_info()
        cap = getattr(info, "vmem_capacity_bytes", None)
    except Exception:
        cap = None
    if not cap or cap <= 0:
        cap = 64 * 1024 * 1024  # conservative: v7x per-core VMEM
    return int(max(32 * 1024 * 1024, min(cap * 3 // 4, 96 * 1024 * 1024)))


_VMEM_LIMIT = _vmem_budget_bytes()   # passed as vmem_limit_bytes
_PLAN_BYTES = _VMEM_LIMIT // 2       # target working set for tile planning


def _pick_tn(Np):
    if Np < 128:
        return Np
    for t in (512, 256, 128):
        if Np % t == 0:
            return t
    return Np


def _plan_direct(H, W, Wp8, Cin, Np, budget, max_ht=None):
    """Pick (Ht, tk, tn) for the halo-tiled direct 3x3 conv kernel."""
    tn_list = [t for t in (512, 256, 128) if Np % t == 0] or [Np]
    if Cin >= 128 and Cin % 128 == 0:
        tk_list = [t for t in (512, 256, 128) if Cin % t == 0]
    else:
        tk_list = [Cin]
    ht_cap = H if max_ht is None else max(1, min(H, max_ht))

    def cost(ht, tk, tn):
        return (2 * (ht + 2) * Wp8 * tk * 2    # x halo tile (bf16, double-buffered)
                + 2 * 9 * tk * tn * 2          # weights (bf16, double-buffered)
                + 2 * ht * W * tn * 2          # output tile (bf16, double-buffered)
                + 2 * ht * W * tn * 4)         # f32 accumulator (+ live chained value)

    for tn in tn_list:
        for tk in tk_list:
            for ht in _divisors_desc(H):
                if ht <= ht_cap and cost(ht, tk, tn) <= budget:
                    return ht, tk, tn
    return 1, tk_list[-1], tn_list[-1]


def _plan_matmul(M, Kp, Np, budget, max_tm=None):
    """Pick (tm, tk, tn) for the M-tiled fused matmul path."""
    tn = _pick_tn(Np)
    tk = next((t for t in (512, 256, 128) if Kp % t == 0), Kp)

    def cost(tm):
        return 2 * tm * tk * 2 + 2 * tk * tn * 2 + 2 * tm * tn * 2 + 2 * tm * tn * 4

    Mr = _round_up(max(M, 1), 8)
    cap = Mr if max_tm is None else max(8, min(Mr, _round_up(max_tm, 8)))
    if max_tm is None and Mr <= 1024 and cost(Mr) <= budget:
        return Mr, tk, tn
    for tm in (1024, 512, 256, 128, 64, 32, 16, 8):
        if tm <= cap and cost(tm) <= budget:
            return tm, tk, tn
    return 8, tk, tn


# ----------------------------------------------------------------------------
# Pallas kernel 1: direct 3x3 conv on a halo H-tile (9 chained MXU dots)
#   x block : (Ht+2, Wp8, tk) bf16, w: (9, tk, tn) bf16, sb: (2, tn) f32
#   o block : (Ht*W, tn), acc scratch (Ht*W, tn) f32
# grid = (N*nH, Np//tn, Cin//tk); last axis is the reduction.
# ----------------------------------------------------------------------------
def _make_direct_conv_kernel(ht, ww, leaky):
    def kernel(x_ref, w_ref, sb_ref, o_ref, acc_ref):
        kstep = pl.program_id(2)

        @pl.when(kstep == 0)
        def _init():
            acc_ref[...] = jnp.zeros_like(acc_ref)

        acc = acc_ref[...]
        # Hoist the three dx-shifted slabs (one sublane relayout each) and reuse
        # them across dy (major-axis slices are free): <=3 relayouts, not 9.
        for dx in range(3):
            slab = x_ref[:, dx:dx + ww, :]                 # (ht+2, ww, tk)
            for dy in range(3):
                xs = slab[dy:dy + ht].reshape(ht * ww, slab.shape[-1])
                acc = acc + jnp.dot(xs, w_ref[dy * 3 + dx],
                                    preferred_element_type=jnp.float32)
        acc_ref[...] = acc

        @pl.when(kstep == pl.num_programs(2) - 1)
        def _epilogue():
            y = acc_ref[...] * sb_ref[0:1, :] + sb_ref[1:2, :]
            if leaky:
                y = jnp.where(y >= 0.0, y, 0.1 * y)
            o_ref[...] = y.astype(o_ref.dtype)

    return kernel


# ----------------------------------------------------------------------------
# Pallas kernel 2: M-tiled fused matmul + folded-BN affine (+ LeakyReLU)
#   x: (tm, tk) bf16, w: (tk, tn) bf16, sb: (2, tn) f32, o: (tm, tn)
# grid = (Mp//tm, Np//tn, Kp//tk); last axis is the reduction.
# ----------------------------------------------------------------------------
def _make_matmul_conv_kernel(leaky):
    def kernel(x_ref, w_ref, sb_ref, o_ref, acc_ref):
        kstep = pl.program_id(2)

        @pl.when(kstep == 0)
        def _init():
            acc_ref[...] = jnp.zeros_like(acc_ref)

        acc_ref[...] += jnp.dot(x_ref[...], w_ref[...],
                                preferred_element_type=jnp.float32)

        @pl.when(kstep == pl.num_programs(2) - 1)
        def _epilogue():
            y = acc_ref[...] * sb_ref[0:1, :] + sb_ref[1:2, :]
            if leaky:
                y = jnp.where(y >= 0.0, y, 0.1 * y)
            o_ref[...] = y.astype(o_ref.dtype)

    return kernel


# ----------------------------------------------------------------------------
# Conv + folded BN + LeakyReLU wrapper
#   x : (N, H, W, Cin) (cast to bf16 here)
#   wt: (ksize*ksize, Cin, Cout) bf16
#   scale/bias: (Cout,) f32
# ----------------------------------------------------------------------------
def conv_bn_act(x, wt, scale, bias, ksize, *, leaky=True, out_dtype=jnp.bfloat16,
                max_ht=None, max_tm=None):
    N, H, W, Cin = x.shape
    Cout = wt.shape[-1]
    Np = Cout if (Cout < 128 or Cout % 128 == 0) else _round_up(Cout, 128)

    sb = jnp.stack([jnp.pad(scale, (0, Np - Cout)),
                    jnp.pad(bias, (0, Np - Cout))]).astype(jnp.float32)  # (2, Np)
    x = x.astype(jnp.bfloat16)

    use_direct = (ksize == 3) and (W % 8 == 0) and (Cin >= 32)

    if use_direct:
        Wp8 = _round_up(W + 2, 8)
        Ht, tk, tn = _plan_direct(H, W, Wp8, Cin, Np, _PLAN_BYTES, max_ht=max_ht)
        nH = H // Ht

        wp = jnp.pad(wt, ((0, 0), (0, 0), (0, Np - Cout)))            # (9, Cin, Np)
        xp = jnp.pad(x, ((0, 0), (1, 1), (1, Wp8 - W - 1), (0, 0)))   # (N, H+2, Wp8, Cin)
        if nH > 1:
            xt = jnp.stack([xp[:, i * Ht:i * Ht + Ht + 2] for i in range(nH)], axis=1)
            xt = xt.reshape(N * nH, Ht + 2, Wp8, Cin)
        else:
            xt = xp
        NT = N * nH

        out = pl.pallas_call(
            _make_direct_conv_kernel(Ht, W, leaky),
            out_shape=jax.ShapeDtypeStruct((NT, Ht * W, Np), out_dtype),
            grid_spec=pltpu.PrefetchScalarGridSpec(
                num_scalar_prefetch=0,
                grid=(NT, Np // tn, Cin // tk),
                in_specs=[
                    pl.BlockSpec((None, Ht + 2, Wp8, tk), lambda t, j, k: (t, 0, 0, k)),
                    pl.BlockSpec((9, tk, tn), lambda t, j, k: (0, k, j)),
                    pl.BlockSpec((2, tn), lambda t, j, k: (0, j)),
                ],
                out_specs=pl.BlockSpec((None, Ht * W, tn), lambda t, j, k: (t, 0, j)),
                scratch_shapes=[pltpu.VMEM((Ht * W, tn), jnp.float32)],
            ),
            compiler_params=pltpu.CompilerParams(
                dimension_semantics=("parallel", "parallel", "arbitrary"),
                vmem_limit_bytes=_VMEM_LIMIT,
            ),
        )(xt, wp, sb)
        out = out.reshape(N, H, W, Np)
        return out[..., :Cout] if Np != Cout else out

    # --- im2col / 1x1 fused matmul path (M-tiled) ----------------------------
    if ksize == 3:
        xp = jnp.pad(x, ((0, 0), (1, 1), (1, 1), (0, 0)))
        xm = jnp.concatenate(
            [xp[:, dy:dy + H, dx:dx + W, :] for dy in range(3) for dx in range(3)],
            axis=-1).reshape(N * H * W, 9 * Cin)
        wm = wt.reshape(9 * Cin, Cout)
    else:  # 1x1
        xm = x.reshape(N * H * W, Cin)
        wm = wt[0]

    M, Ktot = xm.shape
    Kp = _round_up(Ktot, 128)
    tm, tk, tn = _plan_matmul(M, Kp, Np, _PLAN_BYTES, max_tm=max_tm)
    Mp = _round_up(M, tm)

    if (Mp, Kp) != (M, Ktot):
        xm = jnp.pad(xm, ((0, Mp - M), (0, Kp - Ktot)))
    if (Kp, Np) != (Ktot, Cout):
        wm = jnp.pad(wm, ((0, Kp - Ktot), (0, Np - Cout)))

    out = pl.pallas_call(
        _make_matmul_conv_kernel(leaky),
        out_shape=jax.ShapeDtypeStruct((Mp, Np), out_dtype),
        grid_spec=pltpu.PrefetchScalarGridSpec(
            num_scalar_prefetch=0,
            grid=(Mp // tm, Np // tn, Kp // tk),
            in_specs=[
                pl.BlockSpec((tm, tk), lambda i, j, k: (i, k)),
                pl.BlockSpec((tk, tn), lambda i, j, k: (k, j)),
                pl.BlockSpec((2, tn), lambda i, j, k: (0, j)),
            ],
            out_specs=pl.BlockSpec((tm, tn), lambda i, j, k: (i, j)),
            scratch_shapes=[pltpu.VMEM((tm, tn), jnp.float32)],
        ),
        compiler_params=pltpu.CompilerParams(
            dimension_semantics=("parallel", "parallel", "arbitrary"),
            vmem_limit_bytes=_VMEM_LIMIT,
        ),
    )(xm, wm, sb)
    if Mp != M or Np != Cout:
        out = out[:M, :Cout]
    return out.reshape(N, H, W, Cout)


# ----------------------------------------------------------------------------
# Pallas kernel 3: fused 2x2 stride-2 max pool (subsampling done in-kernel)
# ----------------------------------------------------------------------------
def _make_maxpool_kernel(th, wo):
    def kernel(x_ref, o_ref):
        # x_ref: (2*th, W, C).  Columns pooled via two stride-2 sublane loads,
        # rows pooled via a free major-axis reshape + max.
        if wo > 1:
            even = x_ref[:, pl.ds(0, wo, 2), :]
            odd = x_ref[:, pl.ds(1, wo, 2), :]
        else:
            even = x_ref[:, 0:1, :]
            odd = x_ref[:, 1:2, :]
        r = jnp.maximum(even, odd)                  # (2*th, wo, C)
        r = r.reshape(th, 2, wo, r.shape[-1])
        o_ref[...] = jnp.maximum(r[:, 0], r[:, 1])  # (th, wo, C)
    return kernel


def maxpool2x2(x):
    N, H, W, C = x.shape
    Ho, Wo = H // 2, W // 2
    row_bytes = 10 * W * C * x.dtype.itemsize  # ~ per-output-row VMEM (with db)
    cap = max(1, min(Ho, (_PLAN_BYTES // 4) // max(1, row_bytes)))
    th = next(d for d in _divisors_desc(Ho) if d <= cap)

    return pl.pallas_call(
        _make_maxpool_kernel(th, Wo),
        out_shape=jax.ShapeDtypeStruct((N, Ho, Wo, C), x.dtype),
        grid=(N, Ho // th),
        in_specs=[pl.BlockSpec((None, 2 * th, W, C), lambda n, i: (n, i, 0, 0))],
        out_specs=pl.BlockSpec((None, th, Wo, C), lambda n, i: (n, i, 0, 0)),
        compiler_params=pltpu.CompilerParams(
            dimension_semantics=("parallel", "parallel"),
            vmem_limit_bytes=_VMEM_LIMIT,
        ),
    )(x)


def reorg_nhwc(x):
    """YOLOv2 reorg (stride 2); matches the PyTorch module's reorg_layer (NHWC)."""
    N, H, W, C = x.shape
    nh, nw = H // 2, W // 2
    x = x.reshape(N, nh, 2, nw, 2, C)
    x = jnp.transpose(x, (0, 1, 3, 2, 4, 5))
    return x.reshape(N, nh, nw, 4 * C)


# ----------------------------------------------------------------------------
# Parameters (deterministic synthetic init; BN folded to scale/bias, eps=1e-5)
# ----------------------------------------------------------------------------
_CONV_CFG = [  # (cin, cout, ksize)
    (3, 32, 3), (32, 64, 3), (64, 128, 3), (128, 64, 1), (64, 128, 3),
    (128, 256, 3), (256, 128, 1), (128, 256, 3),
    (256, 512, 3), (512, 256, 1), (256, 512, 3), (512, 256, 1), (256, 512, 3),
    (512, 1024, 3), (1024, 512, 1), (512, 1024, 3), (1024, 512, 1), (512, 1024, 3),
    (1024, 1024, 3), (1024, 1024, 3),
    (3072, 1024, 3),
    (1024, 125, 1),  # conv22: has bias, no BN, no activation
]
_BN_EPS = 1e-5


def init_params(key):
    params = []
    for idx, (cin, cout, k) in enumerate(_CONV_CFG):
        key, kw, kg, kb, km, kv, kcb = jax.random.split(key, 7)
        std = (2.0 / (cin * k * k)) ** 0.5
        w = std * jax.random.normal(kw, (cout, cin, k, k), jnp.float32)
        if idx < 21:  # conv1..conv21 are followed by BatchNorm (inference mode)
            gamma = 1.0 + 0.1 * jax.random.normal(kg, (cout,), jnp.float32)
            beta = 0.1 * jax.random.normal(kb, (cout,), jnp.float32)
            mean = 0.1 * jax.random.normal(km, (cout,), jnp.float32)
            var = 0.5 + jnp.abs(jax.random.normal(kv, (cout,), jnp.float32))
            scale = gamma / jnp.sqrt(var + _BN_EPS)
            bias = beta - mean * scale
        else:  # conv22: plain conv with bias
            scale = jnp.ones((cout,), jnp.float32)
            bias = 0.01 * jax.random.normal(kcb, (cout,), jnp.float32)
        params.append((w, scale, bias))
    return params


def prepare_params(raw_params):
    """(Cout, Cin, kh, kw) f32 -> (kh*kw, Cin, Cout) bf16; keep f32 scale/bias."""
    prepped = []
    for (w, scale, bias), (cin, cout, k) in zip(raw_params, _CONV_CFG):
        wt = jnp.transpose(w, (2, 3, 1, 0)).reshape(k * k, cin, cout)
        prepped.append((wt.astype(jnp.bfloat16),
                        scale.astype(jnp.float32), bias.astype(jnp.float32)))
    return prepped


# ----------------------------------------------------------------------------
# Full forward (NCHW in/out; bf16 intermediates, f32 final output)
# ----------------------------------------------------------------------------
@jax.jit
def yolov2_forward(x_nchw, params):
    x = jnp.transpose(x_nchw, (0, 2, 3, 1)).astype(jnp.bfloat16)  # -> NHWC bf16

    def conv(i, t, leaky=True, out_dtype=jnp.bfloat16):
        wt, s, b = params[i]
        return conv_bn_act(t, wt, s, b, _CONV_CFG[i][2], leaky=leaky,
                           out_dtype=out_dtype)

    out = maxpool2x2(conv(0, x))
    out = maxpool2x2(conv(1, out))
    out = conv(2, out)
    out = conv(3, out)
    out = conv(4, out)
    out = maxpool2x2(out)
    out = conv(5, out)
    out = conv(6, out)
    out = conv(7, out)
    out = maxpool2x2(out)
    out = conv(8, out)
    out = conv(9, out)
    out = conv(10, out)
    out = conv(11, out)
    out = conv(12, out)
    passthrough = reorg_nhwc(out)
    out = maxpool2x2(out)
    out = conv(13, out)
    out = conv(14, out)
    out = conv(15, out)
    out = conv(16, out)
    out = conv(17, out)
    out = conv(18, out)
    out = conv(19, out)
    out = jnp.concatenate([passthrough, out], axis=-1)   # channel concat (NHWC)
    out = conv(20, out)
    out = conv(21, out, leaky=False, out_dtype=jnp.float32)  # conv22
    return jnp.transpose(out, (0, 3, 1, 2)).astype(jnp.float32)  # back to NCHW


# ----------------------------------------------------------------------------
# Pure-XLA f32 reference matching the kernels' bf16 rounding points
# ----------------------------------------------------------------------------
def _rnd_bf16(t):
    return t.astype(jnp.bfloat16).astype(jnp.float32)


def _conv_ref_nhwc(x, w_oihw, scale, bias, ksize, leaky=True):
    p = (ksize - 1) // 2
    y = jax.lax.conv_general_dilated(
        _rnd_bf16(x.astype(jnp.float32)),
        jnp.transpose(_rnd_bf16(w_oihw.astype(jnp.float32)), (2, 3, 1, 0)),
        window_strides=(1, 1), padding=((p, p), (p, p)),
        dimension_numbers=("NHWC", "HWIO", "NHWC"),
        precision=jax.lax.Precision.HIGHEST)
    y = y * scale + bias
    if leaky:
        y = jnp.where(y >= 0.0, y, 0.1 * y)
    return y


@jax.jit
def yolov2_reference(x_nchw, raw_params):
    x = _rnd_bf16(jnp.transpose(x_nchw, (0, 2, 3, 1)).astype(jnp.float32))

    def conv(i, t, leaky=True, final=False):
        w, s, b = raw_params[i]
        y = _conv_ref_nhwc(t, w, s, b, _CONV_CFG[i][2], leaky=leaky)
        return y if final else _rnd_bf16(y)

    def pool(t):
        return jax.lax.reduce_window(t, -jnp.inf, jax.lax.max,
                                     (1, 2, 2, 1), (1, 2, 2, 1), "VALID")

    out = pool(conv(0, x))
    out = pool(conv(1, out))
    out = conv(2, out)
    out = conv(3, out)
    out = conv(4, out)
    out = pool(out)
    out = conv(5, out)
    out = conv(6, out)
    out = conv(7, out)
    out = pool(out)
    out = conv(8, out)
    out = conv(9, out)
    out = conv(10, out)
    out = conv(11, out)
    out = conv(12, out)
    passthrough = reorg_nhwc(out)
    out = pool(out)
    out = conv(13, out)
    out = conv(14, out)
    out = conv(15, out)
    out = conv(16, out)
    out = conv(17, out)
    out = conv(18, out)
    out = conv(19, out)
    out = jnp.concatenate([passthrough, out], axis=-1)
    out = conv(20, out)
    out = conv(21, out, leaky=False, final=True)
    return jnp.transpose(out, (0, 3, 1, 2))


def _rel_l2(a, b):
    a = jnp.asarray(a, jnp.float32)
    b = jnp.asarray(b, jnp.float32)
    return float(jnp.linalg.norm(a - b) / (jnp.linalg.norm(b) + 1e-12))


if __name__ == "__main__":
    key = jax.random.PRNGKey(0)
    key, kin, k1, k2, k3, k4, k5, k6, k7, k8 = jax.random.split(key, 10)

    # --- targeted check: direct 3x3 conv with a forced halo H split (nH = 3) --
    xh = jax.random.normal(k1, (1, 48, 16, 64), jnp.float32)
    wh = 0.1 * jax.random.normal(k2, (128, 64, 3, 3), jnp.float32)
    sh = 1.0 + 0.1 * jax.random.normal(k3, (128,), jnp.float32)
    bh = 0.1 * jax.random.normal(k4, (128,), jnp.float32)
    wth = jnp.transpose(wh, (2, 3, 1, 0)).reshape(9, 64, 128).astype(jnp.bfloat16)
    y_k = conv_bn_act(xh, wth, sh, bh, 3, leaky=True,
                      out_dtype=jnp.float32, max_ht=16)
    y_r = _conv_ref_nhwc(xh, wh, sh, bh, 3, leaky=True)
    assert _rel_l2(y_k, y_r) < 1e-2, f"halo-tiled conv mismatch: {_rel_l2(y_k, y_r)}"

    # --- targeted check: 1x1 conv through the M-tiled matmul path (4 M tiles) -
    x1 = jax.random.normal(k5, (2, 16, 16, 128), jnp.float32)
    w1 = 0.1 * jax.random.normal(k6, (256, 128, 1, 1), jnp.float32)
    s1 = 1.0 + 0.1 * jax.random.normal(k7, (256,), jnp.float32)
    b1 = 0.1 * jax.random.normal(k8, (256,), jnp.float32)
    wt1 = jnp.transpose(w1, (2, 3, 1, 0)).reshape(1, 128, 256).astype(jnp.bfloat16)
    z_k = conv_bn_act(x1, wt1, s1, b1, 1, leaky=True,
                      out_dtype=jnp.float32, max_tm=128)
    z_r = _conv_ref_nhwc(x1, w1, s1, b1, 1, leaky=True)
    assert _rel_l2(z_k, z_r) < 1e-2, f"M-tiled matmul mismatch: {_rel_l2(z_k, z_r)}"

    # --- end-to-end smoke test (smallest spatial compatible with 5 pools) -----
    batch, cin, hw = 2, 3, 32
    x = jax.random.normal(kin, (batch, cin, hw, hw), jnp.float32)
    raw_params = init_params(key)
    params = prepare_params(raw_params)

    out = jax.block_until_ready(yolov2_forward(x, params))
    assert out.shape == (batch, 125, hw // 32, hw // 32), out.shape
    assert out.dtype == jnp.float32
    assert bool(jnp.all(jnp.isfinite(out)))

    ref = jax.block_until_ready(yolov2_reference(x, raw_params))
    err = _rel_l2(out, ref)
    assert err < 2e-2, f"relative L2 error vs f32 reference too large: {err}"

    print("KERNEL_OK")
</pallas_src>

<mosaic_0001>
module attributes {stable_mosaic.version = 11 : i64} {
  func.func @kernel(%arg0: i32, %arg1: i32, %arg2: i32, %arg3: memref<1x18x24x64xbf16, #tpu.memory_space<vmem>>, %arg4: memref<9x64x128xbf16, #tpu.memory_space<vmem>>, %arg5: memref<2x128xf32, #tpu.memory_space<vmem>>, %arg6: memref<1x256x128xf32, #tpu.memory_space<vmem>>, %arg7: memref<256x128xf32, #tpu.memory_space<vmem>>) attributes {dimension_semantics = [#tpu.dimension_semantics<parallel>, #tpu.dimension_semantics<parallel>, #tpu.dimension_semantics<arbitrary>], iteration_bounds = array<i64: 3, 1, 1>, scalar_prefetch = 0 : i64, scratch_operands = 1 : i64, tpu.core_type = #tpu.core_type<tc>, window_params = [{transform_indices = @transform_0, window_bounds = array<i64: 1, 18, 24, 64>}, {transform_indices = @transform_1, window_bounds = array<i64: 9, 64, 128>}, {transform_indices = @transform_2, window_bounds = array<i64: 2, 128>}, {transform_indices = @transform_3, window_bounds = array<i64: 1, 256, 128>}]} {
    %c0_i32 = arith.constant 0 : i32
    %0 = arith.cmpi eq, %arg2, %c0_i32 : i32
    %1 = arith.extui %0 : i1 to i32
    %c0_i32_0 = arith.constant 0 : i32
    %2 = arith.cmpi ne, %1, %c0_i32_0 : i32
    scf.if %2 {
      %cst_45 = arith.constant 0.000000e+00 : f32
      %68 = vector.broadcast %cst_45 : f32 to vector<256x128xf32>
      %c0_46 = arith.constant 0 : index
      %c0_47 = arith.constant 0 : index
      %69 = vector.load %arg7[%c0_46, %c0_47] : memref<256x128xf32, #tpu.memory_space<vmem>>, vector<256x128xf32>
      tpu.vector_store %arg7[%c0_46, %c0_47], %68 {strides = array<i32>} : memref<256x128xf32, #tpu.memory_space<vmem>>, vector<256x128xf32>,
    } else {
    }
    %c0 = arith.constant 0 : index
    %c0_1 = arith.constant 0 : index
    %3 = vector.load %arg7[%c0, %c0_1] : memref<256x128xf32, #tpu.memory_space<vmem>>, vector<256x128xf32>
    %c0_2 = arith.constant 0 : index
    %c0_3 = arith.constant 0 : index
    %c0_4 = arith.constant 0 : index
    %c0_5 = arith.constant 0 : index
    %4 = vector.load %arg3[%c0_2, %c0_3, %c0_4, %c0_5] : memref<1x18x24x64xbf16, #tpu.memory_space<vmem>>, vector<1x18x16x64xbf16>
    %5 = vector.shape_cast %4 : vector<1x18x16x64xbf16> to vector<18x16x64xbf16>
    %6 = vector.extract_strided_slice %5 {offsets = [0, 0, 0], sizes = [16, 16, 64], strides = [1, 1, 1]} : vector<18x16x64xbf16> to vector<16x16x64xbf16>
    %7 = vector.shape_cast %6 : vector<16x16x64xbf16> to vector<256x64xbf16>
    %c0_6 = arith.constant 0 : index
    %c0_7 = arith.constant 0 : index
    %c0_8 = arith.constant 0 : index
    %8 = vector.load %arg4[%c0_6, %c0_7, %c0_8] : memref<9x64x128xbf16, #tpu.memory_space<vmem>>, vector<1x64x128xbf16>
    %9 = vector.shape_cast %8 : vector<1x64x128xbf16> to vector<64x128xbf16>
    %cst = arith.constant dense<0.000000e+00> : vector<256x128xf32>
    %10 = tpu.matmul %7, %9, %cst {dimension_numbers = #tpu.dot_dimension_numbers<[1], [0], [0], [1], [0, 0, 1, 1], [], []>} : vector<256x64xbf16>, vector<64x128xbf16>, vector<256x128xf32> -> vector<256x128xf32>
    %11 = arith.addf %3, %10 : vector<256x128xf32>
    %12 = vector.extract_strided_slice %5 {offsets = [1, 0, 0], sizes = [16, 16, 64], strides = [1, 1, 1]} : vector<18x16x64xbf16> to vector<16x16x64xbf16>
    %13 = vector.shape_cast %12 : vector<16x16x64xbf16> to vector<256x64xbf16>
    %c3 = arith.constant 3 : index
    %c0_9 = arith.constant 0 : index
    %c0_10 = arith.constant 0 : index
    %14 = vector.load %arg4[%c3, %c0_9, %c0_10] : memref<9x64x128xbf16, #tpu.memory_space<vmem>>, vector<1x64x128xbf16>
    %15 = vector.shape_cast %14 : vector<1x64x128xbf16> to vector<64x128xbf16>
    %cst_11 = arith.constant dense<0.000000e+00> : vector<256x128xf32>
    %16 = tpu.matmul %13, %15, %cst_11 {dimension_numbers = #tpu.dot_dimension_numbers<[1], [0], [0], [1], [0, 0, 1, 1], [], []>} : vector<256x64xbf16>, vector<64x128xbf16>, vector<256x128xf32> -> vector<256x128xf32>
    %17 = arith.addf %11, %16 : vector<256x128xf32>
    %18 = vector.extract_strided_slice %5 {offsets = [2, 0, 0], sizes = [16, 16, 64], strides = [1, 1, 1]} : vector<18x16x64xbf16> to vector<16x16x64xbf16>
    %19 = vector.shape_cast %18 : vector<16x16x64xbf16> to vector<256x64xbf16>
    %c6 = arith.constant 6 : index
    %c0_12 = arith.constant 0 : index
    %c0_13 = arith.constant 0 : index
    %20 = vector.load %arg4[%c6, %c0_12, %c0_13] : memref<9x64x128xbf16, #tpu.memory_space<vmem>>, vector<1x64x128xbf16>
    %21 = vector.shape_cast %20 : vector<1x64x128xbf16> to vector<64x128xbf16>
    %cst_14 = arith.constant dense<0.000000e+00> : vector<256x128xf32>
    %22 = tpu.matmul %19, %21, %cst_14 {dimension_numbers = #tpu.dot_dimension_numbers<[1], [0], [0], [1], [0, 0, 1, 1], [], []>} : vector<256x64xbf16>, vector<64x128xbf16>, vector<256x128xf32> -> vector<256x128xf32>
    %23 = arith.addf %17, %22 : vector<256x128xf32>
    %c0_15 = arith.constant 0 : index
    %c0_16 = arith.constant 0 : index
    %c1 = arith.constant 1 : index
    %c0_17 = arith.constant 0 : index
    %24 = vector.load %arg3[%c0_15, %c0_16, %c1, %c0_17] : memref<1x18x24x64xbf16, #tpu.memory_space<vmem>>, vector<1x18x16x64xbf16>
    %25 = vector.shape_cast %24 : vector<1x18x16x64xbf16> to vector<18x16x64xbf16>
    %26 = vector.extract_strided_slice %25 {offsets = [0, 0, 0], sizes = [16, 16, 64], strides = [1, 1, 1]} : vector<18x16x64xbf16> to vector<16x16x64xbf16>
    %27 = vector.shape_cast %26 : vector<16x16x64xbf16> to vector<256x64xbf16>
    %c1_18 = arith.constant 1 : index
    %c0_19 = arith.constant 0 : index
    %c0_20 = arith.constant 0 : index
    %28 = vector.load %arg4[%c1_18, %c0_19, %c0_20] : memref<9x64x128xbf16, #tpu.memory_space<vmem>>, vector<1x64x128xbf16>
    %29 = vector.shape_cast %28 : vector<1x64x128xbf16> to vector<64x128xbf16>
    %cst_21 = arith.constant dense<0.000000e+00> : vector<256x128xf32>
    %30 = tpu.matmul %27, %29, %cst_21 {dimension_numbers = #tpu.dot_dimension_numbers<[1], [0], [0], [1], [0, 0, 1, 1], [], []>} : vector<256x64xbf16>, vector<64x128xbf16>, vector<256x128xf32> -> vector<256x128xf32>
    %31 = arith.addf %23, %30 : vector<256x128xf32>
    %32 = vector.extract_strided_slice %25 {offsets = [1, 0, 0], sizes = [16, 16, 64], strides = [1, 1, 1]} : vector<18x16x64xbf16> to vector<16x16x64xbf16>
    %33 = vector.shape_cast %32 : vector<16x16x64xbf16> to vector<256x64xbf16>
    %c4 = arith.constant 4 : index
    %c0_22 = arith.constant 0 : index
    %c0_23 = arith.constant 0 : index
    %34 = vector.load %arg4[%c4, %c0_22, %c0_23] : memref<9x64x128xbf16, #tpu.memory_space<vmem>>, vector<1x64x128xbf16>
    %35 = vector.shape_cast %34 : vector<1x64x128xbf16> to vector<64x128xbf16>
    %cst_24 = arith.constant dense<0.000000e+00> : vector<256x128xf32>
    %36 = tpu.matmul %33, %35, %cst_24 {dimension_numbers = #tpu.dot_dimension_numbers<[1], [0], [0], [1], [0, 0, 1, 1], [], []>} : vector<256x64xbf16>, vector<64x128xbf16>, vector<256x128xf32> -> vector<256x128xf32>
    %37 = arith.addf %31, %36 : vector<256x128xf32>
    %38 = vector.extract_strided_slice %25 {offsets = [2, 0, 0], sizes = [16, 16, 64], strides = [1, 1, 1]} : vector<18x16x64xbf16> to vector<16x16x64xbf16>
    %39 = vector.shape_cast %38 : vector<16x16x64xbf16> to vector<256x64xbf16>
    %c7 = arith.constant 7 : index
    %c0_25 = arith.constant 0 : index
    %c0_26 = arith.constant 0 : index
    %40 = vector.load %arg4[%c7, %c0_25, %c0_26] : memref<9x64x128xbf16, #tpu.memory_space<vmem>>, vector<1x64x128xbf16>
    %41 = vector.shape_cast %40 : vector<1x64x128xbf16> to vector<64x128xbf16>
    %cst_27 = arith.constant dense<0.000000e+00> : vector<256x128xf32>
    %42 = tpu.matmul %39, %41, %cst_27 {dimension_numbers = #tpu.dot_dimension_numbers<[1], [0], [0], [1], [0, 0, 1, 1], [], []>} : vector<256x64xbf16>, vector<64x128xbf16>, vector<256x128xf32> -> vector<256x128xf32>
    %43 = arith.addf %37, %42 : vector<256x128xf32>
    %c0_28 = arith.constant 0 : index
    %c0_29 = arith.constant 0 : index
    %c2 = arith.constant 2 : index
    %c0_30 = arith.constant 0 : index
    %44 = vector.load %arg3[%c0_28, %c0_29, %c2, %c0_30] : memref<1x18x24x64xbf16, #tpu.memory_space<vmem>>, vector<1x18x16x64xbf16>
    %45 = vector.shape_cast %44 : vector<1x18x16x64xbf16> to vector<18x16x64xbf16>
    %46 = vector.extract_strided_slice %45 {offsets = [0, 0, 0], sizes = [16, 16, 64], strides = [1, 1, 1]} : vector<18x16x64xbf16> to vector<16x16x64xbf16>
    %47 = vector.shape_cast %46 : vector<16x16x64xbf16> to vector<256x64xbf16>
    %c2_31 = arith.constant 2 : index
    %c0_32 = arith.constant 0 : index
    %c0_33 = arith.constant 0 : index
    %48 = vector.load %arg4[%c2_31, %c0_32, %c0_33] : memref<9x64x128xbf16, #tpu.memory_space<vmem>>, vector<1x64x128xbf16>
    %49 = vector.shape_cast %48 : vector<1x64x128xbf16> to vector<64x128xbf16>
    %cst_34 = arith.constant dense<0.000000e+00> : vector<256x128xf32>
    %50 = tpu.matmul %47, %49, %cst_34 {dimension_numbers = #tpu.dot_dimension_numbers<[1], [0], [0], [1], [0, 0, 1, 1], [], []>} : vector<256x64xbf16>, vector<64x128xbf16>, vector<256x128xf32> -> vector<256x128xf32>
    %51 = arith.addf %43, %50 : vector<256x128xf32>
    %52 = vector.extract_strided_slice %45 {offsets = [1, 0, 0], sizes = [16, 16, 64], strides = [1, 1, 1]} : vector<18x16x64xbf16> to vector<16x16x64xbf16>
    %53 = vector.shape_cast %52 : vector<16x16x64xbf16> to vector<256x64xbf16>
    %c5 = arith.constant 5 : index
    %c0_35 = arith.constant 0 : index
    %c0_36 = arith.constant 0 : index
    %54 = vector.load %arg4[%c5, %c0_35, %c0_36] : memref<9x64x128xbf16, #tpu.memory_space<vmem>>, vector<1x64x128xbf16>
    %55 = vector.shape_cast %54 : vector<1x64x128xbf16> to vector<64x128xbf16>
    %cst_37 = arith.constant dense<0.000000e+00> : vector<256x128xf32>
    %56 = tpu.matmul %53, %55, %cst_37 {dimension_numbers = #tpu.dot_dimension_numbers<[1], [0], [0], [1], [0, 0, 1, 1], [], []>} : vector<256x64xbf16>, vector<64x128xbf16>, vector<256x128xf32> -> vector<256x128xf32>
    %57 = arith.addf %51, %56 : vector<256x128xf32>
    %58 = vector.extract_strided_slice %45 {offsets = [2, 0, 0], sizes = [16, 16, 64], strides = [1, 1, 1]} : vector<18x16x64xbf16> to vector<16x16x64xbf16>
    %59 = vector.shape_cast %58 : vector<16x16x64xbf16> to vector<256x64xbf16>
    %c8 = arith.constant 8 : index
    %c0_38 = arith.constant 0 : index
    %c0_39 = arith.constant 0 : index
    %60 = vector.load %arg4[%c8, %c0_38, %c0_39] : memref<9x64x128xbf16, #tpu.memory_space<vmem>>, vector<1x64x128xbf16>
    %61 = vector.shape_cast %60 : vector<1x64x128xbf16> to vector<64x128xbf16>
    %cst_40 = arith.constant dense<0.000000e+00> : vector<256x128xf32>
    %62 = tpu.matmul %59, %61, %cst_40 {dimension_numbers = #tpu.dot_dimension_numbers<[1], [0], [0], [1], [0, 0, 1, 1], [], []>} : vector<256x64xbf16>, vector<64x128xbf16>, vector<256x128xf32> -> vector<256x128xf32>
    %63 = arith.addf %57, %62 : vector<256x128xf32>
    %c0_41 = arith.constant 0 : index
    %c0_42 = arith.constant 0 : index
    %64 = vector.load %arg7[%c0_41, %c0_42] : memref<256x128xf32, #tpu.memory_space<vmem>>, vector<256x128xf32>
    tpu.vector_store %arg7[%c0_41, %c0_42], %63 {strides = array<i32>} : memref<256x128xf32, #tpu.memory_space<vmem>>, vector<256x128xf32>,
    %c0_i32_43 = arith.constant 0 : i32
    %65 = arith.cmpi eq, %arg2, %c0_i32_43 : i32
    %66 = arith.extui %65 : i1 to i32
    %c0_i32_44 = arith.constant 0 : i32
    %67 = arith.cmpi ne, %66, %c0_i32_44 : i32
    scf.if %67 {
      %c0_45 = arith.constant 0 : index
      %c0_46 = arith.constant 0 : index
      %68 = vector.load %arg7[%c0_45, %c0_46] : memref<256x128xf32, #tpu.memory_space<vmem>>, vector<256x128xf32>
      %c0_47 = arith.constant 0 : index
      %c0_48 = arith.constant 0 : index
      %69 = vector.load %arg5[%c0_47, %c0_48] : memref<2x128xf32, #tpu.memory_space<vmem>>, vector<1x128xf32>
      %70 = vector.broadcast %69 : vector<1x128xf32> to vector<256x128xf32>
      %71 = arith.mulf %68, %70 : vector<256x128xf32>
      %c1_49 = arith.constant 1 : index
      %c0_50 = arith.constant 0 : index
      %72 = vector.load %arg5[%c1_49, %c0_50] : memref<2x128xf32, #tpu.memory_space<vmem>>, vector<1x128xf32>
      %73 = vector.broadcast %72 : vector<1x128xf32> to vector<256x128xf32>
      %74 = arith.addf %71, %73 : vector<256x128xf32>
      %cst_51 = arith.constant 0.000000e+00 : f32
      %75 = vector.broadcast %cst_51 : f32 to vector<256x128xf32>
      %76 = arith.cmpf oge, %74, %75 : vector<256x128xf32>
      %cst_52 = arith.constant 1.000000e-01 : f32
      %77 = vector.broadcast %cst_52 : f32 to vector<256x128xf32>
      %78 = arith.mulf %77, %74 : vector<256x128xf32>
      %79 = arith.select %76, %74, %78 : vector<256x128xi1>, vector<256x128xf32>
      %c0_53 = arith.constant 0 : index
      %c0_54 = arith.constant 0 : index
      %c0_55 = arith.constant 0 : index
      %80 = vector.load %arg6[%c0_53, %c0_54, %c0_55] : memref<1x256x128xf32, #tpu.memory_space<vmem>>, vector<1x256x128xf32>
      %81 = vector.shape_cast %80 : vector<1x256x128xf32> to vector<256x128xf32>
      %82 = vector.shape_cast %79 : vector<256x128xf32> to vector<1x256x128xf32>
      tpu.vector_store %arg6[%c0_53, %c0_54, %c0_55], %82 {strides = array<i32>} : memref<1x256x128xf32, #tpu.memory_space<vmem>>, vector<1x256x128xf32>,
    } else {
    }
    return
  }
  func.func @transform_0(%arg0: i32, %arg1: i32, %arg2: i32) -> (i32, i32, i32, i32) {
    %c0_i32 = arith.constant 0 : i32
    %c0_i32_0 = arith.constant 0 : i32
    %c0_i32_1 = arith.constant 0 : i32
    return %arg0, %c0_i32, %c0_i32_0, %arg2 : i32, i32, i32, i32
  }
  func.func @transform_1(%arg0: i32, %arg1: i32, %arg2: i32) -> (i32, i32, i32) {
    %c0_i32 = arith.constant 0 : i32
    %c0_i32_0 = arith.constant 0 : i32
    return %c0_i32, %arg2, %arg1 : i32, i32, i32
  }
  func.func @transform_2(%arg0: i32, %arg1: i32, %arg2: i32) -> (i32, i32) {
    %c0_i32 = arith.constant 0 : i32
    %c0_i32_0 = arith.constant 0 : i32
    return %c0_i32, %arg1 : i32, i32
  }
  func.func @transform_3(%arg0: i32, %arg1: i32, %arg2: i32) -> (i32, i32, i32) {
    %c0_i32 = arith.constant 0 : i32
    %c0_i32_0 = arith.constant 0 : i32
    return %arg0, %c0_i32, %arg1 : i32, i32, i32
  }
}

</mosaic_0001>

<bundles_post_ra>
// kernel: tpu_custom_call.1
= control target key start
LH: loop header
LB: loop body
LE: loop exit
PB: predicated region body
PF: predicated region fallthrough
CT: control target
= control target key end

     0   :  { %8 = vsyncpa [#allocation4], 0  ;;  %s6672_s0 = inlined_call_operand.hbm [shape: bf16[3,18,24,64], index: 0, kind: input, shape index: {}]   ;;  %s6673_s1 = inlined_call_operand.hbm [shape: bf16[9,64,128], index: 1, kind: input, shape index: {}]   ;;  %s6674_s2 = inlined_call_operand.vmem [shape: f32[2,128], index: 2, kind: input, shape index: {}]   ;;  %s6675_s3 = inlined_call_operand.hbm [shape: f32[3,256,128], index: 3, kind: output, shape index: {}]  }
   0x1   :  { %10 = vsyncpa [#allocation4 + $0x1], 0 }
   0x2   :  { %11 = vsyncpa [#allocation7], 0 }
   0x3   :  { %12 = vsyncpa [#allocation5], 0 }
   0x4   :  { %14 = vsyncpa [#allocation5 + $0x1], 0  ;;  %s4972_s12 = smov 0   ;;  %s4974_s13 = smov 0  }
   0x5   :  { %s4976_s14 = smov 0   ;;  %s4978_s15 = smov 0  }
   0x6   :  { %s4980_s16 = smov 0   ;;  %s4982_s17 = smov 0  }
   0x7 LB: > { %s3847_s18 = sadd.s32 4294967295, %s4943_s17   ;;  %s3848_s19 = sadd.s32 4294967294, %s4943_s17   ;;  %s4943_s17 = sphi %s4982_s17, %s20_s17   ;;  %s4939_s16 = sphi %s4980_s16, %s6779_s16   ;;  %s4935_s15 = sphi %s4978_s15, %s6778_s15   ;;  %s4931_s14 = sphi %s4976_s14, %s6777_s14   ;;  %s4927_s13 = sphi %s4974_s13, %s6776_s13   ;;  %s4923_s12 = sphi %s4972_s12, %s6775_s12  }
   0x8   : > { %p61_p0 = scmp.ne.s32.totalorder %s4927_s13, %s4923_s12  ;;  %p5006_p1 = scmp.eq.s32.totalorder %s3847_s18, 0 }
   0x9   : > { %p5010_p2 = scmp.eq.s32.totalorder %s3847_s18, 2  ;;  %p147_p3 = scmp.eq.s32.totalorder %s3848_s19, 2 }
   0xa   : > { %p5016_p4 = por %p5006_p1, %p61_p0  ;;  %p3849_p5 = scmp.ge.s32.totalorder %s4943_s17, 1 }
   0xb   : > { %p5021_p6 = por %p147_p3, %p61_p0  ;;  %p154_p7 = scmp.lt.s32.totalorder %s4943_s17, 4 }
   0xc   : > { %s4945_s25 = smov [#allocation6]   ;;  %s39_s28 = sadd.s32 1, %s4939_s16 }
   0xd   : > { %s6680_s23 = scalar_select %p5021_p6, 1, 0 }
   0xe   : > { %p5026_p8 = pnand %p3849_p5, %p154_p7  ;;  %s170_s26 = sshll.u32 %s4945_s25, 4  ;;  %s171_s26 = int_to_ptr.vmem [resolvable:$true] %s170_s26 }
   0xf   : > { %s4816_s29 = scalar_lea.vmem %s171_s26, 4608  ;;  %p4824_p3 = scmp.lt.s32.totalorder %s171_s26, %s171_s26 }
  0x10   : > { %p4676_p9 = pneg %p5026_p8  ;;  %p4817_p12 = scmp.ne.s32.totalorder %s171_s26, %s4816_s29 }
  0x11   : > { %p4825_p5 = scmp.lt.s32.totalorder %s4816_s29, %s4816_s29 }
  0x12   : > { %p5034_p10 = pnand %p4676_p9, %p5006_p1 }
  0x13   : > { %p4826_p7 = por %p4825_p5, %p4824_p3 }
  0x14   : > { %p4807_p11 = pneg %p5034_p10 }
  0x16   : > { %p4819_p13 = pnand %p4817_p12, %p4807_p11 }
  0x18   : > { %p4820_p0 = pneg %p4819_p13 }
  0x1a   : > { %p4827_p6 = pnand %p4826_p7, %p4820_p0 }
  0x1c   : > { %4830 = shalt.err (!%p4827_p6)
}
  0x1d   : > { %s4946_s30 = smov 64   ;;  %s4947_s4 = smov 4  }
  0x1e   : > { %4679 = dma.hbm_to_vmem [thread:$0]  (!%p5034_p10), %s6673_s1, 4608, %s171_s26, [#allocation7], %s4946_s30, %s4946_s30, %s4947_s4  }
  0x1f   : > { %p41_p6 = scmp.ge.s32.totalorder %s39_s28, 3  ;;  %s48_s7 = sadd.s32 1, %s4931_s14 }
  0x20   : > { %p55_p9 = scmp.ne.s32.totalorder %s4931_s14, %s4927_s13  ;;  %p56_p11 = scmp.eq.s32.totalorder %s4943_s17, 0 }
  0x21   : > { %s6781_s28 = smov (%p41_p6, %s39_s28), 0  ;;  %p4689_p0 = scmp.lt.s32.totalorder %s4943_s17, 3 }
  0x22   : > { %p57_p12 = por %p56_p11, %p55_p9  ;;  %p5057_p13 = por %p5010_p2, %p55_p9 }
  0x23   : > { %s43_s9 = ssub.s32 %s4939_s16, %s6781_s28  ;;  %s191_s10 = sand.u32 1, %s4931_s14  }
  0x24   : > { %p46_p3 = scmp.eq.s32.totalorder %s43_s9, 0  ;;  %s4665_s11 = smul.u32 216, %s191_s10 }
  0x25   : > { %s4666_s19 = smul.u32 3456, %s4939_s16  ;;  %p5069_p10 = pnand %p4689_p0, %p57_p12 }
  0x26   : > { %s5066_s18 = scalar_select %p46_p3, %s4931_s14, %s48_s7  }
  0x27   : > { %s195_s25 = scalar_lea.vmem [#allocation3], %s4665_s11  ;;  %s202_s5 = scalar_lea.hbm %s6672_s0, %s4666_s19 }
  0x28   : > { %s203_s26 = sshll.u32 %s195_s25, 4  ;;  %s192_s6 = scalar_lea.sflag [#allocation4], %s191_s10  ;;  %s204_s26 = int_to_ptr.vmem [resolvable:$true] %s203_s26 }
  0x29   : > { %p4833_p2 = pneg %p5069_p10  ;;  %s4844_s9 = scalar_lea.vmem %s204_s26, 3456 }
  0x2a   : > { %p4845_p5 = scmp.ne.s32.totalorder %s204_s26, %s4844_s9  ;;  %s4948_s7 = smov [#allocation3]  }
  0x2b   : > { %s4849_s11 = sshll.u32 %s4948_s7, 4  ;;  %s4850_s11 = int_to_ptr.vmem [resolvable:$false] %s4849_s11 }
  0x2c   : > { %p4847_p7 = pnand %p4845_p5, %p4833_p2  ;;  %s4851_s25 = scalar_lea.vmem %s4850_s11, 6912 }
  0x2d   : > { %p4852_p9 = scmp.lt.s32.totalorder %s204_s26, %s4850_s11  ;;  %p4853_p11 = scmp.lt.s32.totalorder %s4851_s25, %s4844_s9 }
  0x2e   : > { %p4848_p6 = pneg %p4847_p7 }
  0x2f   : > { %p4854_p12 = por %p4853_p11, %p4852_p9 }
  0x31   : > { %p4855_p0 = pnand %p4854_p12, %p4848_p6 }
  0x33   : > { %4858 = shalt.err (!%p4855_p0)
}
  0x34   : > { %4683 = dma.hbm_to_vmem [thread:$0]  (!%p5069_p10), %s202_s5, 3456, %s204_s26, %s192_s6, %s4946_s30, %s4946_s30, %s4947_s4  }
  0x35   : > { %215 = sbr.rel (%p5026_p8) target bundleno = 586 (0x24a), region = 32 }
  0x3a   : > { %s5086_s10 = sand.u32 1, %s4927_s13  }
  0x3b   : > { %s4667_s19 = smul.u32 216, %s5086_s10  ;;  %s218_s29 = scalar_lea.sflag [#allocation4], %s5086_s10 }
  0x3d   : > { %s5090_s21 = scalar_lea.vmem [#allocation3], %s4667_s19 }
  0x3e   : > { %4910 = dma.done.wait (%p5016_p4), %s218_s29, 3456  }
  0x3f   : > { %4912 = vsyncadd (%p5016_p4), %s218_s29, 4294963840 }
  0x40   : > { %4914 = dma.done.wait (%p5006_p1), [#allocation7], 4608  }
  0x41   : > { %4916 = vsyncadd (%p5006_p1), [#allocation7], 4294962688  ;;  %v4745_v0 = vld [vmem:[#allocation6 + $0x18] sm:$0xff]   ;;  %v4746_v1 = vld [vmem:[#allocation6 + $0x10] sm:$0xff]   ;;  %vm474_vm0 = vcmask 523264   ;;  %vm2525_vm4 = vcmask 1042432  }
  0x42   : > { %4297 = vmatprep.subr.bf16.mxu0 %v4745_v0  ;;  %4657 = vmatprep.subr.bf16.mxu1 %v4745_v0  ;;  %v4747_v2 = vld [vmem:[#allocation6 + $0x8] sm:$0xff]   ;;  %v4748_v5 = vld [vmem:[#allocation6] sm:$0xff]   ;;  %v4753_v6 = vld [vmem:[#allocation6 + $0x78] sm:$0xff]   ;;  %vm1238_vm1 = vsmask.f32 3328  ;;  %vm2526_vm5 = vcmask 1046532  }
  0x43   : > { %4298 = vmatpush3.bf16.msra.mxu0 %v4745_v0  ;;  %4661 = vmatpush3.bf16.msra.mxu1 %v4745_v0  ;;  %v4749_v3 = vld [vmem:[%s5090_s21] sm:$0xff]   ;;  %v4751_v7 = vld [vmem:[%s5090_s21 + $0xc] sm:$0xff]   ;;  %v4755_v10 = vld [vmem:[%s5090_s21 + $0x18] sm:$0xff]   ;;  %vm1239_vm2 = vsmask.f32 7440  ;;  %s3856_s4 = sshll.u32 %s5086_s10, 8 }
  0x44   : > { %4299 = vmatprep.subr.bf16.mxu0 %v4746_v1  ;;  %4658 = vmatprep.subr.bf16.mxu1 %v4746_v1  ;;  %v5102_v4 = vld [vmem:[%s5090_s21 + $0x60] sm:$0xff]   ;;  %v4754_v8 = vld [vmem:[#allocation6 + $0xd8] sm:$0xff]   ;;  %v5113_v11 = vld [vmem:[%s5090_s21 + $0x78] sm:$0xff]   ;;  %s6454_s26 = scalar_lea.vmem [#allocation8], %s3856_s4  ;;  %s4116_s27 = sshll.u32 %s4935_s15, 12 }
  0x45   : > { %4305 = vmatprep.mubr.msk.bf16.mxu0 %vm474_vm0, %v4749_v3  ;;  %4321 = vmatprep.mubr.msk.bf16.mxu1 %vm474_vm0, %v5102_v4  ;;  %v5109_v9 = vld [vmem:[%s5090_s21 + $0x6c] sm:$0xff]   ;;  %v4757_v14 = vld [vmem:[%s5090_s21 + $0x24] sm:$0xff]   ;;  %v4763_v22 = vld [vmem:[%s5090_s21 + $0x3c] sm:$0xff]   ;;  %s3730_s5 = sshll.u32 %s6454_s26, 4  ;;  %s6621_s7 = scalar_lea.hbm %s6675_s3, %s4116_s27  ;;  %s6623_s5 = int_to_ptr.vmem [resolvable:$true] %s3730_s5 }
  0x46   : > { %v4759_v12 = vld [vmem:[#allocation6 + $0x70] sm:$0xff]   ;;  %v4765_v16 = vld [vmem:[#allocation6 + $0x68] sm:$0xff]   ;;  %v5126_v18 = vld [vmem:[%s5090_s21 + $0x30] sm:$0xff]   ;;  %s3716_s15 = scalar_lea.sflag [#allocation5], %s5086_s10  ;;  %s4859_s11 = scalar_lea.vmem %s6623_s5, 4096 }
  0x47   : > { %4300 = vmatpush3.bf16.msra.mxu0 %v4746_v1  ;;  %4662 = vmatpush3.bf16.msra.mxu1 %v4746_v1  ;;  %v4760_v13 = vld [vmem:[#allocation6 + $0xd0] sm:$0xff]   ;;  %v4766_v17 = vld [vmem:[#allocation6 + $0xc8] sm:$0xff]   ;;  %v5129_v19 = vld [vmem:[%s5090_s21 + $0x90] sm:$0xff]   ;;  %p4860_p1 = scmp.ne.s32.totalorder %s6623_s5, %s4859_s11  ;;  %s4949_s25 = smov [#allocation8]  }
  0x48   : > { %4301 = vmatprep.subr.bf16.mxu0 %v4747_v2  ;;  %4659 = vmatprep.subr.bf16.mxu1 %v4747_v2  ;;  %v5123_v15 = vld [vmem:[%s5090_s21 + $0x84] sm:$0xff]   ;;  %v4771_v20 = vld [vmem:[#allocation6 + $0x60] sm:$0xff]   ;;  %v1184_v32 = vld [vmem:[%s5090_s21] sm:$0xf]  ;;  %s4863_s19 = sshll.u32 %s4949_s25, 4  ;;  %s4864_s19 = int_to_ptr.vmem [resolvable:$false] %s4863_s19 }
  0x49   : > { %v4772_v21 = vld [vmem:[#allocation6 + $0xc0] sm:$0xff]   ;;  %v4773_v24 = vld [vmem:[#allocation6 + $0x38] sm:$0xff]   ;;  %v4775_v30 = vld [vmem:[#allocation6 + $0x30] sm:$0xff]   ;;  %v1242_v36 = vshrl.u32 %v1184_v32, 16  ;;  %v1245_v37 = vshll.u32 %v1184_v32, 16  ;;  %p4861_p4 = pnand %p4860_p1, %p5057_p13  ;;  %s4865_s29 = scalar_lea.vmem %s4864_s19, 8192 }
  0x4a   : > { %v5140_v23 = vld [vmem:[%s5090_s21 + $0x9c] sm:$0xff]   ;;  %v4774_v25 = vld [vmem:[#allocation6 + $0x98] sm:$0xff]   ;;  %v1185_v33 = vld [vmem:[%s5090_s21 + $0x4] sm:$0xf]  ;;  %p4866_p3 = scmp.lt.s32.totalorder %s6623_s5, %s4864_s19  ;;  %p4867_p10 = scmp.lt.s32.totalorder %s4865_s29, %s4859_s11 }
  0x4b   : > { %4302 = vmatpush3.bf16.msra.mxu0 %v4747_v2  ;;  %4663 = vmatpush3.bf16.msra.mxu1 %v4747_v2  ;;  %v5143_v26 = vld [vmem:[%s5090_s21 + $0x48] sm:$0xff]   ;;  %v5156_v28 = vld [vmem:[%s5090_s21 + $0x54] sm:$0xff]   ;;  %v1251_v39 = vshll.u32 %v1185_v33, 16  ;;  %v1255_v40 = vshrl.u32 %v1185_v33, 16  ;;  %v1244_v46 = vrot.slane %v1242_v36, 4  ;;  %v1247_v47 = vrot.slane %v1245_v37, 5  ;;  %vm5220_vm3 = vmor %vm1238_vm1, %vm1239_vm2  ;;  %p4862_p8 = pneg %p4861_p4 }
  0x4c   : > { %4303 = vmatprep.subr.bf16.mxu0 %v4748_v5  ;;  %4660 = vmatprep.subr.bf16.mxu1 %v4748_v5  ;;  %v5146_v27 = vld [vmem:[%s5090_s21 + $0xa8] sm:$0xff]   ;;  %v5159_v29 = vld [vmem:[%s5090_s21 + $0xb4] sm:$0xff]   ;;  %v5177_v48 = vld [vmem:[%s5090_s21 + $0x10] sm:$0xf]  ;;  %p4868_p2 = por %p4867_p10, %p4866_p3 }
  0x4d   : > { %v4776_v31 = vld [vmem:[#allocation6 + $0x90] sm:$0xff]   ;;  %v4777_v34 = vld [vmem:[#allocation6 + $0x28] sm:$0xff]   ;;  %v4779_v41 = vld [vmem:[#allocation6 + $0x20] sm:$0xff]   ;;  %v5179_v49 = vrot.slane %v1251_v39, 5  ;;  %v1257_v50 = vrot.slane %v1255_v40, 4  ;;  %v1275_v55 = vshll.u32 %v5177_v48, 16  ;;  %v1248_v57 = vor.u32 %v1247_v47, %v1244_v46 }
  0x4e   : > { %v4778_v35 = vld [vmem:[#allocation6 + $0x88] sm:$0xff]   ;;  %v1187_v38 = vld [vmem:[%s5090_s21 + $0xc] sm:$0xf]  ;;  %v4780_v42 = vld [vmem:[#allocation6 + $0x80] sm:$0xff]   ;;  %v1279_v59 = vshrl.u32 %v5177_v48, 16  ;;  %v6676_v1 = vrot.slane %v5177_v48, 5  ;;  %p4869_p5 = pnand %p4868_p2, %p4862_p8 }
  0x4f   : > { %4304 = vmatpush3.bf16.msra.mxu0 %v4748_v5  ;;  %4664 = vmatpush3.bf16.msra.mxu1 %v4748_v5  ;;  %v1266_v43 = vshrl.u32 %v1187_v38, 16  ;;  %v1269_v44 = vshll.u32 %v1187_v38, 16  ;;  %v1186_v45 = vld [vmem:[%s5090_s21 + $0x8] sm:$0x1]  ;;  %v5188_v51 = vld [vmem:[%s5090_s21 + $0x14] sm:$0x1]  ;;  %v1258_v58 = vor.u32 %v1257_v50, %v5179_v49  ;;  %vm5498_vm6 = vmor %vm2525_vm4, %vm2526_vm5 }
  0x50   : > { %4337 = vmatprep.subr.bf16.mxu1 %v4753_v6  ;;  %4377 = vmatprep.subr.bf16.mxu0 %v4754_v8  ;;  %v1261_v54 = vshll.u32 %v1186_v45, 16  ;;  %v1190_v56 = vld [vmem:[%s5090_s21 + $0x18] sm:$0xf]  ;;  %v1191_v60 = vld [vmem:[%s5090_s21 + $0x1c] sm:$0xf]  ;;  %v5195_v61 = vld [vmem:[#allocation6 + $0xf8] sm:$0xff]  }
  0x51   : > { %v1268_v52 = vrot.slane %v1266_v43, 4  ;;  %v1271_v53 = vrot.slane %v1269_v44, 5  ;;  %v5197_v62 = vld [vmem:[#allocation6 + $0x58] sm:$0xff]   ;;  %v1285_v63 = vshll.u32 %v5188_v51, 16  ;;  %v1290_v2 = vshrl.u32 %v1190_v56, 16 }
  0x52   : > { %4306 = vmatmul.mubr.msk.bf16.vlgmr.msra.gmra.mxu0 %vm474_vm0, %v4751_v7  ;;  %4322 = vmatmul.mubr.msk.bf16.vlgmr.msra.gmra.mxu1 %vm474_vm0, %v5109_v9  ;;  %v1293_v3 = vshll.u32 %v1190_v56, 16  ;;  %v1193_v5 = vld [vmem:[%s5090_s21 + $0x24] sm:$0xf]  ;;  %v1192_v32 = vld [vmem:[%s5090_s21 + $0x20] sm:$0x1] }
  0x53   : > { %4338 = vmatpush3.bf16.msra.mxu1 %v4753_v6  ;;  %4378 = vmatpush3.bf16.msra.mxu0 %v4754_v8  ;;  %v1272_v0 = vor.u32 %v1271_v53, %v1268_v52  ;;  %v5202_v6 = vrot.slane %v1261_v54, 5  ;;  %v1299_v8 = vshll.u32 %v1191_v60, 16  ;;  %v1195_v38 = vld [vmem:[%s5090_s21 + $0x2c] sm:$0x1]  ;;  %v1199_v39 = vld [vmem:[%s5090_s21 + $0x3c] sm:$0xf] }
  0x54   : > { %4309 = vmatprep.mubr.msk.bf16.mxu0 %vm474_vm0, %v4755_v10  ;;  %4325 = vmatprep.mubr.msk.bf16.mxu1 %vm474_vm0, %v5113_v11  ;;  %v5255_v40 = vld [vmem:[%s5090_s21 + $0x40] sm:$0xf]  ;;  %v1362_v52 = vshrl.u32 %v1199_v39, 16  ;;  %v1365_v53 = vshll.u32 %v1199_v39, 16 }
  0x55   : > { %4339 = vmatprep.subr.bf16.mxu1 %v4759_v12  ;;  %4379 = vmatprep.subr.bf16.mxu0 %v4760_v13  ;;  %v5238_v33 = vrot.slane %v1299_v8, 5  ;;  %v1371_v54 = vshll.u32 %v5255_v40, 16  ;;  %v5279_v8 = vld [vmem:[%s5090_s21 + $0x38] sm:$0x1] }
  0x57   : > { %4340 = vmatpush3.bf16.msra.mxu1 %v4759_v12  ;;  %4380 = vmatpush3.bf16.msra.mxu0 %v4760_v13  ;;  %v5208_v12 = vrot.slane %v1258_v58, 4  ;;  %v1281_v13 = vrot.slane %v1279_v59, 4  ;;  %v1309_v58 = vshll.u32 %v1192_v32, 16 }
  0x58   : > { %4341 = vmatprep.subr.bf16.mxu1 %v4765_v16  ;;  %4381 = vmatprep.subr.bf16.mxu0 %v4766_v17 }
  0x59   : > { %v1264_v36 = vsel %vm5220_vm3, %v5208_v12, %v5202_v6  ;;  %v1311_v39 = vrot.slane %v1309_v58, 5 }
  0x5a   : > { %4310 = vmatmul.mubr.msk.bf16.gmra.mxu0 %vm474_vm0, %v4757_v14  ;;  %4326 = vmatmul.mubr.msk.bf16.gmra.mxu1 %vm474_vm0, %v5123_v15 }
  0x5b   : > { %4313 = vmatprep.mubr.msk.bf16.mxu0 %vm474_vm0, %v5126_v18  ;;  %4329 = vmatprep.mubr.msk.bf16.mxu1 %vm474_vm0, %v5129_v19 }
  0x5c   : > { %4342 = vmatpush3.bf16.msra.mxu1 %v4765_v16  ;;  %4382 = vmatpush3.bf16.msra.mxu0 %v4766_v17  ;;  %v1194_v16 = vld [vmem:[%s5090_s21 + $0x28] sm:$0xf] }
  0x5d   : > { %4343 = vmatprep.subr.bf16.mxu1 %v4771_v20  ;;  %4383 = vmatprep.subr.bf16.mxu0 %v4772_v21  ;;  %v1327_v44 = vshrl.u32 %v1194_v16, 16 }
  0x60   : > { %4344 = vmatpush3.bf16.msra.mxu1 %v4771_v20  ;;  %4384 = vmatpush3.bf16.msra.mxu0 %v4772_v21  ;;  %v1303_v20 = vshrl.u32 %v1191_v60, 16  ;;  %v1314_v21 = vshrl.u32 %v1193_v5, 16 }
  0x61   : > { %4417 = vmatprep.subr.bf16.mxu1 %v4773_v24  ;;  %4457 = vmatprep.subr.bf16.mxu0 %v4774_v25 }
  0x62   : > { %4314 = vmatmul.mubr.msk.bf16.gmra.mxu0 %vm474_vm0, %v4763_v22  ;;  %4330 = vmatmul.mubr.msk.bf16.gmra.mxu1 %vm474_vm0, %v5140_v23 }
  0x63   : > { %4317 = vmatprep.mubr.msk.bf16.mxu0 %vm474_vm0, %v5143_v26  ;;  %4333 = vmatprep.mubr.msk.bf16.mxu1 %vm474_vm0, %v5146_v27 }
  0x6a   : > { %4318 = vmatmul.mubr.msk.bf16.gmra.mxu0 %vm474_vm0, %v5156_v28  ;;  %4334 = vmatmul.mubr.msk.bf16.gmra.mxu1 %vm474_vm0, %v5159_v29 }
  0x6b   : > { %4345 = vmatprep.mubr.msk.bf16.mxu1 %vm474_vm0, %v4751_v7  ;;  %4385 = vmatprep.mubr.msk.bf16.mxu0 %vm474_vm0, %v4755_v10  ;;  %v5204_v7 = vrot.slane %v1275_v55, 5  ;;  %v1375_v55 = vshrl.u32 %v5255_v40, 16 }
  0x6d   : > { %v1282_v37 = vor.u32 %v1281_v13, %v5204_v7 }
  0x6f   : > { %v5261_v56 = vrot.slane %v1282_v37, 4 }
  0x72   : > { %4346 = vmatmul.mubr.msk.bf16.vlgmr.msra.gmra.mxu1 %vm474_vm0, %v4755_v10  ;;  %4386 = vmatmul.mubr.msk.bf16.vlgmr.msra.gmra.mxu0 %vm474_vm0, %v4757_v14  ;;  %v5206_v10 = vrot.slane %v1248_v57, 4 }
  0x73   : > { %4418 = vmatpush3.bf16.msra.mxu1 %v4773_v24  ;;  %4458 = vmatpush3.bf16.msra.mxu0 %v4774_v25  ;;  %v5230_v24 = vrot.slane %v1272_v0, 4  ;;  %v5234_v25 = vrot.slane %v6676_v1, 4  ;;  %v1329_v0 = vrot.slane %v1327_v44, 4 }
  0x74   : > { %4349 = vmatprep.mubr.msk.bf16.mxu1 %vm474_vm0, %v4757_v14  ;;  %4389 = vmatprep.mubr.msk.bf16.mxu0 %vm474_vm0, %v5126_v18 }
  0x75   : > { %4419 = vmatprep.subr.bf16.mxu1 %v4775_v30  ;;  %4459 = vmatprep.subr.bf16.mxu0 %v4776_v31 }
  0x77   : > { %4420 = vmatpush3.bf16.msra.mxu1 %v4775_v30  ;;  %4460 = vmatpush3.bf16.msra.mxu0 %v4776_v31  ;;  %v1295_v30 = vrot.slane %v1293_v3, 5  ;;  %v1196_v31 = vld [vmem:[%s5090_s21 + $0x30] sm:$0xf]  ;;  %v1202_v3 = vld [vmem:[%s5090_s21 + $0x48] sm:$0xf] }
  0x78   : > { %4421 = vmatprep.subr.bf16.mxu1 %v4777_v34  ;;  %4461 = vmatprep.subr.bf16.mxu0 %v4778_v35  ;;  %v1338_v45 = vshrl.u32 %v1196_v31, 16  ;;  %v1341_v46 = vshll.u32 %v1196_v31, 16  ;;  %v5286_v31 = vld [vmem:[%s5090_s21 + $0x44] sm:$0x1]  ;;  %v1386_v32 = vshrl.u32 %v1202_v3, 16 }
  0x7a   : > { %4350 = vmatmul.mubr.msk.bf16.gmra.mxu1 %vm474_vm0, %v5126_v18  ;;  %4390 = vmatmul.mubr.msk.bf16.gmra.mxu0 %vm474_vm0, %v4763_v22  ;;  %v5224_v18 = vrot.slane %v1285_v63, 5  ;;  %v1343_v13 = vrot.slane %v1341_v46, 5 }
  0x7b   : > { %4353 = vmatprep.mubr.msk.bf16.mxu1 %vm474_vm0, %v4763_v22  ;;  %4393 = vmatprep.mubr.msk.bf16.mxu0 %vm474_vm0, %v5143_v26  ;;  %v1317_v22 = vshll.u32 %v1193_v5, 16  ;;  %v5272_v5 = vld [vmem:[%s5090_s21 + $0x4c] sm:$0xf] }
  0x7c   : > { %4422 = vmatpush3.bf16.msra.mxu1 %v4777_v34  ;;  %4462 = vmatpush3.bf16.msra.mxu0 %v4778_v35  ;;  %v1323_v34 = vshll.u32 %v1194_v16, 16  ;;  %v5241_v35 = vld [vmem:[%s5090_s21 + $0x34] sm:$0xf]  ;;  %v1399_v37 = vshrl.u32 %v5272_v5, 16 }
  0x7d   : > { %4423 = vmatprep.subr.bf16.mxu1 %v4779_v41  ;;  %4463 = vmatprep.subr.bf16.mxu0 %v4780_v42  ;;  %v1319_v43 = vrot.slane %v1317_v22, 5  ;;  %v1347_v47 = vshll.u32 %v5241_v35, 16  ;;  %v1351_v50 = vshrl.u32 %v5241_v35, 16  ;;  %v1367_v22 = vrot.slane %v1365_v53, 5 }
  0x7e   : > { %v5263_v59 = vrot.slane %v1323_v34, 5  ;;  %v1395_v34 = vshll.u32 %v5272_v5, 16  ;;  %v1381_v53 = vshll.u32 %v5286_v31, 16 }
  0x7f   : > { %v5281_v16 = vrot.slane %v1347_v47, 5 }
  0x80   : > { %4424 = vmatpush3.bf16.msra.mxu1 %v4779_v41  ;;  %4464 = vmatpush3.bf16.msra.mxu0 %v4780_v42  ;;  %v1305_v41 = vrot.slane %v1303_v20, 4  ;;  %v1316_v42 = vrot.slane %v1314_v21, 4  ;;  %v1353_v20 = vrot.slane %v1351_v50, 4  ;;  %v1364_v21 = vrot.slane %v1362_v52, 4 }
  0x81   : > { %4497 = vmatprep.subr.bf16.mxu1 %v5195_v61  ;;  %4537 = vmatprep.subr.bf16.mxu0 %v5197_v62  ;;  %v5296_v58 = vrot.slane %v1395_v34, 5 }
  0x82   : > { %4354 = vmatmul.mubr.msk.bf16.gmra.mxu1 %vm474_vm0, %v5143_v26  ;;  %4394 = vmatmul.mubr.msk.bf16.gmra.mxu0 %vm474_vm0, %v5156_v28  ;;  %v1292_v26 = vrot.slane %v1290_v2, 4  ;;  %v1306_v60 = vor.u32 %v1305_v41, %v5238_v33  ;;  %v1320_v63 = vor.u32 %v1319_v43, %v1316_v42  ;;  %v1333_v2 = vshll.u32 %v1195_v38, 16 }
  0x83   : > { %4357 = vmatprep.mubr.msk.bf16.mxu1 %vm474_vm0, %v5156_v28  ;;  %4397 = vmatprep.mubr.msk.bf16.mxu0 %vm474_vm0, %v5102_v4  ;;  %v1254_v28 = vsel %vm5220_vm3, %v5206_v10, %v5179_v49  ;;  %v1330_v41 = vor.u32 %v1329_v0, %v5263_v59  ;;  %v1357_v42 = vshll.u32 %v5279_v8, 16  ;;  %v1354_v46 = vor.u32 %v1353_v20, %v5281_v16 }
  0x84   : > { %v1296_v57 = vor.u32 %v1295_v30, %v1292_v26  ;;  %v5283_v26 = vrot.slane %v1371_v54, 5  ;;  %v1377_v30 = vrot.slane %v1375_v55, 4  ;;  %v1307_v43 = vrot.slane %v1306_v60, 4  ;;  %v1205_v54 = vld [vmem:[%s5090_s21 + $0x54] sm:$0xf] }
  0x85   : > { %v1335_v44 = vrot.slane %v1333_v2, 5  ;;  %v1321_v47 = vrot.slane %v1320_v63, 4  ;;  %v1368_v50 = vor.u32 %v1367_v22, %v1364_v21  ;;  %v1388_v55 = vrot.slane %v1386_v32, 4  ;;  %v5303_v2 = vld [vmem:[%s5090_s21 + $0x50] sm:$0x1] }
  0x86   : > { %v1297_v38 = vrot.slane %v1296_v57, 4  ;;  %v1378_v52 = vor.u32 %v1377_v30, %v5283_v26  ;;  %v1401_v0 = vrot.slane %v1399_v37, 4  ;;  %v1331_v60 = vrot.slane %v1330_v41, 4  ;;  %v5356_v41 = vld [vmem:[%s5090_s21 + $0x64] sm:$0xf] }
  0x87   : > { %v1359_v63 = vrot.slane %v1357_v42, 5  ;;  %v1369_v20 = vrot.slane %v1368_v50, 4  ;;  %v1383_v21 = vrot.slane %v1381_v53, 5  ;;  %v1410_v6 = vshrl.u32 %v1205_v54, 16 }
  0x88   : > { %v1413_v12 = vshll.u32 %v1205_v54, 16  ;;  %v1379_v22 = vrot.slane %v1378_v52, 4  ;;  %v1402_v49 = vor.u32 %v1401_v0, %v5296_v58  ;;  %v1405_v10 = vshll.u32 %v5303_v2, 16  ;;  %v1214_v52 = vld [vmem:[%s5090_s21 + $0x78] sm:$0xf] }
  0x89   : > { %v1312_v32 = vsel %vm5220_vm3, %v1307_v43, %v1311_v39  ;;  %v1336_v34 = vsel %vm5220_vm3, %v1331_v60, %v1335_v44  ;;  %v1374_v37 = vsel %vm5220_vm3, %v1369_v20, %v5283_v26  ;;  %v5386_v0 = vld [vmem:[%s5090_s21 + $0x5c] sm:$0x1] }
  0x8a   : > { %4358 = vmatmul.mubr.msk.bf16.gmra.mxu1 %vm474_vm0, %v5102_v4  ;;  %4398 = vmatmul.mubr.msk.bf16.gmra.mxu0 %vm474_vm0, %v5109_v9  ;;  %v1340_v4 = vrot.slane %v1338_v45, 4  ;;  %v1415_v39 = vrot.slane %v1413_v12, 5  ;;  %v1384_v42 = vsel %vm5220_vm3, %v1379_v22, %v1383_v21  ;;  %v1403_v44 = vrot.slane %v1402_v49, 4  ;;  %v5396_v21 = vld [vmem:[%s5090_s21 + $0x68] sm:$0x1] }
  0x8b   : > { %4361 = vmatprep.mubr.msk.bf16.mxu1 %vm474_vm0, %v5109_v9  ;;  %4401 = vmatprep.mubr.msk.bf16.mxu0 %vm474_vm0, %v5113_v11  ;;  %v1389_v9 = vshll.u32 %v1202_v3, 16  ;;  %v5401_v22 = vld [vmem:[%s5090_s21 + $0x7c] sm:$0xf]  ;;  %v1485_v49 = vshll.u32 %v1214_v52, 16 }
  0x8c   : > { %v1344_v45 = vor.u32 %v1343_v13, %v1340_v4  ;;  %v1355_v4 = vrot.slane %v1354_v46, 4  ;;  %v5326_v13 = vld [vmem:[%s5090_s21 + $0x58] sm:$0xf] }
  0x8d   : > { %v1391_v57 = vrot.slane %v1389_v9, 5  ;;  %v1326_v9 = vsel %vm5220_vm3, %v1321_v47, %v5263_v59  ;;  %v1211_v59 = vld [vmem:[%s5090_s21 + $0x6c] sm:$0xf] }
  0x8e   : > { %v1345_v3 = vrot.slane %v1344_v45, 4  ;;  %v5362_v45 = vld [vmem:[%s5090_s21 + $0x70] sm:$0xf]  ;;  %v5379_v53 = vcombine.low %v1326_v9, %v1336_v34  ;;  %v1461_v20 = vshll.u32 %v1211_v59, 16 }
  0x8f   : > { %v1392_v30 = vor.u32 %v1391_v57, %v1388_v55  ;;  %v5383_v57 = vcombine.low %v1374_v37, %v1384_v42  ;;  %v1471_v12 = vshrl.u32 %v5362_v45, 16 }
  0x91   : > { %v1393_v43 = vrot.slane %v1392_v30, 4  ;;  %v1482_v30 = vshrl.u32 %v1214_v52, 16 }
  0x92   : > { %4362 = vmatmul.mubr.msk.bf16.gmra.mxu1 %vm474_vm0, %v5113_v11  ;;  %4402 = vmatmul.mubr.msk.bf16.gmra.mxu0 %vm474_vm0, %v5123_v15  ;;  %v5319_v11 = vcombine.low %v1254_v28, %v1264_v36  ;;  %v1419_v28 = vshll.u32 %v5326_v13, 16  ;;  %v1423_v36 = vshrl.u32 %v5326_v13, 16 }
  0x93   : > { %4365 = vmatprep.mubr.msk.bf16.mxu1 %vm474_vm0, %v5123_v15  ;;  %4405 = vmatprep.mubr.msk.bf16.mxu0 %vm474_vm0, %v5129_v19  ;;  %v1278_v15 = vsel %vm5220_vm3, %v5230_v24, %v5204_v7  ;;  %v1288_v7 = vsel %vm5220_vm3, %v5261_v56, %v5224_v18  ;;  %v1302_v24 = vsel %vm5220_vm3, %v1297_v38, %v5238_v33  ;;  %v1208_v33 = vld [vmem:[%s5090_s21 + $0x60] sm:$0xf]  ;;  %v1412_v38 = vrot.slane %v1410_v6, 4 }
  0x94   : > { %v1350_v18 = vsel %vm5220_vm3, %v1345_v3, %v5281_v16  ;;  %v1360_v56 = vsel %vm5220_vm3, %v1355_v4, %v1359_v63  ;;  %v1407_v16 = vrot.slane %v1405_v10, 5  ;;  %v5368_v26 = vcombine.low %v1278_v15, %v1288_v7  ;;  %v4781_v10 = vld [vmem:[%s5090_s21 + $0xc0] sm:$0xff]  }
  0x95   : > { %v5370_v46 = vcombine.low %v1302_v24, %v1312_v32  ;;  %v5372_v47 = vrot.slane %v1419_v28, 5  ;;  %v1425_v50 = vrot.slane %v1423_v36, 4  ;;  %v1434_v54 = vshrl.u32 %v1208_v33, 16  ;;  %v1217_v36 = vld [vmem:[%s5090_s21 + $0x84] sm:$0xf] }
  0x96   : > { %v1437_v55 = vshll.u32 %v1208_v33, 16  ;;  %v1416_v60 = vor.u32 %v1415_v39, %v1412_v38  ;;  %v1443_v63 = vshll.u32 %v5356_v41, 16  ;;  %v1398_v15 = vsel %vm5220_vm3, %v1393_v43, %v5296_v58  ;;  %v5414_v33 = vld [vmem:[%s5090_s21 + $0x88] sm:$0xf] }
  0x97   : > { %v1408_v3 = vsel %vm5220_vm3, %v1403_v44, %v1407_v16  ;;  %v1458_v4 = vshrl.u32 %v1211_v59, 16  ;;  %v1467_v6 = vshll.u32 %v5362_v45, 16  ;;  %v1426_v58 = vor.u32 %v1425_v50, %v5372_v47 }
  0x98   : > { %v1429_v7 = vshll.u32 %v5386_v0, 16  ;;  %v1436_v24 = vrot.slane %v1434_v54, 4  ;;  %v1439_v28 = vrot.slane %v1437_v55, 5  ;;  %v5407_v32 = vcombine.low %v1398_v15, %v1408_v3 }
  0x99   : > { %v5409_v9 = vrot.slane %v1416_v60, 4  ;;  %v5411_v34 = vrot.slane %v1443_v63, 5  ;;  %v1460_v37 = vrot.slane %v1458_v4, 4  ;;  %v1463_v38 = vrot.slane %v1461_v20, 5  ;;  %v5441_v63 = vld [vmem:[%s5090_s21 + $0x80] sm:$0x1] }
  0x9a   : > { %4366 = vmatmul.mubr.msk.bf16.gmra.mxu1 %vm474_vm0, %v5129_v19  ;;  %4406 = vmatmul.mubr.msk.bf16.gmra.mxu0 %vm474_vm0, %v5140_v23  ;;  %v5381_v19 = vcombine.low %v1350_v18, %v1360_v56  ;;  %v5417_v56 = vld [vmem:[%s5090_s21 + $0x74] sm:$0x1]  ;;  %v1491_v39 = vshll.u32 %v5401_v22, 16  ;;  %v1495_v59 = vshrl.u32 %v5401_v22, 16  ;;  %v5425_v42 = vrot.slane %v1467_v6, 5 }
  0x9b   : > { %4369 = vmatprep.mubr.msk.bf16.mxu1 %vm474_vm0, %v5140_v23  ;;  %4409 = vmatprep.mubr.msk.bf16.mxu0 %vm474_vm0, %v5146_v27  ;;  %v1447_v23 = vshrl.u32 %v5356_v41, 16  ;;  %v1473_v43 = vrot.slane %v1471_v12, 4  ;;  %v1484_v44 = vrot.slane %v1482_v30, 4  ;;  %v1487_v16 = vrot.slane %v1485_v49, 5  ;;  %v1220_v6 = vld [vmem:[%s5090_s21 + $0x90] sm:$0xf] }
  0x9c   : > { %v5430_v50 = vrot.slane %v1426_v58, 4  ;;  %v5432_v52 = vrot.slane %v1429_v7, 5  ;;  %v1453_v54 = vshll.u32 %v5396_v21, 16  ;;  %v5443_v15 = vrot.slane %v1491_v39, 5  ;;  %v4782_v12 = vld [vmem:[%s5090_s21 + $0xcc] sm:$0xff]  }
  0x9d   : > { %v1449_v18 = vrot.slane %v1447_v23, 4  ;;  %v1509_v23 = vshll.u32 %v1217_v36, 16  ;;  %v1497_v3 = vrot.slane %v1495_v59, 4  ;;  %v1515_v4 = vshll.u32 %v5414_v33, 16  ;;  %v5460_v59 = vld [vmem:[%s5090_s21 + $0x8c] sm:$0x1] }
  0x9e   : > { %v1519_v20 = vshrl.u32 %v5414_v33, 16  ;;  %v1464_v30 = vor.u32 %v1463_v38, %v1460_v37  ;;  %v1474_v49 = vor.u32 %v1473_v43, %v5425_v42  ;;  %v1477_v58 = vshll.u32 %v5417_v56, 16 }
  0x9f   : > { %v1450_v60 = vor.u32 %v1449_v18, %v5411_v34  ;;  %v1488_v7 = vor.u32 %v1487_v16, %v1484_v44  ;;  %v1455_v18 = vrot.slane %v1453_v54, 5  ;;  %v1501_v39 = vshll.u32 %v5441_v63, 16 }
  0xa0   : > { %v1511_v37 = vrot.slane %v1509_v23, 5  ;;  %v1530_v38 = vshrl.u32 %v1220_v6, 16  ;;  %v1533_v43 = vshll.u32 %v1220_v6, 16  ;;  %v1498_v44 = vor.u32 %v1497_v3, %v5443_v15  ;;  %v1223_v3 = vld [vmem:[%s5090_s21 + $0x9c] sm:$0xf] }
  0xa1   : > { %v1451_v55 = vrot.slane %v1450_v60, 4  ;;  %v5463_v16 = vrot.slane %v1515_v4, 5  ;;  %v1521_v14 = vrot.slane %v1519_v20, 4  ;;  %v1489_v54 = vrot.slane %v1488_v7, 4  ;;  %v5479_v6 = vld [vmem:[%s5090_s21 + $0x98] sm:$0x1] }
  0xa2   : > { %4370 = vmatmul.mubr.msk.bf16.gmra.mxu1 %vm474_vm0, %v5146_v27  ;;  %4410 = vmatmul.mubr.msk.bf16.gmra.mxu0 %vm474_vm0, %v5159_v29  ;;  %v1440_v27 = vor.u32 %v1439_v28, %v1436_v24  ;;  %v5452_v24 = vld [vmem:[%s5090_s21 + $0x94] sm:$0xf]  ;;  %v1432_v28 = vsel %vm5220_vm3, %v5430_v50, %v5432_v52  ;;  %v1465_v50 = vrot.slane %v1464_v30, 4  ;;  %v1475_v52 = vrot.slane %v1474_v49, 4 }
  0xa3   : > { %4373 = vmatprep.mubr.msk.bf16.mxu1 %vm474_vm0, %v5159_v29  ;;  %4413 = vmatprep.mubr.msk.bf16.mxu0 %vm474_vm0, %v4781_v10  ;;  %v1506_v29 = vshrl.u32 %v1217_v36, 16  ;;  %v1543_v23 = vshrl.u32 %v5452_v24, 16  ;;  %v1525_v20 = vshll.u32 %v5460_v59, 16  ;;  %v1456_v30 = vsel %vm5220_vm3, %v1451_v55, %v1455_v18 }
  0xa4   : > { %v1441_v36 = vrot.slane %v1440_v27, 4  ;;  %v1479_v27 = vrot.slane %v1477_v58, 5  ;;  %v1499_v49 = vrot.slane %v1498_v44, 4  ;;  %v2460_v58 = vld [vmem:[%s5090_s21 + $0xc] sm:$0xe]  ;;  %v1470_v7 = vsel %vm5220_vm3, %v1465_v50, %v5425_v42 }
  0xa5   : > { %v1508_v1 = vrot.slane %v1506_v29, 4  ;;  %v1503_v29 = vrot.slane %v1501_v39, 5  ;;  %v5494_v39 = vld [vmem:[%s5090_s21 + $0xa0] sm:$0xf]  ;;  %v1545_v18 = vrot.slane %v1543_v23, 4  ;;  %v4014_v50 = vrot.slane %v2460_v58, 9 }
  0xa6   : > { %v1446_v60 = vsel %vm5220_vm3, %v1441_v36, %v5411_v34  ;;  %v1522_v34 = vor.u32 %v1521_v14, %v5463_v16  ;;  %v1494_v36 = vsel %vm5220_vm3, %v1489_v54, %v5443_v15  ;;  %v1554_v14 = vshrl.u32 %v1223_v3, 16  ;;  %v4785_v15 = vld [vmem:[#allocation6 + $0xf0] sm:$0xff]  }
  0xa7   : > { %v1512_v4 = vor.u32 %v1511_v37, %v1508_v1  ;;  %v1480_v1 = vsel %vm5220_vm3, %v1475_v52, %v1479_v27  ;;  %v1557_v37 = vshll.u32 %v1223_v3, 16  ;;  %v4786_v52 = vld [vmem:[#allocation6 + $0x50] sm:$0xff]   ;;  %v1504_v27 = vsel %vm5220_vm3, %v1499_v49, %v1503_v29 }
  0xa8   : > { %v5508_v54 = vrot.slane %v1522_v34, 4  ;;  %v6689_v23 = vrot.slane %v5188_v51, 5  ;;  %v6690_v29 = vsel %vm5220_vm3, %v5409_v9, %v5372_v47  ;;  %v1563_v51 = vshll.u32 %v5494_v39, 16  ;;  %v5560_v58 = vld [vmem:[%s5090_s21 + $0xa4] sm:$0x1] }
  0xa9   : > { %v5502_v42 = vrot.slane %v1512_v4, 4  ;;  %v5525_v4 = vcombine.low %v6690_v29, %v1432_v28  ;;  %v5538_v47 = vrot.slane %v1554_v14, 4  ;;  %v5540_v9 = vrot.slane %v1557_v37, 5  ;;  %v2465_v14 = vld [vmem:[%s5090_s21 + $0x48] sm:$0xe] }
  0xaa   : > { %4374 = vmatmul.mubr.msk.bf16.gmra.mxu1 %vm474_vm0, %v4781_v10  ;;  %4414 = vmatmul.mubr.msk.bf16.gmra.mxu0 %vm474_vm0, %v4782_v12  ;;  %v1539_v10 = vshll.u32 %v5452_v24, 16  ;;  %v1535_v12 = vrot.slane %v1533_v43, 5  ;;  %v5504_v43 = vrot.slane %v1525_v20, 5  ;;  %v2541_v3 = vsel %vm5498_vm6, %v5234_v25, %v6689_v23 }
  0xab   : > { %4425 = vmatprep.mubr.msk.bf16.mxu1 %vm474_vm0, %v5319_v11  ;;  %4465 = vmatprep.mubr.msk.bf16.mxu0 %vm474_vm0, %v5368_v26  ;;  %v1532_v11 = vrot.slane %v1530_v38, 4  ;;  %v5527_v20 = vcombine.low %v1446_v60, %v1456_v30  ;;  %v2464_v60 = vld [vmem:[%s5090_s21 + $0x3c] sm:$0xe]  ;;  %v5570_v37 = vrot.slane %v1563_v51, 5  ;;  %v2565_v51 = vrot.slane %v5255_v40, 5 }
  0xac   : > { %v5496_v55 = vrot.slane %v1539_v10, 5  ;;  %v1549_v10 = vshll.u32 %v5479_v6, 16  ;;  %v4788_v30 = vld [vmem:[#allocation6 + $0x48] sm:$0xff]   ;;  %v4018_v23 = vrot.slane %v2464_v60, 9  ;;  %v2572_v40 = vrot.slane %v5272_v5, 5 }
  0xad   : > { %v1536_v44 = vor.u32 %v1535_v12, %v1532_v11  ;;  %v6691_v11 = vrot.slane %v5177_v48, 5  ;;  %v5549_v48 = vcombine.low %v1470_v7, %v1480_v1  ;;  %v2567_v49 = vrot.slane %v2565_v51, 4  ;;  %v2467_v7 = vld [vmem:[%s5090_s21 + $0x60] sm:$0xe] }
  0xae   : > { %v1546_v12 = vor.u32 %v1545_v18, %v5496_v55  ;;  %v5566_v1 = vrot.slane %v1549_v10, 5  ;;  %v1560_v10 = vor.u32 %v5540_v9, %v5538_v47  ;;  %v2566_v60 = vsel %vm5498_vm6, %v4018_v23, %v2565_v51 }
  0xaf   : > { %v2538_v25 = vsel %vm5498_vm6, %v4014_v50, %v6691_v11  ;;  %v5557_v34 = vrot.slane %v1536_v44, 4  ;;  %v5573_v44 = vld [vmem:[%s5090_s21 + $0xa8] sm:$0xf]  ;;  %v2558_v50 = vrot.slane %v5241_v35, 5  ;;  %v2466_v11 = vld [vmem:[%s5090_s21 + $0x54] sm:$0xe] }
  0xb0   : > { %v5542_v28 = vcombine.low %v2538_v25, %v2541_v3  ;;  %v5577_v3 = vrot.slane %v1546_v12, 4  ;;  %v4789_v25 = vld [vmem:[#allocation6 + $0xe0] sm:$0xff]   ;;  %v4021_v29 = vrot.slane %v2467_v7, 9 }
  0xb1   : > { %v4790_v12 = vld [vmem:[#allocation6 + $0x40] sm:$0xff]  }
  0xb2   : > { %4426 = vmatmul.mubr.msk.bf16.vlgmr.msra.gmra.mxu1 %vm474_vm0, %v5368_v26  ;;  %4466 = vmatmul.mubr.msk.bf16.vlgmr.msra.gmra.mxu0 %vm474_vm0, %v5370_v46  ;;  %v2463_v26 = vld [vmem:[%s5090_s21 + $0x30] sm:$0xe] }
  0xb3   : > { %4498 = vmatpush3.bf16.msra.mxu1 %v5195_v61  ;;  %4538 = vmatpush3.bf16.msra.mxu0 %v5197_v62  ;;  %v5551_v61 = vcombine.low %v1494_v36, %v1504_v27  ;;  %v4787_v62 = vld [vmem:[#allocation6 + $0xe8] sm:$0xff]   ;;  %v1567_v36 = vshrl.u32 %v5494_v39, 16  ;;  %v4017_v18 = vrot.slane %v2463_v26, 9  ;;  %v2561_v27 = vrot.slane %v5279_v8, 5 }
  0xb4   : > { %4429 = vmatprep.mubr.msk.bf16.mxu1 %vm474_vm0, %v5370_v46  ;;  %4469 = vmatprep.mubr.msk.bf16.mxu0 %vm474_vm0, %v5379_v53  ;;  %v2560_v8 = vrot.slane %v2558_v50, 4 }
  0xb5   : > { %4499 = vmatprep.subr.bf16.mxu1 %v4785_v15  ;;  %4539 = vmatprep.subr.bf16.mxu0 %v4786_v52  ;;  %v2559_v35 = vsel %vm5498_vm6, %v4017_v18, %v2558_v50  ;;  %v5587_v26 = vrot.slane %v1567_v36, 4  ;;  %v2575_v36 = vrot.slane %v5303_v2, 5  ;;  %v2468_v50 = vld [vmem:[%s5090_s21 + $0x6c] sm:$0xe]  ;;  %v2469_v18 = vld [vmem:[%s5090_s21 + $0x78] sm:$0xe] }
  0xb7   : > { %4500 = vmatpush3.bf16.msra.mxu1 %v4785_v15  ;;  %4540 = vmatpush3.bf16.msra.mxu0 %v4786_v52  ;;  %v2568_v15 = vrot.slane %v5286_v31, 5  ;;  %v4019_v52 = vrot.slane %v2465_v14, 9  ;;  %v2562_v31 = vsel %vm5498_vm6, %v2560_v8, %v2561_v27  ;;  %v4020_v14 = vrot.slane %v2466_v11, 9 }
  0xb8   : > { %4501 = vmatprep.subr.bf16.mxu1 %v4787_v62  ;;  %4541 = vmatprep.subr.bf16.mxu0 %v4788_v30  ;;  %v5606_v5 = vcombine.low %v2559_v35, %v2562_v31  ;;  %v2574_v27 = vrot.slane %v2572_v40, 4  ;;  %v2579_v11 = vrot.slane %v5326_v13, 5  ;;  %v2582_v8 = vrot.slane %v5386_v0, 5  ;;  %v5617_v35 = vld [vmem:[#allocation6 + $0xb8] sm:$0xff]  }
  0xb9   : > { %v2569_v23 = vsel %vm5498_vm6, %v2567_v49, %v2568_v15  ;;  %v2573_v51 = vsel %vm5498_vm6, %v4019_v52, %v2572_v40  ;;  %v5619_v49 = vld [vmem:[#allocation6 + $0x118] sm:$0xff]   ;;  %v4022_v52 = vrot.slane %v2468_v50, 9  ;;  %v2470_v40 = vld [vmem:[%s5090_s21 + $0x84] sm:$0xe] }
  0xba   : > { %4430 = vmatmul.mubr.msk.bf16.gmra.mxu1 %vm474_vm0, %v5379_v53  ;;  %4470 = vmatmul.mubr.msk.bf16.gmra.mxu0 %vm474_vm0, %v5381_v19  ;;  %v5612_v2 = vcombine.low %v2566_v60, %v2569_v23  ;;  %v2576_v15 = vsel %vm5498_vm6, %v2574_v27, %v2575_v36  ;;  %v2580_v0 = vsel %vm5498_vm6, %v4020_v14, %v2579_v11  ;;  %v2581_v7 = vrot.slane %v2579_v11, 4 }
  0xbb   : > { %4433 = vmatprep.mubr.msk.bf16.mxu1 %vm474_vm0, %v5381_v19  ;;  %4473 = vmatprep.mubr.msk.bf16.mxu0 %vm474_vm0, %v5383_v57  ;;  %v5625_v13 = vcombine.low %v2573_v51, %v2576_v15  ;;  %v2593_v60 = vrot.slane %v5362_v45, 5  ;;  %v4023_v36 = vrot.slane %v2469_v18, 9  ;;  %v2600_v45 = vrot.slane %v5401_v22, 5  ;;  %v2471_v51 = vld [vmem:[%s5090_s21 + $0x90] sm:$0xe] }
  0xbc   : > { %4502 = vmatpush3.bf16.msra.mxu1 %v4787_v62  ;;  %4542 = vmatpush3.bf16.msra.mxu0 %v4788_v30  ;;  %v2586_v62 = vrot.slane %v5356_v41, 5  ;;  %v2589_v30 = vrot.slane %v5396_v21, 5  ;;  %v2596_v41 = vrot.slane %v5417_v56, 5  ;;  %v2583_v21 = vsel %vm5498_vm6, %v2581_v7, %v2582_v8  ;;  %v2472_v18 = vld [vmem:[%s5090_s21 + $0x9c] sm:$0xe] }
  0xbd   : > { %4503 = vmatprep.subr.bf16.mxu1 %v4789_v25  ;;  %4543 = vmatprep.subr.bf16.mxu0 %v4790_v12  ;;  %v2594_v14 = vsel %vm5498_vm6, %v4022_v52, %v2593_v60  ;;  %v2595_v50 = vrot.slane %v2593_v60, 4  ;;  %v2601_v11 = vsel %vm5498_vm6, %v4023_v36, %v2600_v45  ;;  %v2602_v8 = vrot.slane %v2600_v45, 4  ;;  %v2473_v52 = vld [vmem:[%s5090_s21 + $0xa8] sm:$0xe] }
  0xbe   : > { %v2587_v31 = vsel %vm5498_vm6, %v4021_v29, %v2586_v62  ;;  %v2588_v23 = vrot.slane %v2586_v62, 4  ;;  %v5642_v29 = vcombine.low %v2580_v0, %v2583_v21  ;;  %v2607_v15 = vrot.slane %v5414_v33, 5 }
  0xbf   : > { %v2597_v27 = vsel %vm5498_vm6, %v2595_v50, %v2596_v41  ;;  %v2610_v62 = vrot.slane %v5460_v59, 5  ;;  %v2614_v7 = vrot.slane %v5452_v24, 5  ;;  %v2617_v60 = vrot.slane %v5479_v6, 5  ;;  %v1227_v41 = vld [vmem:[%s5090_s21 + $0xac] sm:$0xf] }
  0xc0   : > { %4504 = vmatpush3.bf16.msra.mxu1 %v4789_v25  ;;  %4544 = vmatpush3.bf16.msra.mxu0 %v4790_v12  ;;  %v2590_v56 = vsel %vm5498_vm6, %v2588_v23, %v2589_v30  ;;  %v2603_v25 = vrot.slane %v5441_v63, 5  ;;  %v4024_v12 = vrot.slane %v2470_v40, 9  ;;  %v5662_v63 = vcombine.low %v2594_v14, %v2597_v27  ;;  %v5681_v6 = vld [vmem:[%s5090_s21 + $0xb0] sm:$0x1] }
  0xc1   : > { %4577 = vmatprep.subr.bf16.mxu1 %v5617_v35  ;;  %4617 = vmatprep.subr.bf16.mxu0 %v5619_v49  ;;  %v5652_v22 = vcombine.low %v2587_v31, %v2590_v56  ;;  %v4025_v30 = vrot.slane %v2471_v51, 9  ;;  %v4026_v40 = vrot.slane %v2472_v18, 9  ;;  %v2609_v33 = vrot.slane %v2607_v15, 4 }
  0xc2   : > { %4434 = vmatmul.mubr.msk.bf16.gmra.mxu1 %vm474_vm0, %v5383_v57  ;;  %4474 = vmatmul.mubr.msk.bf16.gmra.mxu0 %vm474_vm0, %v5407_v32  ;;  %v2604_v0 = vsel %vm5498_vm6, %v2602_v8, %v2603_v25  ;;  %v2608_v23 = vsel %vm5498_vm6, %v4024_v12, %v2607_v15  ;;  %v2621_v59 = vrot.slane %v5494_v39, 5  ;;  %v2616_v21 = vrot.slane %v2614_v7, 4  ;;  %v1229_v25 = vld [vmem:[%s5090_s21 + $0xb4] sm:$0xf] }
  0xc3   : > { %4437 = vmatprep.mubr.msk.bf16.mxu1 %vm474_vm0, %v5407_v32  ;;  %4477 = vmatprep.mubr.msk.bf16.mxu0 %vm474_vm0, %v5525_v4  ;;  %v5671_v31 = vcombine.low %v2601_v11, %v2604_v0  ;;  %v2615_v36 = vsel %vm5498_vm6, %v4025_v30, %v2614_v7  ;;  %v2624_v24 = vrot.slane %v5560_v58, 5  ;;  %v4027_v14 = vrot.slane %v2473_v52, 9  ;;  %v1230_v11 = vld [vmem:[%s5090_s21 + $0xb8] sm:$0xf]  ;;  %v2474_v52 = vld [vmem:[%s5090_s21 + $0xb4] sm:$0xe] }
  0xc4   : > { %v2611_v50 = vsel %vm5498_vm6, %v2609_v33, %v2610_v62  ;;  %v2622_v45 = vsel %vm5498_vm6, %v4026_v40, %v2621_v59  ;;  %v2623_v51 = vrot.slane %v2621_v59, 4  ;;  %v2628_v39 = vrot.slane %v1227_v41, 5 }
  0xc5   : > { %v1581_v56 = vshll.u32 %v5573_v44, 16  ;;  %v5689_v12 = vcombine.low %v2608_v23, %v2611_v50  ;;  %v2618_v18 = vsel %vm5498_vm6, %v2616_v21, %v2617_v60  ;;  %v2631_v27 = vrot.slane %v5681_v6, 5 }
  0xc6   : > { %v5695_v8 = vcombine.low %v2615_v36, %v2618_v18  ;;  %v2625_v15 = vsel %vm5498_vm6, %v2623_v51, %v2624_v24  ;;  %v2629_v62 = vsel %vm5498_vm6, %v4027_v14, %v2628_v39  ;;  %v2630_v30 = vrot.slane %v2628_v39, 4 }
  0xc7   : > { %v1570_v0 = vor.u32 %v5587_v26, %v5570_v37  ;;  %v1587_v7 = vshll.u32 %v1227_v41, 16  ;;  %v1591_v60 = vshrl.u32 %v1227_v41, 16  ;;  %v5708_v40 = vcombine.low %v2622_v45, %v2625_v15  ;;  %v1231_v26 = vld [vmem:[%s5090_s21 + $0xbc] sm:$0x1] }
  0xc8   : > { %v1561_v23 = vrot.slane %v1560_v10, 4  ;;  %v1602_v33 = vshrl.u32 %v1229_v25, 16  ;;  %v1605_v59 = vshll.u32 %v1229_v25, 16  ;;  %v2632_v36 = vsel %vm5498_vm6, %v2630_v30, %v2631_v27 }
  0xc9   : > { %v1611_v41 = vshll.u32 %v1230_v11, 16  ;;  %v1615_v21 = vshrl.u32 %v1230_v11, 16  ;;  %v5720_v24 = vcombine.low %v2629_v62, %v2632_v36  ;;  %v4028_v14 = vrot.slane %v2474_v52, 9 }
  0xca   : > { %4438 = vmatmul.mubr.msk.bf16.gmra.mxu1 %vm474_vm0, %v5525_v4  ;;  %4478 = vmatmul.mubr.msk.bf16.gmra.mxu0 %vm474_vm0, %v5527_v20  ;;  %v6692_v50 = vshrl.u32 %v5573_v44, 16  ;;  %v1583_v51 = vrot.slane %v1581_v56, 5  ;;  %v2635_v39 = vrot.slane %v1230_v11, 5  ;;  %v2638_v47 = vrot.slane %v1231_v26, 5  ;;  %v1232_v11 = vld [vmem:[%s5090_s21 + $0xc0] sm:$0xf] }
  0xcb   : > { %4441 = vmatprep.mubr.msk.bf16.mxu1 %vm474_vm0, %v5527_v20  ;;  %4481 = vmatprep.mubr.msk.bf16.mxu0 %vm474_vm0, %v5549_v48  ;;  %v1571_v9 = vrot.slane %v1570_v0, 4  ;;  %v6693_v10 = vshll.u32 %v5560_v58, 16  ;;  %v1589_v18 = vrot.slane %v1587_v7, 5  ;;  %v1593_v27 = vrot.slane %v1591_v60, 4  ;;  %v5746_v7 = vld [vmem:[%s5090_s21 + $0xc4] sm:$0xf] }
  0xcc   : > { %v1580_v45 = vrot.slane %v6692_v50, 4  ;;  %v6694_v15 = vsel %vm5220_vm3, %v5508_v54, %v5504_v43  ;;  %v6695_v44 = vsel %vm5220_vm3, %v5502_v42, %v5463_v16  ;;  %v1542_v58 = vsel %vm5220_vm3, %v5557_v34, %v5496_v55 }
  0xcd   : > { %v1575_v25 = vrot.slane %v6693_v10, 5  ;;  %v5736_v56 = vcombine.low %v6695_v44, %v6694_v15  ;;  %v2636_v62 = vsel %vm5498_vm6, %v4028_v14, %v2635_v39  ;;  %v2637_v30 = vrot.slane %v2635_v39, 4 }
  0xce   : > { %v1604_v52 = vrot.slane %v1602_v33, 4  ;;  %v1607_v0 = vrot.slane %v1605_v59, 5  ;;  %v1613_v43 = vrot.slane %v1611_v41, 5  ;;  %v1617_v54 = vrot.slane %v1615_v21, 4 }
  0xcf   : > { %v1552_v16 = vsel %vm5220_vm3, %v5577_v3, %v5566_v1  ;;  %v1566_v55 = vsel %vm5220_vm3, %v1561_v23, %v5570_v37  ;;  %v1584_v42 = vor.u32 %v1583_v51, %v1580_v45  ;;  %v2639_v34 = vsel %vm5498_vm6, %v2637_v30, %v2638_v47 }
  0xd0   : > { %v1576_v60 = vsel %vm5220_vm3, %v1571_v9, %v1575_v25  ;;  %v1594_v33 = vor.u32 %v1593_v27, %v1589_v18  ;;  %v1597_v1 = vshll.u32 %v5681_v6, 16  ;;  %v5764_v3 = vcombine.low %v2636_v62, %v2639_v34 }
  0xd1   : > { %v1948_v37 = vshrl.u32 %v1232_v11, 16  ;;  %v1951_v23 = vshll.u32 %v1232_v11, 16  ;;  %v1957_v59 = vshll.u32 %v5746_v7, 16  ;;  %v1961_v36 = vshrl.u32 %v5746_v7, 16  ;;  %v1234_v11 = vld [vmem:[%s5090_s21 + $0xc8] sm:$0x1] }
  0xd2   : > { %4442 = vmatmul.mubr.msk.bf16.gmra.mxu1 %vm474_vm0, %v5549_v48  ;;  %4482 = vmatmul.mubr.msk.bf16.gmra.mxu0 %vm474_vm0, %v5551_v61  ;;  %v1608_v41 = vor.u32 %v1607_v0, %v1604_v52  ;;  %v1618_v21 = vor.u32 %v1617_v54, %v1613_v43  ;;  %v1621_v14 = vshll.u32 %v1231_v26, 16  ;;  %v5772_v50 = vcombine.low %v1542_v58, %v1552_v16  ;;  %v2459_v0 = vld [vmem:[%s5090_s21] sm:$0xe]  ;;  %v4799_v16 = vld [vmem:[%s5090_s21 + $0x4] sm:$0xf] }
  0xd3   : > { %4445 = vmatprep.mubr.msk.bf16.mxu1 %vm474_vm0, %v5551_v61  ;;  %4485 = vmatprep.mubr.msk.bf16.mxu0 %vm474_vm0, %v5736_v56  ;;  %v5774_v6 = vcombine.low %v1566_v55, %v1576_v60  ;;  %v1585_v45 = vrot.slane %v1584_v42, 4  ;;  %v1595_v51 = vrot.slane %v1594_v33, 4  ;;  %v1599_v39 = vrot.slane %v1597_v1, 5 }
  0xd4   : > { %v1950_v47 = vrot.slane %v1948_v37, 4  ;;  %v1953_v9 = vrot.slane %v1951_v23, 5  ;;  %v1959_v10 = vrot.slane %v1957_v59, 5  ;;  %v1963_v25 = vrot.slane %v1961_v36, 4  ;;  %v4800_v59 = vld [vmem:[%s5090_s21 + $0x8] sm:$0x1] }
  0xd5   : > { %v1609_v27 = vrot.slane %v1608_v41, 4  ;;  %v1619_v15 = vrot.slane %v1618_v21, 4  ;;  %v1623_v44 = vrot.slane %v1621_v14, 5  ;;  %v1590_v26 = vsel %vm5220_vm3, %v1585_v45, %v1589_v18  ;;  %v5807_v41 = vld [vmem:[%s5090_s21 + $0xd0] sm:$0xf] }
  0xd6   : > { %v1600_v58 = vsel %vm5220_vm3, %v1595_v51, %v1599_v39  ;;  %v1954_v62 = vor.u32 %v1953_v9, %v1950_v47  ;;  %v1964_v30 = vor.u32 %v1963_v25, %v1959_v10  ;;  %v1967_v52 = vshll.u32 %v1234_v11, 16  ;;  %v5810_v21 = vld [vmem:[%s5090_s21 + $0xd4] sm:$0x1]  ;;  %v2475_v47 = vld [vmem:[%s5090_s21 + $0xc0] sm:$0xe] }
  0xd7   : > { %v1614_v54 = vsel %vm5220_vm3, %v1609_v27, %v1613_v43  ;;  %v1624_v18 = vsel %vm5220_vm3, %v1619_v15, %v1623_v44  ;;  %v2530_v55 = vrot.slane %v4799_v16, 5  ;;  %v5795_v42 = vcombine.low %v1590_v26, %v1600_v58  ;;  %v2476_v44 = vld [vmem:[%s5090_s21 + $0xcc] sm:$0xe]  ;;  %v4801_v26 = vld [vmem:[%s5090_s21 + $0x1c] sm:$0xf] }
  0xd8   : > { %v4013_v34 = vrot.slane %v2459_v0, 9  ;;  %v5797_v60 = vcombine.low %v1614_v54, %v1624_v18  ;;  %v1955_v33 = vrot.slane %v1954_v62, 4  ;;  %v1965_v1 = vrot.slane %v1964_v30, 4 }
  0xd9   : > { %v1969_v37 = vrot.slane %v1967_v52, 5  ;;  %v2532_v23 = vrot.slane %v2530_v55, 4  ;;  %v2533_v36 = vrot.slane %v4800_v59, 5  ;;  %v2967_v14 = vrot.slane %v5746_v7, 5  ;;  %v2461_v52 = vld [vmem:[%s5090_s21 + $0x18] sm:$0xe] }
  0xda   : > { %4446 = vmatmul.mubr.msk.bf16.gmra.mxu1 %vm474_vm0, %v5736_v56  ;;  %4486 = vmatmul.mubr.msk.bf16.gmra.mxu0 %vm474_vm0, %v5772_v50  ;;  %v2531_v43 = vsel %vm5498_vm6, %v4013_v34, %v2530_v55  ;;  %v1960_v45 = vsel %vm5220_vm3, %v1955_v33, %v1959_v10  ;;  %v3212_v39 = vrot.slane %v5810_v21, 5  ;;  %v3209_v9 = vrot.slane %v5807_v41, 5  ;;  %v4803_v59 = vld [vmem:[%s5090_s21 + $0x28] sm:$0xf] }
  0xdb   : > { %4449 = vmatprep.mubr.msk.bf16.mxu1 %vm474_vm0, %v5772_v50  ;;  %4489 = vmatprep.mubr.msk.bf16.mxu0 %vm474_vm0, %v5774_v6  ;;  %v1970_v51 = vsel %vm5220_vm3, %v1965_v1, %v1969_v37  ;;  %v2534_v7 = vsel %vm5498_vm6, %v2532_v23, %v2533_v36  ;;  %v4065_v25 = vrot.slane %v2475_v47, 9  ;;  %v2969_v27 = vrot.slane %v2967_v14, 4  ;;  %v4802_v37 = vld [vmem:[%s5090_s21 + $0x20] sm:$0x1]  ;;  %v4804_v47 = vld [vmem:[%s5090_s21 + $0x2c] sm:$0x1] }
  0xdc   : > { %v2970_v15 = vrot.slane %v1234_v11, 5  ;;  %v2544_v58 = vrot.slane %v4801_v26, 5  ;;  %v4087_v62 = vrot.slane %v2476_v44, 9  ;;  %v3211_v10 = vrot.slane %v3209_v9, 4  ;;  %v4796_v44 = vld [vmem:[#allocation6 + $0x108] sm:$0xff]  }
  0xdd   : > { %v5828_v30 = vcombine.low %v1960_v45, %v1970_v51  ;;  %v2968_v0 = vsel %vm5498_vm6, %v4065_v25, %v2967_v14  ;;  %v4029_v18 = vcombine.low %v2531_v43, %v2534_v7  ;;  %v4015_v33 = vrot.slane %v2461_v52, 9  ;;  %v2462_v43 = vld [vmem:[%s5090_s21 + $0x24] sm:$0xe] }
  0xde   : > { %v2971_v54 = vsel %vm5498_vm6, %v2969_v27, %v2970_v15  ;;  %v5839_v11 = vsel %vm5498_vm6, %v4087_v62, %v3209_v9  ;;  %v5843_v55 = vsel %vm5498_vm6, %v3211_v10, %v3212_v39  ;;  %v2546_v1 = vrot.slane %v2544_v58, 4  ;;  %v4793_v25 = vld [vmem:[#allocation6 + $0xb0] sm:$0xff]  }
  0xdf   : > { %v5835_v16 = vcombine.low %v2968_v0, %v2971_v54  ;;  %v4088_v34 = vcombine.low %v5839_v11, %v5843_v55  ;;  %v2547_v23 = vrot.slane %v4802_v37, 5  ;;  %v2551_v36 = vrot.slane %v4803_v59, 5  ;;  %v4794_v27 = vld [vmem:[#allocation6 + $0x110] sm:$0xff]  }
  0xe0   : > { %v2545_v14 = vsel %vm5498_vm6, %v4015_v33, %v2544_v58  ;;  %v4016_v51 = vrot.slane %v2462_v43, 9  ;;  %v2554_v9 = vrot.slane %v4804_v47, 5 }
  0xe1   : > { %v2548_v45 = vsel %vm5498_vm6, %v2546_v1, %v2547_v23  ;;  %v2553_v39 = vrot.slane %v2551_v36, 4  ;;  %v2223_v23 = vshll.u32 %v5810_v21, 16 }
  0xe2   : > { %4450 = vmatmul.mubr.msk.bf16.gmra.mxu1 %vm474_vm0, %v5774_v6  ;;  %4490 = vmatmul.mubr.msk.bf16.gmra.mxu0 %vm474_vm0, %v5795_v42  ;;  %v5862_v7 = vcombine.low %v2545_v14, %v2548_v45 }
  0xe3   : > { %4453 = vmatprep.mubr.msk.bf16.mxu1 %vm474_vm0, %v5795_v42  ;;  %4493 = vmatprep.mubr.msk.bf16.mxu0 %vm474_vm0, %v5797_v60  ;;  %v2555_v15 = vsel %vm5498_vm6, %v2553_v39, %v2554_v9 }
  0xea   : > { %4454 = vmatmul.mubr.msk.bf16.gmra.mxu1 %vm474_vm0, %v5797_v60  ;;  %4494 = vmatmul.mubr.msk.bf16.gmra.mxu0 %vm474_vm0, %v5828_v30 }
  0xeb   : > { %4505 = vmatprep.mubr.msk.bf16.mxu1 %vm474_vm0, %v5370_v46  ;;  %4545 = vmatprep.mubr.msk.bf16.mxu0 %vm474_vm0, %v4029_v18  ;;  %v2552_v46 = vsel %vm5498_vm6, %v4016_v51, %v2551_v36  ;;  %v2225_v51 = vrot.slane %v2223_v23, 5 }
  0xec   : > { %v5878_v26 = vcombine.low %v2552_v46, %v2555_v15 }
  0xf2   : > { %4506 = vmatmul.mubr.msk.bf16.vlgmr.msra.gmra.mxu1 %vm474_vm0, %v5379_v53  ;;  %4546 = vmatmul.mubr.msk.bf16.vlgmr.msra.gmra.mxu0 %vm474_vm0, %v5542_v28  ;;  %v4795_v53 = vld [vmem:[#allocation6 + $0xa8] sm:$0xff]  }
  0xf3   : > { %4578 = vmatpush3.bf16.msra.mxu1 %v5617_v35  ;;  %4618 = vmatpush3.bf16.msra.mxu0 %v5619_v49  ;;  %v4797_v35 = vld [vmem:[#allocation6 + $0xa0] sm:$0xff]  }
  0xf4   : > { %4509 = vmatprep.mubr.msk.bf16.mxu1 %vm474_vm0, %v5381_v19  ;;  %4549 = vmatprep.mubr.msk.bf16.mxu0 %vm474_vm0, %v5862_v7  ;;  %v4798_v49 = vld [vmem:[#allocation6 + $0x100] sm:$0xff]   ;;  %v1235_v19 = vld [vmem:[%s5090_s21 + $0xcc] sm:$0xf] }
  0xf5   : > { %4579 = vmatprep.subr.bf16.mxu1 %v4793_v25  ;;  %4619 = vmatprep.subr.bf16.mxu0 %v4794_v27  ;;  %v2204_v38 = vshrl.u32 %v1235_v19, 16 }
  0xf7   : > { %4580 = vmatpush3.bf16.msra.mxu1 %v4793_v25  ;;  %4620 = vmatpush3.bf16.msra.mxu0 %v4794_v27  ;;  %v2206_v10 = vrot.slane %v2204_v38, 4 }
  0xf8   : > { %4581 = vmatprep.subr.bf16.mxu1 %v4795_v53  ;;  %4621 = vmatprep.subr.bf16.mxu0 %v4796_v44 }
  0xfa   : > { %4510 = vmatmul.mubr.msk.bf16.gmra.mxu1 %vm474_vm0, %v5383_v57  ;;  %4550 = vmatmul.mubr.msk.bf16.gmra.mxu0 %vm474_vm0, %v5878_v26 }
  0xfb   : > { %4513 = vmatprep.mubr.msk.bf16.mxu1 %vm474_vm0, %v5407_v32  ;;  %4553 = vmatprep.mubr.msk.bf16.mxu0 %vm474_vm0, %v5606_v5 }
  0xfc   : > { %4582 = vmatpush3.bf16.msra.mxu1 %v4795_v53  ;;  %4622 = vmatpush3.bf16.msra.mxu0 %v4796_v44 }
  0xfd   : > { %4583 = vmatprep.subr.bf16.mxu1 %v4797_v35  ;;  %4623 = vmatprep.subr.bf16.mxu0 %v4798_v49 }
 0x100   : > { %4584 = vmatpush3.bf16.msra.mxu1 %v4797_v35  ;;  %4624 = vmatpush3.bf16.msra.mxu0 %v4798_v49 }
 0x102   : > { %4514 = vmatmul.mubr.msk.bf16.gmra.mxu1 %vm474_vm0, %v5525_v4  ;;  %4554 = vmatmul.mubr.msk.bf16.gmra.mxu0 %vm474_vm0, %v5612_v2  ;;  %v2207_v4 = vshll.u32 %v1235_v19, 16 }
 0x103   : > { %4517 = vmatprep.mubr.msk.bf16.mxu1 %vm474_vm0, %v5527_v20  ;;  %4557 = vmatprep.mubr.msk.bf16.mxu0 %vm474_vm0, %v5625_v13  ;;  %v2213_v20 = vshll.u32 %v5807_v41, 16 }
 0x104   : > { %v2209_v52 = vrot.slane %v2207_v4, 5 }
 0x10a   : > { %4518 = vmatmul.mubr.msk.bf16.gmra.mxu1 %vm474_vm0, %v5549_v48  ;;  %4558 = vmatmul.mubr.msk.bf16.gmra.mxu0 %vm474_vm0, %v5642_v29  ;;  %v2217_v48 = vshrl.u32 %v5807_v41, 16  ;;  %v2210_v41 = vor.u32 %v2209_v52, %v2206_v10 }
 0x10b   : > { %4521 = vmatprep.mubr.msk.bf16.mxu1 %vm474_vm0, %v5551_v61  ;;  %4561 = vmatprep.mubr.msk.bf16.mxu0 %vm474_vm0, %v5652_v22 }
 0x10c   : > { %v2219_v0 = vrot.slane %v2217_v48, 4  ;;  %v2211_v14 = vrot.slane %v2210_v41, 4 }
 0x112   : > { %v5905_v57 = vpop.f32.mrf.mxu0  ;;  %v5907_v32 = vpop.f32.mrf.mxu1  ;;  %4522 = vmatmul.mubr.msk.bf16.gmra.mxu1 %vm474_vm0, %v5736_v56  ;;  %4562 = vmatmul.mubr.msk.bf16.gmra.mxu0 %vm474_vm0, %v5662_v63 }
 0x113   : > { %4525 = vmatprep.mubr.msk.bf16.mxu1 %vm474_vm0, %v5772_v50  ;;  %4565 = vmatprep.mubr.msk.bf16.mxu0 %vm474_vm0, %v5671_v31  ;;  %v2215_v50 = vrot.slane %v2213_v20, 5 }
 0x114   : > { %v5919_v61 = vpop.f32.mrf.mxu0  ;;  %v5921_v58 = vpop.f32.mrf.mxu1 }
 0x115   : > { %v2220_v37 = vor.u32 %v2219_v0, %v2215_v50  ;;  %v2216_v21 = vsel %vm5220_vm3, %v2211_v14, %v2215_v50 }
 0x116   : > { %v5923_v56 = vpop.f32.mrf.mxu0  ;;  %v5925_v62 = vpop.f32.mrf.mxu1 }
 0x117   : > { %v2221_v45 = vrot.slane %v2220_v37, 4 }
 0x118   : > { %v5927_v54 = vpop.f32.mrf.mxu0  ;;  %v5929_v18 = vpop.f32.mrf.mxu1 }
 0x119   : > { %v2226_v25 = vsel %vm5220_vm3, %v2221_v45, %v2225_v51 }
 0x11a   : > { %v5931_v33 = vpop.f32.mrf.mxu0  ;;  %v5933_v1 = vpop.f32.mrf.mxu1  ;;  %4526 = vmatmul.mubr.msk.bf16.gmra.mxu1 %vm474_vm0, %v5774_v6  ;;  %4566 = vmatmul.mubr.msk.bf16.gmra.mxu0 %vm474_vm0, %v5689_v12  ;;  %v3992_v53 = vcombine.low %v2216_v21, %v2226_v25 }
 0x11b   : > { %4529 = vmatprep.mubr.msk.bf16.mxu1 %vm474_vm0, %v5795_v42  ;;  %4569 = vmatprep.mubr.msk.bf16.mxu0 %vm474_vm0, %v5695_v8 }
 0x11c   : > { %v5944_v59 = vpop.f32.mrf.mxu0  ;;  %v5946_v36 = vpop.f32.mrf.mxu1 }
 0x11e   : > { %v5948_v43 = vpop.f32.mrf.mxu0  ;;  %v5950_v6 = vpop.f32.mrf.mxu1 }
 0x120   : > { %v5952_v39 = vpop.f32.mrf.mxu0  ;;  %v5954_v42 = vpop.f32.mrf.mxu1 }
 0x122   : > { %v5956_v47 = vpop.f32.mrf.mxu0  ;;  %v5958_v9 = vpop.f32.mrf.mxu1  ;;  %4530 = vmatmul.mubr.msk.bf16.gmra.mxu1 %vm474_vm0, %v5797_v60  ;;  %4570 = vmatmul.mubr.msk.bf16.gmra.mxu0 %vm474_vm0, %v5708_v40 }
 0x123   : > { %4533 = vmatprep.mubr.msk.bf16.mxu1 %vm474_vm0, %v5828_v30  ;;  %4573 = vmatprep.mubr.msk.bf16.mxu0 %vm474_vm0, %v5720_v24 }
 0x124   : > { %v5972_v27 = vpop.f32.mrf.mxu0  ;;  %v5974_v46 = vpop.f32.mrf.mxu1 }
 0x126   : > { %v5976_v60 = vpop.f32.mrf.mxu0  ;;  %v5978_v15 = vpop.f32.mrf.mxu1 }
 0x128   : > { %v5980_v44 = vpop.f32.mrf.mxu0  ;;  %v5982_v30 = vpop.f32.mrf.mxu1 }
 0x12a   : > { %v5984_v35 = vpop.f32.mrf.mxu0  ;;  %v5986_v49 = vpop.f32.mrf.mxu1  ;;  %4534 = vmatmul.mubr.msk.bf16.gmra.mxu1 %vm474_vm0, %v3992_v53  ;;  %4574 = vmatmul.mubr.msk.bf16.gmra.mxu0 %vm474_vm0, %v5764_v3 }
 0x12b   : > { %4585 = vmatprep.mubr.msk.bf16.mxu1 %vm474_vm0, %v5542_v28  ;;  %4625 = vmatprep.mubr.msk.bf16.mxu0 %vm474_vm0, %v5862_v7 }
 0x12c   : > { %v5995_v17 = vpop.f32.mrf.mxu0  ;;  %v5997_v19 = vpop.f32.mrf.mxu1 }
 0x12e   : > { %v5999_v38 = vpop.f32.mrf.mxu0  ;;  %v6001_v4 = vpop.f32.mrf.mxu1 }
 0x130   : > { %v6003_v20 = vpop.f32.mrf.mxu0  ;;  %v6005_v48 = vpop.f32.mrf.mxu1 }
 0x132   : > { %v4347_v10 = vpop.f32.mrf.mxu1  ;;  %v4387_v52 = vpop.f32.mrf.mxu0  ;;  %4586 = vmatmul.mubr.msk.bf16.vlgmr.msra.gmra.mxu1 %vm474_vm0, %v5862_v7  ;;  %4626 = vmatmul.mubr.msk.bf16.vlgmr.msra.gmra.mxu0 %vm474_vm0, %v5878_v26 }
 0x133   : > { %v920_v28 = vadd.f32 %v4347_v10, %v5905_v57  ;;  %4589 = vmatprep.mubr.msk.bf16.mxu1 %vm474_vm0, %v5878_v26  ;;  %4629 = vmatprep.mubr.msk.bf16.mxu0 %vm474_vm0, %v5606_v5 }
 0x134   : > { %v791_v50 = vpop.f32.mrf.mxu1  ;;  %v1025_v0 = vpop.f32.mrf.mxu0 }
 0x135   : > { %v6016_v41 = vadd.f32 %v4387_v52, %v920_v28  ;;  %v918_v37 = vadd.f32 %v791_v50, %v5919_v61 }
 0x136   : > { %v4348_v23 = vpop.f32.mrf.mxu1  ;;  %v4388_v14 = vpop.f32.mrf.mxu0 }
 0x137   : > { %v6019_v7 = vadd.f32 %v1025_v0, %v918_v37  ;;  %v921_v45 = vadd.f32 %v4348_v23, %v5923_v56 }
 0x138   : > { %v794_v51 = vpop.f32.mrf.mxu1  ;;  %v1028_v57 = vpop.f32.mrf.mxu0 }
 0x139   : > { %v6022_v21 = vadd.f32 %v4388_v14, %v921_v45  ;;  %v919_v26 = vadd.f32 %v794_v51, %v5927_v54 }
 0x13a   : > { %v4351_v25 = vpop.f32.mrf.mxu1  ;;  %v4391_v53 = vpop.f32.mrf.mxu0  ;;  %4590 = vmatmul.mubr.msk.bf16.gmra.mxu1 %vm474_vm0, %v5606_v5  ;;  %4630 = vmatmul.mubr.msk.bf16.gmra.mxu0 %vm474_vm0, %v5612_v2 }
 0x13b   : > { %v6029_v61 = vadd.f32 %v1028_v57, %v919_v26  ;;  %v924_v10 = vadd.f32 %v4351_v25, %v5931_v33  ;;  %4593 = vmatprep.mubr.msk.bf16.mxu1 %vm474_vm0, %v5612_v2  ;;  %4633 = vmatprep.mubr.msk.bf16.mxu0 %vm474_vm0, %v5625_v13 }
 0x13c   : > { %v807_v56 = vpop.f32.mrf.mxu1  ;;  %v1041_v54 = vpop.f32.mrf.mxu0 }
 0x13d   : > { %v6036_v52 = vadd.f32 %v4391_v53, %v924_v10  ;;  %v922_v28 = vadd.f32 %v807_v56, %v5944_v59 }
 0x13e   : > { %v4352_v5 = vpop.f32.mrf.mxu1  ;;  %v4392_v50 = vpop.f32.mrf.mxu0 }
 0x13f   : > { %v6039_v0 = vadd.f32 %v1041_v54, %v922_v28  ;;  %v925_v37 = vadd.f32 %v4352_v5, %v5948_v43 }
 0x140   : > { %v810_v23 = vpop.f32.mrf.mxu1  ;;  %v1044_v33 = vpop.f32.mrf.mxu0 }
 0x141   : > { %v6042_v14 = vadd.f32 %v4392_v50, %v925_v37  ;;  %v923_v2 = vadd.f32 %v810_v23, %v5952_v39 }
 0x142   : > { %v4355_v45 = vpop.f32.mrf.mxu1  ;;  %v4395_v51 = vpop.f32.mrf.mxu0  ;;  %4594 = vmatmul.mubr.msk.bf16.gmra.mxu1 %vm474_vm0, %v5625_v13  ;;  %4634 = vmatmul.mubr.msk.bf16.gmra.mxu0 %vm474_vm0, %v5642_v29 }
 0x143   : > { %v6049_v59 = vadd.f32 %v1044_v33, %v923_v2  ;;  %v928_v57 = vadd.f32 %v4355_v45, %v5956_v47  ;;  %4597 = vmatprep.mubr.msk.bf16.mxu1 %vm474_vm0, %v5642_v29  ;;  %4637 = vmatprep.mubr.msk.bf16.mxu0 %vm474_vm0, %v5652_v22 }
 0x144   : > { %v823_v43 = vpop.f32.mrf.mxu1  ;;  %v1057_v39 = vpop.f32.mrf.mxu0 }
 0x145   : > { %v6056_v26 = vadd.f32 %v4395_v51, %v928_v57  ;;  %v926_v25 = vadd.f32 %v823_v43, %v5972_v27 }
 0x146   : > { %v4356_v13 = vpop.f32.mrf.mxu1  ;;  %v4396_v53 = vpop.f32.mrf.mxu0 }
 0x147   : > { %v6059_v10 = vadd.f32 %v1057_v39, %v926_v25  ;;  %v929_v56 = vadd.f32 %v4356_v13, %v5976_v60 }
 0x148   : > { %v826_v54 = vpop.f32.mrf.mxu1  ;;  %v1060_v47 = vpop.f32.mrf.mxu0 }
 0x149   : > { %v6062_v28 = vadd.f32 %v4396_v53, %v929_v56  ;;  %v927_v29 = vadd.f32 %v826_v54, %v5980_v44 }
 0x14a   : > { %v4359_v5 = vpop.f32.mrf.mxu1  ;;  %v4399_v50 = vpop.f32.mrf.mxu0  ;;  %4598 = vmatmul.mubr.msk.bf16.gmra.mxu1 %vm474_vm0, %v5652_v22  ;;  %4638 = vmatmul.mubr.msk.bf16.gmra.mxu0 %vm474_vm0, %v5662_v63 }
 0x14b   : > { %v6069_v27 = vadd.f32 %v1060_v47, %v927_v29  ;;  %v932_v37 = vadd.f32 %v4359_v5, %v5984_v35  ;;  %4601 = vmatprep.mubr.msk.bf16.mxu1 %vm474_vm0, %v5662_v63  ;;  %4641 = vmatprep.mubr.msk.bf16.mxu0 %vm474_vm0, %v5671_v31 }
 0x14c   : > { %v839_v60 = vpop.f32.mrf.mxu1  ;;  %v1073_v44 = vpop.f32.mrf.mxu0 }
 0x14d   : > { %v6076_v23 = vadd.f32 %v4399_v50, %v932_v37  ;;  %v930_v33 = vadd.f32 %v839_v60, %v5995_v17 }
 0x14e   : > { %v4360_v22 = vpop.f32.mrf.mxu1  ;;  %v4400_v2 = vpop.f32.mrf.mxu0 }
 0x14f   : > { %v6079_v45 = vadd.f32 %v1073_v44, %v930_v33  ;;  %v933_v51 = vadd.f32 %v4360_v22, %v5999_v38 }
 0x150   : > { %v842_v57 = vpop.f32.mrf.mxu1  ;;  %v1076_v35 = vpop.f32.mrf.mxu0 }
 0x151   : > { %v6082_v43 = vadd.f32 %v4400_v2, %v933_v51  ;;  %v931_v63 = vadd.f32 %v842_v57, %v6003_v20 }
 0x152   : > { %v4363_v39 = vpop.f32.mrf.mxu1  ;;  %v4403_v25 = vpop.f32.mrf.mxu0  ;;  %4602 = vmatmul.mubr.msk.bf16.gmra.mxu1 %vm474_vm0, %v5671_v31  ;;  %4642 = vmatmul.mubr.msk.bf16.gmra.mxu0 %vm474_vm0, %v5689_v12 }
 0x153   : > { %v6089_v17 = vadd.f32 %v1076_v35, %v931_v63  ;;  %v936_v13 = vadd.f32 %v4363_v39, %v5907_v32  ;;  %4605 = vmatprep.mubr.msk.bf16.mxu1 %vm474_vm0, %v5689_v12  ;;  %4645 = vmatprep.mubr.msk.bf16.mxu0 %vm474_vm0, %v5695_v8 }
 0x154   : > { %v855_v38 = vpop.f32.mrf.mxu1  ;;  %v1089_v20 = vpop.f32.mrf.mxu0 }
 0x155   : > { %v6096_v53 = vadd.f32 %v4403_v25, %v936_v13  ;;  %v934_v56 = vadd.f32 %v855_v38, %v5921_v58 }
 0x156   : > { %v4364_v31 = vpop.f32.mrf.mxu1  ;;  %v4404_v54 = vpop.f32.mrf.mxu0 }
 0x157   : > { %v6099_v47 = vadd.f32 %v1089_v20, %v934_v56  ;;  %v937_v29 = vadd.f32 %v4364_v31, %v5925_v62 }
 0x158   : > { %v858_v5 = vpop.f32.mrf.mxu1  ;;  %v1092_v32 = vpop.f32.mrf.mxu0 }
 0x159   : > { %v6102_v50 = vadd.f32 %v4404_v54, %v937_v29  ;;  %v935_v12 = vadd.f32 %v858_v5, %v5929_v18 }
 0x15a   : > { %v4367_v37 = vpop.f32.mrf.mxu1  ;;  %v4407_v60 = vpop.f32.mrf.mxu0  ;;  %4606 = vmatmul.mubr.msk.bf16.gmra.mxu1 %vm474_vm0, %v5695_v8  ;;  %4646 = vmatmul.mubr.msk.bf16.gmra.mxu0 %vm474_vm0, %v5708_v40 }
 0x15b   : > { %v6109_v58 = vadd.f32 %v1092_v32, %v935_v12  ;;  %v940_v44 = vadd.f32 %v4367_v37, %v5933_v1  ;;  %4609 = vmatprep.mubr.msk.bf16.mxu1 %vm474_vm0, %v5708_v40  ;;  %4649 = vmatprep.mubr.msk.bf16.mxu0 %vm474_vm0, %v5720_v24 }
 0x15c   : > { %v871_v62 = vpop.f32.mrf.mxu1  ;;  %v1105_v18 = vpop.f32.mrf.mxu0 }
 0x15d   : > { %v6116_v33 = vadd.f32 %v4407_v60, %v940_v44  ;;  %v938_v22 = vadd.f32 %v871_v62, %v5946_v36 }
 0x15e   : > { %v4368_v8 = vpop.f32.mrf.mxu1  ;;  %v4408_v2 = vpop.f32.mrf.mxu0 }
 0x15f   : > { %v6119_v51 = vadd.f32 %v1105_v18, %v938_v22  ;;  %v941_v57 = vadd.f32 %v4368_v8, %v5950_v6 }
 0x160   : > { %v874_v35 = vpop.f32.mrf.mxu1  ;;  %v1108_v1 = vpop.f32.mrf.mxu0 }
 0x161   : > { %v6122_v63 = vadd.f32 %v4408_v2, %v941_v57  ;;  %v939_v40 = vadd.f32 %v874_v35, %v5954_v42 }
 0x162   : > { %v4371_v39 = vpop.f32.mrf.mxu1  ;;  %v4411_v25 = vpop.f32.mrf.mxu0  ;;  %4610 = vmatmul.mubr.msk.bf16.gmra.mxu1 %vm474_vm0, %v5720_v24  ;;  %4650 = vmatmul.mubr.msk.bf16.gmra.mxu0 %vm474_vm0, %v5764_v3 }
 0x163   : > { %v6129_v36 = vadd.f32 %v1108_v1, %v939_v40  ;;  %v944_v13 = vadd.f32 %v4371_v39, %v5958_v9  ;;  %4613 = vmatprep.mubr.msk.bf16.mxu1 %vm474_vm0, %v5764_v3  ;;  %4653 = vmatprep.mubr.msk.bf16.mxu0 %vm474_vm0, %v5835_v16 }
 0x164   : > { %v887_v6 = vpop.f32.mrf.mxu1  ;;  %v1121_v42 = vpop.f32.mrf.mxu0 }
 0x165   : > { %v6136_v38 = vadd.f32 %v4411_v25, %v944_v13  ;;  %v942_v20 = vadd.f32 %v887_v6, %v5974_v46 }
 0x166   : > { %v4372_v24 = vpop.f32.mrf.mxu1  ;;  %v4412_v56 = vpop.f32.mrf.mxu0 }
 0x167   : > { %v6139_v31 = vadd.f32 %v1121_v42, %v942_v20  ;;  %v945_v54 = vadd.f32 %v4372_v24, %v5978_v15 }
 0x168   : > { %v890_v29 = vpop.f32.mrf.mxu1  ;;  %v1124_v9 = vpop.f32.mrf.mxu0 }
 0x169   : > { %v6142_v5 = vadd.f32 %v4412_v56, %v945_v54  ;;  %v943_v3 = vadd.f32 %v890_v29, %v5982_v30 }
 0x16a   : > { %v4375_v32 = vpop.f32.mrf.mxu1  ;;  %v4415_v12 = vpop.f32.mrf.mxu0  ;;  %4614 = vmatmul.mubr.msk.bf16.gmra.mxu1 %vm474_vm0, %v5835_v16  ;;  %4654 = vmatmul.mubr.msk.bf16.gmra.mxu0 %vm474_vm0, %v4088_v34 }
 0x16b   : > { %v6151_v46 = vadd.f32 %v1124_v9, %v943_v3  ;;  %v948_v15 = vadd.f32 %v4375_v32, %v5986_v49 }
 0x16c   : > { %v903_v37 = vpop.f32.mrf.mxu1  ;;  %v1137_v60 = vpop.f32.mrf.mxu0 }
 0x16d   : > { %v6154_v44 = vadd.f32 %v4415_v12, %v948_v15  ;;  %v946_v30 = vadd.f32 %v903_v37, %v5997_v19 }
 0x16e   : > { %v4376_v62 = vpop.f32.mrf.mxu1  ;;  %v4416_v18 = vpop.f32.mrf.mxu0 }
 0x16f   : > { %v6157_v22 = vadd.f32 %v1137_v60, %v946_v30  ;;  %v949_v16 = vadd.f32 %v4376_v62, %v6001_v4 }
 0x170   : > { %v906_v8 = vpop.f32.mrf.mxu1  ;;  %v1140_v11 = vpop.f32.mrf.mxu0 }
 0x171   : > { %v6160_v55 = vadd.f32 %v4416_v18, %v949_v16  ;;  %v947_v34 = vadd.f32 %v906_v8, %v6005_v48 }
 0x172   : > { %v4427_v2 = vpop.f32.mrf.mxu1  ;;  %v4467_v49 = vpop.f32.mrf.mxu0 }
 0x173   : > { %v6163_v57 = vadd.f32 %v1140_v11, %v947_v34  ;;  %v1917_v35 = vadd.f32 %v4427_v2, %v6016_v41 }
 0x174   : > { %v1788_v1 = vpop.f32.mrf.mxu1  ;;  %v2044_v19 = vpop.f32.mrf.mxu0 }
 0x175   : > { %v6166_v40 = vadd.f32 %v4467_v49, %v1917_v35  ;;  %v1915_v39 = vadd.f32 %v1788_v1, %v6019_v7 }
 0x176   : > { %v4428_v25 = vpop.f32.mrf.mxu1  ;;  %v4468_v4 = vpop.f32.mrf.mxu0 }
 0x177   : > { %v6169_v13 = vadd.f32 %v2044_v19, %v1915_v39  ;;  %v1918_v6 = vadd.f32 %v4428_v25, %v6022_v21 }
 0x178   : > { %v1791_v42 = vpop.f32.mrf.mxu1  ;;  %v2047_v48 = vpop.f32.mrf.mxu0 }
 0x179   : > { %v6172_v20 = vadd.f32 %v4468_v4, %v1918_v6  ;;  %v1916_v24 = vadd.f32 %v1791_v42, %v6029_v61 }
 0x17a   : > { %v4431_v56 = vpop.f32.mrf.mxu1  ;;  %v4471_v41 = vpop.f32.mrf.mxu0 }
 0x17b   : > { %v6175_v54 = vadd.f32 %v2047_v48, %v1916_v24  ;;  %v1921_v29 = vadd.f32 %v4431_v56, %v6036_v52 }
 0x17c   : > { %v1804_v9 = vpop.f32.mrf.mxu1  ;;  %v2060_v7 = vpop.f32.mrf.mxu0 }
 0x17d   : > { %v6178_v3 = vadd.f32 %v4471_v41, %v1921_v29  ;;  %v1919_v32 = vadd.f32 %v1804_v9, %v6039_v0 }
 0x17e   : > { %v4432_v12 = vpop.f32.mrf.mxu1  ;;  %v4472_v21 = vpop.f32.mrf.mxu0 }
 0x17f   : > { %v6181_v15 = vadd.f32 %v2060_v7, %v1919_v32  ;;  %v1922_v37 = vadd.f32 %v4432_v12, %v6042_v14 }
 0x180   : > { %v1807_v60 = vpop.f32.mrf.mxu1  ;;  %v2063_v61 = vpop.f32.mrf.mxu0 }
 0x181   : > { %v6184_v30 = vadd.f32 %v4472_v21, %v1922_v37  ;;  %v1920_v62 = vadd.f32 %v1807_v60, %v6049_v59 }
 0x182   : > { %v4435_v18 = vpop.f32.mrf.mxu1  ;;  %v4475_v52 = vpop.f32.mrf.mxu0 }
 0x183   : > { %v6187_v16 = vadd.f32 %v2063_v61, %v1920_v62  ;;  %v1925_v8 = vadd.f32 %v4435_v18, %v6056_v26 }
 0x184   : > { %v1820_v11 = vpop.f32.mrf.mxu1  ;;  %v2076_v0 = vpop.f32.mrf.mxu0 }
 0x185   : > { %v6190_v34 = vadd.f32 %v4475_v52, %v1925_v8  ;;  %v1923_v2 = vadd.f32 %v1820_v11, %v6059_v10 }
 0x186   : > { %v4436_v49 = vpop.f32.mrf.mxu1  ;;  %v4476_v14 = vpop.f32.mrf.mxu0 }
 0x187   : > { %v6193_v35 = vadd.f32 %v2076_v0, %v1923_v2  ;;  %v1926_v1 = vadd.f32 %v4436_v49, %v6062_v28 }
 0x188   : > { %v1823_v19 = vpop.f32.mrf.mxu1  ;;  %v2079_v59 = vpop.f32.mrf.mxu0 }
 0x189   : > { %v6196_v39 = vadd.f32 %v4476_v14, %v1926_v1  ;;  %v1924_v25 = vadd.f32 %v1823_v19, %v6069_v27 }
 0x18a   : > { %v4439_v4 = vpop.f32.mrf.mxu1  ;;  %v4479_v26 = vpop.f32.mrf.mxu0 }
 0x18b   : > { %v6199_v6 = vadd.f32 %v2079_v59, %v1924_v25  ;;  %v1929_v42 = vadd.f32 %v4439_v4, %v6076_v23 }
 0x18c   : > { %v1836_v48 = vpop.f32.mrf.mxu1  ;;  %v2092_v10 = vpop.f32.mrf.mxu0 }
 0x18d   : > { %v6202_v24 = vadd.f32 %v4479_v26, %v1929_v42  ;;  %v1927_v56 = vadd.f32 %v1836_v48, %v6079_v45 }
 0x18e   : > { %v4440_v41 = vpop.f32.mrf.mxu1  ;;  %v4480_v28 = vpop.f32.mrf.mxu0 }
 0x18f   : > { %v6205_v29 = vadd.f32 %v2092_v10, %v1927_v56  ;;  %v1930_v9 = vadd.f32 %v4440_v41, %v6082_v43 }
 0x190   : > { %v1839_v7 = vpop.f32.mrf.mxu1  ;;  %v2095_v27 = vpop.f32.mrf.mxu0 }
 0x191   : > { %v6208_v32 = vadd.f32 %v4480_v28, %v1930_v9  ;;  %v1928_v12 = vadd.f32 %v1839_v7, %v6089_v17 }
 0x192   : > { %v4443_v21 = vpop.f32.mrf.mxu1  ;;  %v4483_v23 = vpop.f32.mrf.mxu0 }
 0x193   : > { %v6211_v37 = vadd.f32 %v2095_v27, %v1928_v12  ;;  %v1933_v60 = vadd.f32 %v4443_v21, %v6096_v53 }
 0x194   : > { %v1852_v61 = vpop.f32.mrf.mxu1  ;;  %v2108_v45 = vpop.f32.mrf.mxu0 }
 0x195   : > { %v6214_v62 = vadd.f32 %v4483_v23, %v1933_v60  ;;  %v1931_v18 = vadd.f32 %v1852_v61, %v6099_v47 }
 0x196   : > { %v4444_v52 = vpop.f32.mrf.mxu1  ;;  %v4484_v43 = vpop.f32.mrf.mxu0 }
 0x197   : > { %v6217_v8 = vadd.f32 %v2108_v45, %v1931_v18  ;;  %v1934_v11 = vadd.f32 %v4444_v52, %v6102_v50 }
 0x198   : > { %v1855_v0 = vpop.f32.mrf.mxu1  ;;  %v2111_v17 = vpop.f32.mrf.mxu0 }
 0x199   : > { %v6220_v2 = vadd.f32 %v4484_v43, %v1934_v11  ;;  %v1932_v49 = vadd.f32 %v1855_v0, %v6109_v58 }
 0x19a   : > { %v4447_v14 = vpop.f32.mrf.mxu1  ;;  %v4487_v53 = vpop.f32.mrf.mxu0 }
 0x19b   : > { %6696 = vst [vmem:[#allocation12_spill] sm:$0xff] %v6220_v2  ;;  %v6223_v1 = vadd.f32 %v2111_v17, %v1932_v49  ;;  %v1937_v19 = vadd.f32 %v4447_v14, %v6116_v33 }
 0x19c   : > { %v1868_v59 = vpop.f32.mrf.mxu1  ;;  %v2124_v47 = vpop.f32.mrf.mxu0 }
 0x19d   : > { %6697 = vst [vmem:[#allocation13_spill] sm:$0xff] %v6223_v1  ;;  %v6226_v25 = vadd.f32 %v4487_v53, %v1937_v19  ;;  %v1935_v4 = vadd.f32 %v1868_v59, %v6119_v51 }
 0x19e   : > { %v4448_v26 = vpop.f32.mrf.mxu1  ;;  %v4488_v50 = vpop.f32.mrf.mxu0 }
 0x19f   : > { %6698 = vst [vmem:[#allocation14_spill] sm:$0xff] %v6226_v25  ;;  %v6229_v42 = vadd.f32 %v2124_v47, %v1935_v4  ;;  %v1938_v48 = vadd.f32 %v4448_v26, %v6122_v63 }
 0x1a0   : > { %v1871_v10 = vpop.f32.mrf.mxu1  ;;  %v2127_v58 = vpop.f32.mrf.mxu0 }
 0x1a1   : > { %6699 = vst [vmem:[#allocation15_spill] sm:$0xff] %v6229_v42  ;;  %v6232_v56 = vadd.f32 %v4488_v50, %v1938_v48  ;;  %v1936_v41 = vadd.f32 %v1871_v10, %v6129_v36 }
 0x1a2   : > { %v4451_v28 = vpop.f32.mrf.mxu1  ;;  %v4491_v33 = vpop.f32.mrf.mxu0 }
 0x1a3   : > { %6700 = vst [vmem:[#allocation16_spill] sm:$0xff] %v6232_v56  ;;  %v6235_v9 = vadd.f32 %v2127_v58, %v1936_v41  ;;  %v1941_v7 = vadd.f32 %v4451_v28, %v6136_v38 }
 0x1a4   : > { %v1884_v27 = vpop.f32.mrf.mxu1  ;;  %v2140_v51 = vpop.f32.mrf.mxu0 }
 0x1a5   : > { %6701 = vst [vmem:[#allocation17_spill] sm:$0xff] %v6235_v9  ;;  %v6238_v12 = vadd.f32 %v4491_v33, %v1941_v7  ;;  %v1939_v21 = vadd.f32 %v1884_v27, %v6139_v31 }
 0x1a6   : > { %v4452_v23 = vpop.f32.mrf.mxu1  ;;  %v4492_v63 = vpop.f32.mrf.mxu0 }
 0x1a7   : > { %6702 = vst [vmem:[#allocation18_spill] sm:$0xff] %v6238_v12  ;;  %v6241_v60 = vadd.f32 %v2140_v51, %v1939_v21  ;;  %v1942_v61 = vadd.f32 %v4452_v23, %v6142_v5 }
 0x1a8   : > { %v1887_v45 = vpop.f32.mrf.mxu1  ;;  %v2143_v36 = vpop.f32.mrf.mxu0 }
 0x1a9   : > { %6703 = vst [vmem:[#allocation19_spill] sm:$0xff] %v6241_v60  ;;  %v6244_v18 = vadd.f32 %v4492_v63, %v1942_v61  ;;  %v1940_v52 = vadd.f32 %v1887_v45, %v6151_v46 }
 0x1aa   : > { %v4455_v43 = vpop.f32.mrf.mxu1  ;;  %v4495_v38 = vpop.f32.mrf.mxu0 }
 0x1ab   : > { %6704 = vst [vmem:[#allocation20_spill] sm:$0xff] %v6244_v18  ;;  %v6247_v11 = vadd.f32 %v2143_v36, %v1940_v52  ;;  %v1945_v0 = vadd.f32 %v4455_v43, %v6154_v44 }
 0x1ac   : > { %v1900_v17 = vpop.f32.mrf.mxu1  ;;  %v2156_v31 = vpop.f32.mrf.mxu0 }
 0x1ad   : > { %6705 = vst [vmem:[#allocation21_spill] sm:$0xff] %v6247_v11  ;;  %v6250_v49 = vadd.f32 %v4495_v38, %v1945_v0  ;;  %v1943_v14 = vadd.f32 %v1900_v17, %v6157_v22 }
 0x1ae   : > { %v4456_v53 = vpop.f32.mrf.mxu1  ;;  %v4496_v5 = vpop.f32.mrf.mxu0 }
 0x1af   : > { %6706 = vst [vmem:[#allocation22_spill] sm:$0xff] %v6250_v49  ;;  %v6253_v19 = vadd.f32 %v2156_v31, %v1943_v14  ;;  %v1946_v59 = vadd.f32 %v4456_v53, %v6160_v55 }
 0x1b0   : > { %v1903_v47 = vpop.f32.mrf.mxu1  ;;  %v2159_v46 = vpop.f32.mrf.mxu0 }
 0x1b1   : > { %6707 = vst [vmem:[#allocation23_spill] sm:$0xff] %v6253_v19  ;;  %v6256_v4 = vadd.f32 %v4496_v5, %v1946_v59  ;;  %v1944_v26 = vadd.f32 %v1903_v47, %v6163_v57 }
 0x1b2   : > { %v4507_v50 = vpop.f32.mrf.mxu1  ;;  %v6259_v44 = vpop.f32.mrf.mxu0 }
 0x1b3   : > { %6708 = vst [vmem:[#allocation24_spill] sm:$0xff] %v6256_v4  ;;  %v6261_v48 = vadd.f32 %v2159_v46, %v1944_v26 }
 0x1b4   : > { %v2300_v10 = vpop.f32.mrf.mxu1  ;;  %v6263_v58 = vpop.f32.mrf.mxu0 }
 0x1b5   : > { %6709 = vst [vmem:[#allocation25_spill] sm:$0xff] %v6261_v48 }
 0x1b6   : > { %v4508_v22 = vpop.f32.mrf.mxu1  ;;  %v6265_v41 = vpop.f32.mrf.mxu0 }
 0x1b8   : > { %v2303_v28 = vpop.f32.mrf.mxu1  ;;  %v6267_v33 = vpop.f32.mrf.mxu0 }
 0x1ba   : > { %v4511_v55 = vpop.f32.mrf.mxu1  ;;  %v6269_v7 = vpop.f32.mrf.mxu0 }
 0x1bc   : > { %v2316_v27 = vpop.f32.mrf.mxu1  ;;  %v6271_v51 = vpop.f32.mrf.mxu0 }
 0x1be   : > { %v4512_v57 = vpop.f32.mrf.mxu1  ;;  %v6273_v21 = vpop.f32.mrf.mxu0 }
 0x1c0   : > { %v2319_v23 = vpop.f32.mrf.mxu1  ;;  %v6275_v63 = vpop.f32.mrf.mxu0 }
 0x1c2   : > { %v4515_v61 = vpop.f32.mrf.mxu1  ;;  %v6277_v45 = vpop.f32.mrf.mxu0 }
 0x1c4   : > { %v2332_v36 = vpop.f32.mrf.mxu1  ;;  %v6279_v52 = vpop.f32.mrf.mxu0 }
 0x1c6   : > { %v6281_v43 = vpop.f32.mrf.mxu1  ;;  %v6283_v38 = vpop.f32.mrf.mxu0 }
 0x1c8   : > { %v6285_v0 = vpop.f32.mrf.mxu1  ;;  %v6287_v17 = vpop.f32.mrf.mxu0 }
 0x1ca   : > { %v4519_v31 = vpop.f32.mrf.mxu1  ;;  %v6289_v14 = vpop.f32.mrf.mxu0 }
 0x1cc   : > { %v2348_v53 = vpop.f32.mrf.mxu1  ;;  %v6291_v5 = vpop.f32.mrf.mxu0 }
 0x1ce   : > { %v4520_v59 = vpop.f32.mrf.mxu1  ;;  %v6293_v47 = vpop.f32.mrf.mxu0 }
 0x1d0   : > { %v6295_v46 = vpop.f32.mrf.mxu1  ;;  %v6297_v26 = vpop.f32.mrf.mxu0 }
 0x1d2   : > { %v6299_v48 = vpop.f32.mrf.mxu1  ;;  %v6301_v4 = vpop.f32.mrf.mxu0 }
 0x1d4   : > { %v6303_v19 = vpop.f32.mrf.mxu1  ;;  %v6305_v49 = vpop.f32.mrf.mxu0 }
 0x1d5   : > { %6710 = vst [vmem:[#allocation26_spill] sm:$0xff] %v6305_v49 }
 0x1d6   : > { %v6307_v11 = vpop.f32.mrf.mxu1  ;;  %v6309_v18 = vpop.f32.mrf.mxu0 }
 0x1d7   : > { %6711 = vst [vmem:[#allocation27_spill] sm:$0xff] %v6307_v11  ;;  %6712 = vst [vmem:[#allocation28_spill] sm:$0xff] %v6309_v18 }
 0x1d8   : > { %v6311_v60 = vpop.f32.mrf.mxu1  ;;  %v6313_v12 = vpop.f32.mrf.mxu0 }
 0x1d9   : > { %6713 = vst [vmem:[#allocation29_spill] sm:$0xff] %v6311_v60  ;;  %6714 = vst [vmem:[#allocation30_spill] sm:$0xff] %v6313_v12 }
 0x1da   : > { %v6315_v9 = vpop.f32.mrf.mxu1  ;;  %v6317_v56 = vpop.f32.mrf.mxu0 }
 0x1db   : > { %6715 = vst [vmem:[#allocation31_spill] sm:$0xff] %v6315_v9  ;;  %6716 = vst [vmem:[#allocation32_spill] sm:$0xff] %v6317_v56 }
 0x1dc   : > { %v6319_v42 = vpop.f32.mrf.mxu1  ;;  %v6321_v25 = vpop.f32.mrf.mxu0 }
 0x1dd   : > { %6717 = vst [vmem:[#allocation33_spill] sm:$0xff] %v6319_v42  ;;  %6718 = vst [vmem:[#allocation34_spill] sm:$0xff] %v6321_v25 }
 0x1de   : > { %v6323_v1 = vpop.f32.mrf.mxu1  ;;  %v6325_v2 = vpop.f32.mrf.mxu0 }
 0x1df   : > { %6719 = vst [vmem:[#allocation35_spill] sm:$0xff] %v6323_v1  ;;  %6720 = vst [vmem:[#allocation36_spill] sm:$0xff] %v6325_v2 }
 0x1e0   : > { %v6327_v49 = vpop.f32.mrf.mxu1  ;;  %v6329_v11 = vpop.f32.mrf.mxu0 }
 0x1e1   : > { %6721 = vst [vmem:[#allocation37_spill] sm:$0xff] %v6327_v49  ;;  %6722 = vst [vmem:[#allocation38_spill] sm:$0xff] %v6329_v11 }
 0x1e2   : > { %v6331_v18 = vpop.f32.mrf.mxu1  ;;  %v6333_v60 = vpop.f32.mrf.mxu0 }
 0x1e3   : > { %6723 = vst [vmem:[#allocation39_spill] sm:$0xff] %v6331_v18  ;;  %6724 = vst [vmem:[#allocation40_spill] sm:$0xff] %v6333_v60  ;;  %v2429_v60 = vadd.f32 %v4507_v50, %v6166_v40 }
 0x1e4   : > { %v6335_v12 = vpop.f32.mrf.mxu1  ;;  %v6337_v9 = vpop.f32.mrf.mxu0 }
 0x1e5   : > { %6725 = vst [vmem:[#allocation41_spill] sm:$0xff] %v6335_v12  ;;  %6726 = vst [vmem:[#allocation42_spill] sm:$0xff] %v6337_v9  ;;  %v2427_v9 = vadd.f32 %v2300_v10, %v6169_v13  ;;  %v2932_v40 = vadd.f32 %v6259_v44, %v2429_v60 }
 0x1e6   : > { %v6339_v56 = vpop.f32.mrf.mxu1  ;;  %v6341_v42 = vpop.f32.mrf.mxu0 }
 0x1e7   : > { %6727 = vst [vmem:[#allocation43_spill] sm:$0xff] %v6339_v56  ;;  %6728 = vst [vmem:[#allocation44_spill] sm:$0xff] %v6341_v42  ;;  %v2430_v56 = vadd.f32 %v4508_v22, %v6172_v20  ;;  %v2428_v42 = vadd.f32 %v2303_v28, %v6175_v54  ;;  %v2930_v13 = vadd.f32 %v6263_v58, %v2427_v9 }
 0x1e8   : > { %v6343_v25 = vpop.f32.mrf.mxu1  ;;  %v6345_v1 = vpop.f32.mrf.mxu0  ;;  %v2432_v20 = vadd.f32 %v2319_v23, %v6187_v16  ;;  %v2437_v54 = vadd.f32 %v4515_v61, %v6190_v34  ;;  %v2438_v16 = vadd.f32 %v6281_v43, %v6196_v39  ;;  %v2436_v34 = vadd.f32 %v6285_v0, %v6199_v6 }
 0x1e9   : > { %6729 = vst [vmem:[#allocation45_spill] sm:$0xff] %v6343_v25  ;;  %6730 = vst [vmem:[#allocation46_spill] sm:$0xff] %v6345_v1  ;;  %v2433_v25 = vadd.f32 %v4511_v55, %v6178_v3  ;;  %v2933_v3 = vadd.f32 %v6265_v41, %v2430_v56  ;;  %v2931_v50 = vadd.f32 %v6267_v33, %v2428_v42  ;;  %v6392_v56 = vld [vmem:[%s6674_s2] ss:$0 sm:$0xff]  ;;  %v6412_v33 = vld [vmem:[%s6674_s2 + $0x1] ss:$0 sm:$0xff] }
 0x1ea   : > { %v6347_v2 = vpop.f32.mrf.mxu1  ;;  %v6349_v49 = vpop.f32.mrf.mxu0  ;;  %v2441_v42 = vadd.f32 %v4519_v31, %v6202_v24  ;;  %v6395_v44 = vadd.f32 %v6275_v63, %v2432_v20  ;;  %v6398_v39 = vadd.f32 %v6277_v45, %v2437_v54  ;;  %v2443_v41 = vadd.f32 %v6303_v19, %v6217_v8  ;;  %v6737_v31 = vld [vmem:[#allocation27_spill] sm:$0xff]  ;;  %v6740_v20 = vld [vmem:[#allocation14_spill] sm:$0xff] }
 0x1eb   : > { %6731 = vst [vmem:[#allocation47_spill] sm:$0xff] %v6347_v2  ;;  %6732 = vst [vmem:[#allocation48_spill] sm:$0xff] %v6349_v49  ;;  %v2431_v49 = vadd.f32 %v2316_v27, %v6181_v15  ;;  %v2936_v15 = vadd.f32 %v6269_v7, %v2433_v25  ;;  %v2439_v25 = vadd.f32 %v2348_v53, %v6205_v29 }
 0x1ec   : > { %v6351_v11 = vpop.f32.mrf.mxu1  ;;  %v6353_v18 = vpop.f32.mrf.mxu0  ;;  %v2440_v29 = vadd.f32 %v6295_v46, %v6211_v37  ;;  %v6415_v27 = vadd.f32 %v6283_v38, %v2438_v16  ;;  %v6735_v38 = vld [vmem:[#allocation26_spill] sm:$0xff] }
 0x1ed   : > { %6733 = vst [vmem:[#allocation49_spill] sm:$0xff] %v6351_v11  ;;  %6734 = vst [vmem:[#allocation50_spill] sm:$0xff] %v6353_v18  ;;  %v2434_v11 = vadd.f32 %v4512_v57, %v6184_v30  ;;  %v2435_v30 = vadd.f32 %v2332_v36, %v6193_v35  ;;  %v2934_v28 = vadd.f32 %v6271_v51, %v2431_v49 }
 0x1ee   : > { %v6360_v12 = vpop.f32.mrf.mxu1  ;;  %v6362_v1 = vpop.f32.mrf.mxu0  ;;  %v2442_v35 = vadd.f32 %v4520_v59, %v6208_v32  ;;  %v2445_v32 = vadd.f32 %v6299_v48, %v6214_v62  ;;  %v6422_v62 = vadd.f32 %v6289_v14, %v2441_v42  ;;  %v6425_v8 = vadd.f32 %v6291_v5, %v2439_v25 }
 0x1ef   : > { %v6380_v60 = vadd.f32 %v6273_v21, %v2434_v11  ;;  %v6401_v24 = vadd.f32 %v6279_v52, %v2435_v30  ;;  %v6419_v21 = vadd.f32 %v6287_v17, %v2436_v34  ;;  %v6434_v52 = vadd.f32 %v6297_v26, %v2440_v29  ;;  %v6736_v17 = vld [vmem:[#allocation12_spill] sm:$0xff]  ;;  %v6739_v26 = vld [vmem:[#allocation29_spill] sm:$0xff] }
 0x1f0   : > { %v6366_v2 = vpop.f32.mrf.mxu1  ;;  %v6368_v18 = vpop.f32.mrf.mxu0  ;;  %v6428_v19 = vadd.f32 %v6293_v47, %v2442_v35  ;;  %v6437_v43 = vadd.f32 %v6301_v4, %v2445_v32  ;;  %v6440_v0 = vadd.f32 %v6735_v38, %v2443_v41  ;;  %v2446_v14 = vadd.f32 %v6737_v31, %v6736_v17  ;;  %v6741_v4 = vld [vmem:[#allocation31_spill] sm:$0xff]  ;;  %v6742_v34 = vld [vmem:[#allocation28_spill] sm:$0xff]  ;;  %v6743_v32 = vld [vmem:[#allocation30_spill] sm:$0xff] }
 0x1f1   : > { %v2449_v54 = vadd.f32 %v6741_v4, %v6740_v20  ;;  %v6745_v31 = vld [vmem:[#allocation15_spill] sm:$0xff] }
 0x1f2   : > { %v4587_v10 = vpop.f32.mrf.mxu1  ;;  %v4627_v22 = vpop.f32.mrf.mxu0  ;;  %v6452_v42 = vadd.f32 %v6742_v34, %v2446_v14  ;;  %v6746_v14 = vld [vmem:[#allocation33_spill] sm:$0xff] }
 0x1f3   : > { %v3174_v9 = vadd.f32 %v4587_v10, %v2932_v40  ;;  %v6738_v40 = vld [vmem:[#allocation13_spill] sm:$0xff] }
 0x1f4   : > { %v3045_v11 = vpop.f32.mrf.mxu1  ;;  %v3287_v49 = vpop.f32.mrf.mxu0 }
 0x1f5   : > { %v3416_v6 = vadd.f32 %v4627_v22, %v3174_v9  ;;  %v3172_v58 = vadd.f32 %v3045_v11, %v2930_v13  ;;  %v2444_v13 = vadd.f32 %v6739_v26, %v6738_v40 }
 0x1f6   : > { %v4588_v55 = vpop.f32.mrf.mxu1  ;;  %v4628_v7 = vpop.f32.mrf.mxu0 }
 0x1f7   : > { %v3520_v51 = vmul.f32 %v6392_v56, %v3416_v6  ;;  %v3414_v57 = vadd.f32 %v3287_v49, %v3172_v58  ;;  %v3175_v37 = vadd.f32 %v4588_v55, %v2933_v3  ;;  %v6460_v41 = vadd.f32 %v6743_v32, %v2444_v13 }
 0x1f8   : > { %v3048_v48 = vpop.f32.mrf.mxu1  ;;  %v3290_v23 = vpop.f32.mrf.mxu0 }
 0x1f9   : > { %v3557_v63 = vadd.f32 %v6412_v33, %v3520_v51  ;;  %v3518_v61 = vmul.f32 %v6392_v56, %v3414_v57  ;;  %v3417_v45 = vadd.f32 %v4628_v7, %v3175_v37  ;;  %v3173_v36 = vadd.f32 %v3048_v48, %v2931_v50 }
 0x1fa   : > { %v4591_v53 = vpop.f32.mrf.mxu1  ;;  %v4631_v5 = vpop.f32.mrf.mxu0 }
 0x1fb   : > { %vm3589_vm7 = vcmp.ge.f32.partialorder %v3557_v63, 0.0  ;;  %v3621_v59 = vmul.f32 0.1, %v3557_v63  ;;  %v3555_v47 = vadd.f32 %v6412_v33, %v3518_v61  ;;  %v3521_v46 = vmul.f32 %v6392_v56, %v3417_v45 }
 0x1fc   : > { %v3415_v3 = vadd.f32 %v3290_v23, %v3173_v36  ;;  %v3178_v50 = vadd.f32 %v4591_v53, %v2936_v15  ;;  %v3061_v30 = vpop.f32.mrf.mxu1  ;;  %v3303_v10 = vpop.f32.mrf.mxu0  ;;  %v2447_v53 = vadd.f32 %v6746_v14, %v6745_v31 }
 0x1fd   : > { %v3653_v22 = vsel %vm3589_vm7, %v3557_v63, %v3621_v59  ;;  %vm3587_vm8 = vcmp.ge.f32.partialorder %v3555_v47, 0.0  ;;  %v3619_v16 = vmul.f32 0.1, %v3555_v47  ;;  %v3558_v9 = vadd.f32 %v6412_v33, %v3521_v46 }
 0x1fe   : > { %3685 = vst [vmem:[%s6454_s26 + $0x10] sm:$0xff] %v3653_v22  ;;  %v3519_v25 = vmul.f32 %v6392_v56, %v3415_v3  ;;  %v3420_v35 = vadd.f32 %v4631_v5, %v3178_v50  ;;  %v3176_v11 = vadd.f32 %v3061_v30, %v2934_v28  ;;  %v4592_v15 = vpop.f32.mrf.mxu1  ;;  %v4632_v49 = vpop.f32.mrf.mxu0  ;;  %v6744_v28 = vld [vmem:[#allocation32_spill] sm:$0xff]  ;;  %v6748_v30 = vld [vmem:[#allocation35_spill] sm:$0xff] }
 0x1ff   : > { %v3651_v6 = vsel %vm3587_vm8, %v3555_v47, %v3619_v16  ;;  %vm3590_vm9 = vcmp.ge.f32.partialorder %v3558_v9, 0.0  ;;  %v3622_v58 = vmul.f32 0.1, %v3558_v9  ;;  %v3179_v29 = vadd.f32 %v4592_v15, %v6380_v60  ;;  %v6747_v50 = vld [vmem:[#allocation16_spill] sm:$0xff]  ;;  %v6750_v15 = vld [vmem:[#allocation37_spill] sm:$0xff] }
 0x200   : > { %3683 = vst [vmem:[%s6454_s26] sm:$0xff] %v3651_v6  ;;  %v3556_v55 = vadd.f32 %v6412_v33, %v3519_v25  ;;  %v3524_v7 = vmul.f32 %v6392_v56, %v3420_v35  ;;  %v3418_v51 = vadd.f32 %v3303_v10, %v3176_v11  ;;  %v3064_v57 = vpop.f32.mrf.mxu1  ;;  %v3306_v37 = vpop.f32.mrf.mxu0  ;;  %v6466_v48 = vadd.f32 %v6744_v28, %v2449_v54  ;;  %v6749_v11 = vld [vmem:[#allocation17_spill] sm:$0xff] }
 0x201   : > { %v3654_v23 = vsel %vm3590_vm9, %v3558_v9, %v3622_v58  ;;  %v3421_v63 = vadd.f32 %v4632_v49, %v3179_v29  ;;  %v3177_v61 = vadd.f32 %v3064_v57, %v6395_v44  ;;  %v2450_v10 = vadd.f32 %v6748_v30, %v6747_v50  ;;  %v6751_v57 = vld [vmem:[#allocation34_spill] sm:$0xff] }
 0x202   : > { %3686 = vst [vmem:[%s6454_s26 + $0x18] sm:$0xff] %v3654_v23  ;;  %vm3588_vm10 = vcmp.ge.f32.partialorder %v3556_v55, 0.0  ;;  %v3620_v60 = vmul.f32 0.1, %v3556_v55  ;;  %v3561_v45 = vadd.f32 %v6412_v33, %v3524_v7  ;;  %v3522_v36 = vmul.f32 %v6392_v56, %v3418_v51  ;;  %v4595_v38 = vpop.f32.mrf.mxu1  ;;  %v4635_v17 = vpop.f32.mrf.mxu0 }
 0x203   : > { %v3525_v5 = vmul.f32 %v6392_v56, %v3421_v63  ;;  %v3419_v59 = vadd.f32 %v3306_v37, %v3177_v61  ;;  %v3182_v47 = vadd.f32 %v4595_v38, %v6398_v39  ;;  %v6492_v37 = vadd.f32 %v6751_v57, %v2447_v53  ;;  %v6752_v38 = vld [vmem:[#allocation36_spill] sm:$0xff] }
 0x204   : > { %v3652_v46 = vsel %vm3588_vm10, %v3556_v55, %v3620_v60  ;;  %vm3593_vm11 = vcmp.ge.f32.partialorder %v3561_v45, 0.0  ;;  %v3625_v44 = vmul.f32 0.1, %v3561_v45  ;;  %v3559_v40 = vadd.f32 %v6412_v33, %v3522_v36  ;;  %v3077_v26 = vpop.f32.mrf.mxu1  ;;  %v3319_v13 = vpop.f32.mrf.mxu0  ;;  %v6758_v57 = vld [vmem:[#allocation20_spill] sm:$0xff] }
 0x205   : > { %3684 = vst [vmem:[%s6454_s26 + $0x8] sm:$0xff] %v3652_v46  ;;  %v3562_v20 = vadd.f32 %v6412_v33, %v3525_v5  ;;  %v3523_v4 = vmul.f32 %v6392_v56, %v3419_v59  ;;  %v3424_v54 = vadd.f32 %v4635_v17, %v3182_v47  ;;  %v3180_v3 = vadd.f32 %v3077_v26, %v6401_v24 }
 0x206   : > { %v3657_v39 = vsel %vm3593_vm11, %v3561_v45, %v3625_v44  ;;  %vm3591_vm12 = vcmp.ge.f32.partialorder %v3559_v40, 0.0  ;;  %v3623_v22 = vmul.f32 0.1, %v3559_v40  ;;  %v4596_v16 = vpop.f32.mrf.mxu1  ;;  %v4636_v9 = vpop.f32.mrf.mxu0  ;;  %v2448_v24 = vadd.f32 %v6750_v15, %v6749_v11 }
 0x207   : > { %3689 = vst [vmem:[%s6454_s26 + $0x30] sm:$0xff] %v3657_v39  ;;  %vm3594_vm13 = vcmp.ge.f32.partialorder %v3562_v20, 0.0  ;;  %v3626_v34 = vmul.f32 0.1, %v3562_v20  ;;  %v3560_v25 = vadd.f32 %v6412_v33, %v3523_v4  ;;  %v3528_v35 = vmul.f32 %v6392_v56, %v3424_v54  ;;  %v6754_v54 = vld [vmem:[#allocation18_spill] sm:$0xff] }
 0x208   : > { %v3655_v49 = vsel %vm3591_vm12, %v3559_v40, %v3623_v22  ;;  %v3422_v6 = vadd.f32 %v3319_v13, %v3180_v3  ;;  %v3183_v58 = vadd.f32 %v4596_v16, %v6415_v27  ;;  %v3080_v29 = vpop.f32.mrf.mxu1  ;;  %v3322_v32 = vpop.f32.mrf.mxu0  ;;  %v6499_v17 = vadd.f32 %v6752_v38, %v2450_v10  ;;  %v6755_v3 = vld [vmem:[#allocation39_spill] sm:$0xff] }
 0x209   : > { %3687 = vst [vmem:[%s6454_s26 + $0x20] sm:$0xff] %v3655_v49  ;;  %v3658_v55 = vsel %vm3594_vm13, %v3562_v20, %v3626_v34  ;;  %vm3592_vm14 = vcmp.ge.f32.partialorder %v3560_v25, 0.0  ;;  %v3624_v7 = vmul.f32 0.1, %v3560_v25  ;;  %v3565_v51 = vadd.f32 %v6412_v33, %v3528_v35  ;;  %v6757_v49 = vld [vmem:[#allocation41_spill] sm:$0xff] }
 0x20a   : > { %3690 = vst [vmem:[%s6454_s26 + $0x38] sm:$0xff] %v3658_v55  ;;  %v3526_v28 = vmul.f32 %v6392_v56, %v3422_v6  ;;  %v3425_v23 = vadd.f32 %v4636_v9, %v3183_v58  ;;  %v3181_v63 = vadd.f32 %v3080_v29, %v6419_v21  ;;  %v4599_v61 = vpop.f32.mrf.mxu1  ;;  %v4639_v27 = vpop.f32.mrf.mxu0  ;;  %v6753_v21 = vld [vmem:[#allocation38_spill] sm:$0xff]  ;;  %v2453_v50 = vadd.f32 %v6755_v3, %v6754_v54 }
 0x20b   : > { %v3656_v60 = vsel %vm3592_vm14, %v3560_v25, %v3624_v7  ;;  %vm3597_vm15 = vcmp.ge.f32.partialorder %v3565_v51, 0.0  ;;  %v3629_v45 = vmul.f32 0.1, %v3565_v51  ;;  %v3186_v36 = vadd.f32 %v4599_v61, %v6422_v62 }
 0x20c   : > { %3688 = vst [vmem:[%s6454_s26 + $0x28] sm:$0xff] %v3656_v60  ;;  %v3563_v31 = vadd.f32 %v6412_v33, %v3526_v28  ;;  %v3529_v14 = vmul.f32 %v6392_v56, %v3425_v23  ;;  %v3423_v53 = vadd.f32 %v3322_v32, %v3181_v63  ;;  %v3093_v5 = vpop.f32.mrf.mxu1  ;;  %v3335_v59 = vpop.f32.mrf.mxu0  ;;  %v6505_v47 = vadd.f32 %v6753_v21, %v2448_v24  ;;  %v6756_v24 = vld [vmem:[#allocation19_spill] sm:$0xff] }
 0x20d   : > { %v3661_v46 = vsel %vm3597_vm15, %v3565_v51, %v3629_v45  ;;  %v3428_v44 = vadd.f32 %v4639_v27, %v3186_v36  ;;  %v3184_v40 = vadd.f32 %v3093_v5, %v6425_v8  ;;  %v2451_v6 = vadd.f32 %v6757_v49, %v6756_v24  ;;  %v6759_v28 = vld [vmem:[#allocation43_spill] sm:$0xff] }
 0x20e   : > { %3693 = vst [vmem:[%s6454_s26 + $0x50] sm:$0xff] %v3661_v46  ;;  %vm3595_vm0 = vcmp.ge.f32.partialorder %v3563_v31, 0.0  ;;  %v3627_v62 = vmul.f32 0.1, %v3563_v31  ;;  %v3566_v26 = vadd.f32 %v6412_v33, %v3529_v14  ;;  %v3527_v13 = vmul.f32 %v6392_v56, %v3423_v53  ;;  %v4600_v20 = vpop.f32.mrf.mxu1  ;;  %v4640_v4 = vpop.f32.mrf.mxu0 }
 0x20f   : > { %v3532_v30 = vmul.f32 %v6392_v56, %v3428_v44  ;;  %v3426_v10 = vadd.f32 %v3335_v59, %v3184_v40  ;;  %v3187_v39 = vadd.f32 %v4600_v20, %v6428_v19 }
 0x210   : > { %v3659_v22 = vsel %vm3595_vm0, %v3563_v31, %v3627_v62  ;;  %vm3598_vm1 = vcmp.ge.f32.partialorder %v3566_v26, 0.0  ;;  %v3630_v8 = vmul.f32 0.1, %v3566_v26  ;;  %v3564_v16 = vadd.f32 %v6412_v33, %v3527_v13  ;;  %v3096_v9 = vpop.f32.mrf.mxu1  ;;  %v3338_v34 = vpop.f32.mrf.mxu0  ;;  %v6760_v31 = vld [vmem:[#allocation40_spill] sm:$0xff]  ;;  %v6761_v62 = vld [vmem:[#allocation42_spill] sm:$0xff] }
 0x211   : > { %3691 = vst [vmem:[%s6454_s26 + $0x40] sm:$0xff] %v3659_v22  ;;  %v3569_v25 = vadd.f32 %v6412_v33, %v3532_v30  ;;  %v3530_v35 = vmul.f32 %v6392_v56, %v3426_v10  ;;  %v3429_v11 = vadd.f32 %v4640_v4, %v3187_v39  ;;  %v3185_v15 = vadd.f32 %v3096_v9, %v6434_v52 }
 0x212   : > { %v3662_v19 = vsel %vm3598_vm1, %v3566_v26, %v3630_v8  ;;  %vm3596_vm2 = vcmp.ge.f32.partialorder %v3564_v16, 0.0  ;;  %v3628_v58 = vmul.f32 0.1, %v3564_v16  ;;  %v4603_v29 = vpop.f32.mrf.mxu1  ;;  %v4643_v32 = vpop.f32.mrf.mxu0  ;;  %v2454_v52 = vadd.f32 %v6759_v28, %v6758_v57  ;;  %v6766_v57 = vld [vmem:[#allocation47_spill] sm:$0xff] }
 0x213   : > { %3694 = vst [vmem:[%s6454_s26 + $0x58] sm:$0xff] %v3662_v19  ;;  %vm3601_vm3 = vcmp.ge.f32.partialorder %v3569_v25, 0.0  ;;  %v3633_v55 = vmul.f32 0.1, %v3569_v25  ;;  %v3567_v7 = vadd.f32 %v6412_v33, %v3530_v35  ;;  %v3533_v51 = vmul.f32 %v6392_v56, %v3429_v11 }
 0x214   : > { %v3660_v23 = vsel %vm3596_vm2, %v3564_v16, %v3628_v58  ;;  %v3427_v63 = vadd.f32 %v3338_v34, %v3185_v15  ;;  %v3190_v61 = vadd.f32 %v4603_v29, %v6437_v43  ;;  %v3109_v27 = vpop.f32.mrf.mxu1  ;;  %v3351_v60 = vpop.f32.mrf.mxu0  ;;  %v6531_v14 = vadd.f32 %v6760_v31, %v2453_v50  ;;  %v6763_v34 = vld [vmem:[#allocation21_spill] sm:$0xff] }
 0x215   : > { %3692 = vst [vmem:[%s6454_s26 + $0x48] sm:$0xff] %v3660_v23  ;;  %v3665_v45 = vsel %vm3601_vm3, %v3569_v25, %v3633_v55  ;;  %vm3599_vm4 = vcmp.ge.f32.partialorder %v3567_v7, 0.0  ;;  %v3631_v36 = vmul.f32 0.1, %v3567_v7  ;;  %v3570_v38 = vadd.f32 %v6412_v33, %v3533_v51  ;;  %v6764_v25 = vld [vmem:[#allocation45_spill] sm:$0xff]  ;;  %v6765_v51 = vld [vmem:[#allocation22_spill] sm:$0xff] }
 0x216   : > { %3697 = vst [vmem:[%s6454_s26 + $0x70] sm:$0xff] %v3665_v45  ;;  %v3531_v53 = vmul.f32 %v6392_v56, %v3427_v63  ;;  %v3432_v5 = vadd.f32 %v4643_v32, %v3190_v61  ;;  %v3188_v59 = vadd.f32 %v3109_v27, %v6440_v0  ;;  %v4604_v21 = vpop.f32.mrf.mxu1  ;;  %v4644_v43 = vpop.f32.mrf.mxu0  ;;  %v6538_v26 = vadd.f32 %v6761_v62, %v2451_v6  ;;  %v6762_v0 = vld [vmem:[#allocation44_spill] sm:$0xff]  ;;  %v6767_v45 = vld [vmem:[#allocation23_spill] sm:$0xff] }
 0x217   : > { %v3663_v46 = vsel %vm3599_vm4, %v3567_v7, %v3631_v36  ;;  %vm3602_vm5 = vcmp.ge.f32.partialorder %v3570_v38, 0.0  ;;  %v3634_v44 = vmul.f32 0.1, %v3570_v38  ;;  %v3191_v40 = vadd.f32 %v4604_v21, %v6452_v42  ;;  %v6768_v36 = vld [vmem:[#allocation49_spill] sm:$0xff] }
 0x218   : > { %3695 = vst [vmem:[%s6454_s26 + $0x60] sm:$0xff] %v3663_v46  ;;  %v3568_v13 = vadd.f32 %v6412_v33, %v3531_v53  ;;  %v3536_v20 = vmul.f32 %v6392_v56, %v3432_v5  ;;  %v3430_v4 = vadd.f32 %v3351_v60, %v3188_v59  ;;  %v3112_v54 = vpop.f32.mrf.mxu1  ;;  %v3354_v3 = vpop.f32.mrf.mxu0  ;;  %v6544_v50 = vadd.f32 %v6762_v0, %v2454_v52 }
 0x219   : > { %v3666_v30 = vsel %vm3602_vm5, %v3570_v38, %v3634_v44  ;;  %v3433_v10 = vadd.f32 %v4644_v43, %v3191_v40  ;;  %v3189_v39 = vadd.f32 %v3112_v54, %v6460_v41  ;;  %v2452_v35 = vadd.f32 %v6764_v25, %v6763_v34  ;;  %v6769_v44 = vld [vmem:[#allocation46_spill] sm:$0xff] }
 0x21a   : > { %3698 = vst [vmem:[%s6454_s26 + $0x78] sm:$0xff] %v3666_v30  ;;  %vm3600_vm6 = vcmp.ge.f32.partialorder %v3568_v13, 0.0  ;;  %v3632_v42 = vmul.f32 0.1, %v3568_v13  ;;  %v3573_v22 = vadd.f32 %v6412_v33, %v3536_v20  ;;  %v3534_v8 = vmul.f32 %v6392_v56, %v3430_v4  ;;  %v4607_v16 = vpop.f32.mrf.mxu1  ;;  %v4647_v9 = vpop.f32.mrf.mxu0  ;;  %v6770_v30 = vld [vmem:[#allocation48_spill] sm:$0xff] }
 0x21b   : > { %v3537_v11 = vmul.f32 %v6392_v56, %v3433_v10  ;;  %v3431_v15 = vadd.f32 %v3354_v3, %v3189_v39  ;;  %v3194_v24 = vadd.f32 %v4607_v16, %v6466_v48  ;;  %v2457_v28 = vadd.f32 %v6766_v57, %v6765_v51 }
 0x21c   : > { %v3664_v49 = vsel %vm3600_vm6, %v3568_v13, %v3632_v42  ;;  %vm3605_vm7 = vcmp.ge.f32.partialorder %v3573_v22, 0.0  ;;  %v3637_v41 = vmul.f32 0.1, %v3573_v22  ;;  %v3571_v6 = vadd.f32 %v6412_v33, %v3534_v8  ;;  %v3125_v19 = vpop.f32.mrf.mxu1  ;;  %v3367_v58 = vpop.f32.mrf.mxu0 }
 0x21d   : > { %3696 = vst [vmem:[%s6454_s26 + $0x68] sm:$0xff] %v3664_v49  ;;  %v3574_v29 = vadd.f32 %v6412_v33, %v3537_v11  ;;  %v3535_v32 = vmul.f32 %v6392_v56, %v3431_v15  ;;  %v3436_v55 = vadd.f32 %v4647_v9, %v3194_v24  ;;  %v3192_v7 = vadd.f32 %v3125_v19, %v6492_v37  ;;  %v6771_v9 = vld [vmem:[#allocation50_spill] sm:$0xff] }
 0x21e   : > { %v3669_v48 = vsel %vm3605_vm7, %v3573_v22, %v3637_v41  ;;  %vm3603_vm8 = vcmp.ge.f32.partialorder %v3571_v6, 0.0  ;;  %v3635_v52 = vmul.f32 0.1, %v3571_v6  ;;  %v4608_v23 = vpop.f32.mrf.mxu1  ;;  %v4648_v63 = vpop.f32.mrf.mxu0  ;;  %v2455_v37 = vadd.f32 %v6768_v36, %v6767_v45  ;;  %v6772_v41 = vld [vmem:[#allocation24_spill] sm:$0xff] }
 0x21f   : > { %3701 = vst [vmem:[%s6454_s26 + $0x90] sm:$0xff] %v3669_v48  ;;  %vm3606_vm9 = vcmp.ge.f32.partialorder %v3574_v29, 0.0  ;;  %v3638_v61 = vmul.f32 0.1, %v3574_v29  ;;  %v3572_v27 = vadd.f32 %v6412_v33, %v3535_v32  ;;  %v3540_v60 = vmul.f32 %v6392_v56, %v3436_v55 }
 0x220   : > { %v3667_v38 = vsel %vm3603_vm8, %v3571_v6, %v3635_v52  ;;  %v3434_v31 = vadd.f32 %v3367_v58, %v3192_v7  ;;  %v3195_v53 = vadd.f32 %v4608_v23, %v6499_v17  ;;  %v3128_v5 = vpop.f32.mrf.mxu1  ;;  %v3370_v59 = vpop.f32.mrf.mxu0  ;;  %v2955_v40 = vadd.f32 %v6769_v44, %v2452_v35  ;;  %v6773_v52 = vld [vmem:[#allocation25_spill] sm:$0xff] }
 0x221   : > { %3699 = vst [vmem:[%s6454_s26 + $0x80] sm:$0xff] %v3667_v38  ;;  %v3670_v21 = vsel %vm3606_vm9, %v3574_v29, %v3638_v61  ;;  %vm3604_vm10 = vcmp.ge.f32.partialorder %v3572_v27, 0.0  ;;  %v3636_v43 = vmul.f32 0.1, %v3572_v27  ;;  %v3577_v46 = vadd.f32 %v6412_v33, %v3540_v60 }
 0x222   : > { %3702 = vst [vmem:[%s6454_s26 + $0x98] sm:$0xff] %v3670_v21  ;;  %v3538_v62 = vmul.f32 %v6392_v56, %v3434_v31  ;;  %v3437_v13 = vadd.f32 %v4648_v63, %v3195_v53  ;;  %v3193_v20 = vadd.f32 %v3128_v5, %v6505_v47  ;;  %v4611_v4 = vpop.f32.mrf.mxu1  ;;  %v4651_v54 = vpop.f32.mrf.mxu0  ;;  %v2960_v10 = vadd.f32 %v6770_v30, %v2457_v28 }
 0x223   : > { %v3668_v17 = vsel %vm3604_vm10, %v3572_v27, %v3636_v43  ;;  %vm3609_vm11 = vcmp.ge.f32.partialorder %v3577_v46, 0.0  ;;  %v3641_v3 = vmul.f32 0.1, %v3577_v46  ;;  %v3198_v0 = vadd.f32 %v4611_v4, %v6531_v14 }
 0x224   : > { %3700 = vst [vmem:[%s6454_s26 + $0x88] sm:$0xff] %v3668_v17  ;;  %v3575_v39 = vadd.f32 %v6412_v33, %v3538_v62  ;;  %v3541_v42 = vmul.f32 %v6392_v56, %v3437_v13  ;;  %v3435_v22 = vadd.f32 %v3370_v59, %v3193_v20  ;;  %v3141_v8 = vpop.f32.mrf.mxu1  ;;  %v3383_v16 = vpop.f32.mrf.mxu0  ;;  %v2958_v47 = vadd.f32 %v6771_v9, %v2455_v37 }
 0x225   : > { %v3673_v34 = vsel %vm3609_vm11, %v3577_v46, %v3641_v3  ;;  %v3440_v25 = vadd.f32 %v4651_v54, %v3198_v0  ;;  %v3196_v35 = vadd.f32 %v3141_v8, %v6538_v26  ;;  %v2458_v6 = vadd.f32 %v6360_v12, %v6772_v41 }
 0x226   : > { %3705 = vst [vmem:[%s6454_s26 + $0xb0] sm:$0xff] %v3673_v34  ;;  %vm3607_vm12 = vcmp.ge.f32.partialorder %v3575_v39, 0.0  ;;  %v3639_v14 = vmul.f32 0.1, %v3575_v39  ;;  %v3578_v11 = vadd.f32 %v6412_v33, %v3541_v42  ;;  %v3539_v15 = vmul.f32 %v6392_v56, %v3435_v22  ;;  %v4612_v24 = vpop.f32.mrf.mxu1  ;;  %v4652_v49 = vpop.f32.mrf.mxu0 }
 0x227   : > { %v3544_v19 = vmul.f32 %v6392_v56, %v3440_v25  ;;  %v3438_v58 = vadd.f32 %v3383_v16, %v3196_v35  ;;  %v3199_v29 = vadd.f32 %v4612_v24, %v6544_v50  ;;  %v2456_v23 = vadd.f32 %v6366_v2, %v6773_v52 }
 0x228   : > { %v3671_v32 = vsel %vm3607_vm12, %v3575_v39, %v3639_v14  ;;  %vm3610_vm13 = vcmp.ge.f32.partialorder %v3578_v11, 0.0  ;;  %v3642_v26 = vmul.f32 0.1, %v3578_v11  ;;  %v3576_v55 = vadd.f32 %v6412_v33, %v3539_v15  ;;  %v3144_v7 = vpop.f32.mrf.mxu1  ;;  %v3386_v51 = vpop.f32.mrf.mxu0 }
 0x229   : > { %3703 = vst [vmem:[%s6454_s26 + $0xa0] sm:$0xff] %v3671_v32  ;;  %v3581_v57 = vadd.f32 %v6412_v33, %v3544_v19  ;;  %v3542_v28 = vmul.f32 %v6392_v56, %v3438_v58  ;;  %v3441_v48 = vadd.f32 %v4652_v49, %v3199_v29  ;;  %v3197_v12 = vadd.f32 %v3144_v7, %v2955_v40 }
 0x22a   : > { %v3674_v63 = vsel %vm3610_vm13, %v3578_v11, %v3642_v26  ;;  %vm3608_vm14 = vcmp.ge.f32.partialorder %v3576_v55, 0.0  ;;  %v3640_v50 = vmul.f32 0.1, %v3576_v55  ;;  %v4615_v61 = vpop.f32.mrf.mxu1  ;;  %v4655_v27 = vpop.f32.mrf.mxu0  ;;  %v2961_v37 = vadd.f32 %v6362_v1, %v2458_v6 }
 0x22b   : > { %3706 = vst [vmem:[%s6454_s26 + $0xb8] sm:$0xff] %v3674_v63  ;;  %vm3613_vm15 = vcmp.ge.f32.partialorder %v3581_v57, 0.0  ;;  %v3645_v60 = vmul.f32 0.1, %v3581_v57  ;;  %v3579_v45 = vadd.f32 %v6412_v33, %v3542_v28  ;;  %v3545_v36 = vmul.f32 %v6392_v56, %v3441_v48 }
 0x22c   : > { %v3672_v38 = vsel %vm3608_vm14, %v3576_v55, %v3640_v50  ;;  %v3439_v31 = vadd.f32 %v3386_v51, %v3197_v12  ;;  %v3202_v53 = vadd.f32 %v4615_v61, %v2960_v10  ;;  %v3157_v2 = vpop.f32.mrf.mxu1  ;;  %v3399_v5 = vpop.f32.mrf.mxu0  ;;  %v2959_v46 = vadd.f32 %v6368_v18, %v2456_v23 }
 0x22d   : > { %3704 = vst [vmem:[%s6454_s26 + $0xa8] sm:$0xff] %v3672_v38  ;;  %v3677_v59 = vsel %vm3613_vm15, %v3581_v57, %v3645_v60  ;;  %vm3611_vm0 = vcmp.ge.f32.partialorder %v3579_v45, 0.0  ;;  %v3643_v21 = vmul.f32 0.1, %v3579_v45  ;;  %v3582_v43 = vadd.f32 %v6412_v33, %v3545_v36 }
 0x22e   : > { %3709 = vst [vmem:[%s6454_s26 + $0xd0] sm:$0xff] %v3677_v59  ;;  %v3543_v44 = vmul.f32 %v6392_v56, %v3439_v31  ;;  %v3444_v40 = vadd.f32 %v4655_v27, %v3202_v53  ;;  %v3200_v1 = vadd.f32 %v3157_v2, %v2958_v47  ;;  %v4616_v62 = vpop.f32.mrf.mxu1  ;;  %v4656_v13 = vpop.f32.mrf.mxu0 }
 0x22f   : > { %v3675_v20 = vsel %vm3611_vm0, %v3579_v45, %v3643_v21  ;;  %vm3614_vm1 = vcmp.ge.f32.partialorder %v3582_v43, 0.0  ;;  %v3646_v4 = vmul.f32 0.1, %v3582_v43  ;;  %v3203_v54 = vadd.f32 %v4616_v62, %v2961_v37 }
 0x230   : > { %3707 = vst [vmem:[%s6454_s26 + $0xc0] sm:$0xff] %v3675_v20  ;;  %v3580_v17 = vadd.f32 %v6412_v33, %v3543_v44  ;;  %v3548_v3 = vmul.f32 %v6392_v56, %v3444_v40  ;;  %v3442_v0 = vadd.f32 %v3399_v5, %v3200_v1  ;;  %v3160_v30 = vpop.f32.mrf.mxu1  ;;  %v3402_v16 = vpop.f32.mrf.mxu0 }
 0x231   : > { %v3678_v18 = vsel %vm3614_vm1, %v3582_v43, %v3646_v4  ;;  %v3445_v10 = vadd.f32 %v4656_v13, %v3203_v54  ;;  %v3201_v39 = vadd.f32 %v3160_v30, %v2959_v46 }
 0x232   : > { %3710 = vst [vmem:[%s6454_s26 + $0xd8] sm:$0xff] %v3678_v18  ;;  %vm3612_vm2 = vcmp.ge.f32.partialorder %v3580_v17, 0.0  ;;  %v3644_v42 = vmul.f32 0.1, %v3580_v17  ;;  %v3585_v22 = vadd.f32 %v6412_v33, %v3548_v3  ;;  %v3546_v8 = vmul.f32 %v6392_v56, %v3442_v0 }
 0x233   : > { %v3549_v9 = vmul.f32 %v6392_v56, %v3445_v10  ;;  %v3443_v47 = vadd.f32 %v3402_v16, %v3201_v39 }
 0x234   : > { %v3676_v34 = vsel %vm3612_vm2, %v3580_v17, %v3644_v42  ;;  %vm3617_vm3 = vcmp.ge.f32.partialorder %v3585_v22, 0.0  ;;  %v3649_v25 = vmul.f32 0.1, %v3585_v22  ;;  %v3583_v35 = vadd.f32 %v6412_v33, %v3546_v8 }
 0x235   : > { %3708 = vst [vmem:[%s6454_s26 + $0xc8] sm:$0xff] %v3676_v34  ;;  %v3586_v14 = vadd.f32 %v6412_v33, %v3549_v9  ;;  %v3547_v11 = vmul.f32 %v6392_v56, %v3443_v47 }
 0x236   : > { %v3681_v15 = vsel %vm3617_vm3, %v3585_v22, %v3649_v25  ;;  %vm3615_vm4 = vcmp.ge.f32.partialorder %v3583_v35, 0.0  ;;  %v3647_v24 = vmul.f32 0.1, %v3583_v35 }
 0x237   : > { %3713 = vst [vmem:[%s6454_s26 + $0xf0] sm:$0xff] %v3681_v15  ;;  %vm3618_vm5 = vcmp.ge.f32.partialorder %v3586_v14, 0.0  ;;  %v3650_v49 = vmul.f32 0.1, %v3586_v14  ;;  %v3584_v41 = vadd.f32 %v6412_v33, %v3547_v11 }
 0x238   : > { %v3679_v6 = vsel %vm3615_vm4, %v3583_v35, %v3647_v24 }
 0x239   : > { %3711 = vst [vmem:[%s6454_s26 + $0xe0] sm:$0xff] %v3679_v6  ;;  %v3682_v19 = vsel %vm3618_vm5, %v3586_v14, %v3650_v49  ;;  %vm3616_vm6 = vcmp.ge.f32.partialorder %v3584_v41, 0.0  ;;  %v3648_v58 = vmul.f32 0.1, %v3584_v41 }
 0x23a   : > { %3714 = vst [vmem:[%s6454_s26 + $0xf8] sm:$0xff] %v3682_v19 }
 0x23b   : > { %v3680_v56 = vsel %vm3616_vm6, %v3584_v41, %v3648_v58 }
 0x23c   : > { %3712 = vst [vmem:[%s6454_s26 + $0xe8] sm:$0xff] %v3680_v56 }
 0x23d   : > { %4872 = shalt.err (!%p4869_p5)
}
 0x23e   : > { %s4873_s21 = scalar_lea.hbm %s6621_s7, 4096  ;;  %s4877_s24 = scalar_lea.hbm %s6675_s3, 12288 }
 0x23f   : > { %p4874_p7 = scmp.ne.s32.totalorder %s6621_s7, %s4873_s21  ;;  %p4878_p11 = scmp.lt.s32.totalorder %s6621_s7, %s6675_s3 }
 0x240   : > { %p4879_p12 = scmp.lt.s32.totalorder %s4877_s24, %s4873_s21 }
 0x241   : > { %p4875_p6 = pnand %p4874_p7, %p5057_p13 }
 0x242   : > { %p4880_p0 = por %p4879_p12, %p4878_p11 }
 0x243   : > { %p4876_p9 = pneg %p4875_p6 }
 0x245   : > { %p4881_p1 = pnand %p4880_p0, %p4876_p9 }
 0x247   : > { %4884 = shalt.err (!%p4881_p1)
}
 0x248   : > { %s4950_s26 = smov 128   ;;  %s4951_s27 = smov 8  }
 0x249   : > { %4674 = dma.vmem_to_hbm [thread:$0]  (%p5057_p13), %s6623_s5, 4096, %s6621_s7, %s3716_s15, %s4950_s26, %s4950_s26, %s4951_s27  }
 0x24a PF: > { %p4691_p4 = scmp.ge.s32.totalorder %s4943_s17, 2  ;;  %s3745_s6 = sand.u32 1, %s4923_s12  }
 0x24b   : > { %p6774_p8 = scmp.ne.s32.totalorder %s6680_s23, 0  ;;  %s3746_s9 = scalar_lea.sflag [#allocation5], %s3745_s6 }
 0x24d   : > { %p4685_p3 = pnand %p4691_p4, %p6774_p8 }
 0x24f   : > { %p4686_p10 = pneg %p4685_p3 }
 0x251   : > { %4918 = dma.done.wait (%p4686_p10), %s3746_s9, 4096  }
 0x252   : > { %4920 = vsyncadd (%p4686_p10), %s3746_s9, 4294963200  ;;  %s20_s17 = sadd.s32 1, %s4943_s17   ;;  %s6775_s12 = smov %s4927_s13 }
 0x253   : > { %p17_p2 = scmp.ge.s32.totalorder %s20_s17, 5   ;;  %s6776_s13 = smov %s4931_s14 }
 0x254   : > { %s6777_s14 = smov %s5066_s18  ;;  %s6778_s15 = smov %s4939_s16 }
 0x255   : > { %s6779_s16 = smov %s6781_s28  ;;  %19 = sbr.rel (!%p17_p2) target bundleno = 7 (0x7), region = 101 }
 0x25a   :  { %3751 = vsyncpa [#allocation4], 1 }
 0x25b   :  { %3753 = vsyncpa [#allocation4 + $0x1], 1 }
 0x25c   :  { %3754 = vsyncpa [#allocation7], 1 }
 0x25d   :  { %3755 = vsyncpa [#allocation5], 1 }
 0x25e   :  { %3757 = vsyncpa [#allocation5 + $0x1], 1 }

</bundles_post_ra>
